<compile_context>
chip_gen: v7x
topology: tpu7x:2x2x1
jax: 0.10.0
libtpu: 0.0.40
codegen_flags: <defaults>
</compile_context>

<pallas_src>
import math

import jax
import jax.numpy as jnp
from jax.experimental import pallas as pl
from jax.experimental.pallas import tpu as pltpu


def _round_up(x, m):
    return (x + m - 1) // m * m


# --------------------------- fused block kernel -----------------------------

def _make_block_kernel(*, stride, Ho, Wo, Cin, C1, C2p, hp2, TR):
    """Kernel body for one batch sample (one grid step)."""
    n_chunks = Ho // TR
    TRW = TR * Wo

    def tap_start(dy, dx):
        # (row, col) start of tap (dy, dx) in the (parity-folded) padded input
        if stride == 1:
            return dy, dx
        plane = 2 * (dy % 2) + (dx % 2)           # stride 2: 4 parity planes
        return plane * hp2 + dy // 2, dx // 2     # planes stacked on the row axis

    def kernel(x_ref, w1_ref, b1_ref, w2_ref, b2_ref, ws_ref, bs_ref,
               o_ref, pad_ref):
        # ---- re-zero only the 1-tap halo of the conv2 scratch (interior is
        #      fully overwritten below); aligned 8-wide column blocks ----
        pad_ref[0] = jnp.zeros((Wo + 16, C1), pad_ref.dtype)
        pad_ref[Ho + 1] = jnp.zeros((Wo + 16, C1), pad_ref.dtype)
        pad_ref[1:Ho + 1, 0:8, :] = jnp.zeros((Ho, 8, C1), pad_ref.dtype)
        pad_ref[1:Ho + 1, Wo + 8:Wo + 16, :] = jnp.zeros((Ho, 8, C1), pad_ref.dtype)

        # ---- conv1 (+bn1+relu): 9 per-tap bf16 MXU matmuls, f32 accumulate ----
        def conv1_chunk(r0):                      # r0 = first output row of chunk
            acc = jnp.zeros((TRW, C1), jnp.float32)
            k = 0
            for dy in range(3):
                for dx in range(3):
                    rs, cs = tap_start(dy, dx)
                    t = x_ref[0, pl.ds(rs + r0, TR), cs:cs + Wo, :]   # bf16 [TR,Wo,Cin]
                    acc += jnp.dot(t.reshape(TRW, Cin), w1_ref[k],
                                   preferred_element_type=jnp.float32)
                    k += 1
            h1 = jnp.maximum(acc + b1_ref[...], 0.0)                  # folded bn1 + relu
            pad_ref[pl.ds(1 + r0, TR), 8:8 + Wo, :] = (
                h1.reshape(TR, Wo, C1).astype(pad_ref.dtype))

        # ---- conv2 (+bn2) + residual matmul + relu ----
        def conv2_chunk(r0):
            acc = jnp.zeros((TRW, C2p), jnp.float32)
            k = 0
            for dy in range(3):
                for dx in range(3):
                    t = pad_ref[pl.ds(r0 + dy, TR), 7 + dx:7 + dx + Wo, :]  # bf16
                    acc += jnp.dot(t.reshape(TRW, C1), w2_ref[k],
                                   preferred_element_type=jnp.float32)
                    k += 1
            # residual: folded (1x1 conv stride s + BN) or padded identity,
            # reusing the already-resident center tap of the 3x3 window.
            rs, cs = tap_start(1, 1)
            ctr = x_ref[0, pl.ds(rs + r0, TR), cs:cs + Wo, :].reshape(TRW, Cin)
            res = jnp.dot(ctr, ws_ref[...], preferred_element_type=jnp.float32)
            out = acc + b2_ref[...] + res + bs_ref[...]
            o_ref[0, pl.ds(r0 * Wo, TRW), :] = (
                jnp.maximum(out, 0.0).astype(o_ref.dtype))

        if n_chunks == 1:                         # small maps: straight-line body
            conv1_chunk(0)
            conv2_chunk(0)
        else:                                     # large maps: chunked output rows
            @pl.loop(0, n_chunks)
            def _(c):
                conv1_chunk(c * TR)

            @pl.loop(0, n_chunks)
            def _(c):
                conv2_chunk(c * TR)

    return kernel


# --------------------------------- wrapper ----------------------------------

def _fold_bn(w, bn, eps=1e-5):
    """Fold inference-mode BatchNorm (running stats) into conv weight/bias."""
    gamma, beta, mean, var = bn
    s = gamma * jax.lax.rsqrt(var + eps)
    return (w * s).astype(jnp.bfloat16), (beta - mean * s).astype(jnp.float32)


def residual_block_nhwc(x_nhwc, p):
    """Fused ResidualBlock forward. NHWC in/out, activations carried in bf16."""
    # TODO(synk): BatchNorm is folded as inference-mode (running-stats) affine;
    # training-mode batch statistics are not computed in-kernel.
    stride = p['stride']
    has_down = 'wd' in p
    x = x_nhwc.astype(jnp.bfloat16)
    N, H, W, Cin = x.shape
    assert H % stride == 0 and W % stride == 0
    Ho, Wo = H // stride, W // stride
    assert Wo % 8 == 0, "W/stride must be a multiple of 8 for the VMEM layout"
    C1 = p['w1'].shape[-1]
    C2 = p['w2'].shape[-1]
    if not has_down:
        assert stride == 1 and Cin == C2, "identity skip needs stride=1, Cin==Cout"
    C2p = _round_up(C2, 128)          # lane-dense output slab, sliced off below
    M = Ho * Wo

    # spatial zero-pad; stride-2 folds into 4 parity planes so every kernel tap
    # is a contiguous (unstrided) slice.  Done in bf16 (half the HBM bytes).
    # TODO(synk): for a full ResNet this pad / parity fold should be fused into
    # the previous block's output store instead of a separate HBM pass.
    xp = jnp.pad(x, ((0, 0), (1, 1), (1, 1), (0, 0)))
    if stride == 1:
        planes, hp2 = xp, None                                    # [N, H+2, W+2, Cin]
    else:
        assert stride == 2, "only stride 1 and 2 are supported"
        hp2, wp2 = (H + 2) // 2, (W + 2) // 2
        planes = jnp.stack([xp[:, py::2, px::2, :] for py in (0, 1) for px in (0, 1)],
                           axis=1).reshape(N, 4 * hp2, wp2, Cin)

    # fold BN scale into conv weights; per-tap weight layout (9, Cin, Cout)
    w1f, b1 = _fold_bn(p['w1'], p['bn1'])
    w1f = w1f.reshape(9, Cin, C1)
    b1 = b1.reshape(1, C1)

    w2f, b2 = _fold_bn(p['w2'], p['bn2'])
    w2f = jnp.pad(w2f.reshape(9, C1, C2), ((0, 0), (0, 0), (0, C2p - C2)))
    b2 = jnp.pad(b2.reshape(1, C2), ((0, 0), (0, C2p - C2)))

    if has_down:                               # standard 1x1-conv + BN downsample
        wsf, bs = _fold_bn(p['wd'], p['bnd'])
        wsf = jnp.pad(wsf.reshape(Cin, C2), ((0, 0), (0, C2p - C2)))
        bs = jnp.pad(bs.reshape(1, C2), ((0, 0), (0, C2p - C2)))
    else:                                      # identity skip as a padded eye matmul
        wsf = jnp.pad(jnp.eye(Cin, dtype=jnp.bfloat16), ((0, 0), (0, C2p - Cin)))
        bs = jnp.zeros((1, C2p), jnp.float32)

    args = [planes, w1f, b1, w2f, b2, wsf, bs]
    in_specs = [
        pl.BlockSpec((1,) + planes.shape[1:], lambda i: (i, 0, 0, 0)),
        pl.BlockSpec(w1f.shape, lambda i: (0, 0, 0)),
        pl.BlockSpec(b1.shape, lambda i: (0, 0)),
        pl.BlockSpec(w2f.shape, lambda i: (0, 0, 0)),
        pl.BlockSpec(b2.shape, lambda i: (0, 0)),
        pl.BlockSpec(wsf.shape, lambda i: (0, 0)),
        pl.BlockSpec(bs.shape, lambda i: (0, 0)),
    ]

    # spatial row-chunking: keep the per-chunk f32 accumulators bounded.
    TR = Ho
    if Ho * Wo > 2048:
        TR = 1
        for d in range(2, Ho + 1):
            if Ho % d == 0 and d * Wo <= 2048:
                TR = d

    kernel = _make_block_kernel(stride=stride, Ho=Ho, Wo=Wo, Cin=Cin, C1=C1,
                                C2p=C2p, hp2=hp2, TR=TR)

    # per-step VMEM footprint (double-buffered I/O blocks + weights + scratch)
    def nbytes(shape, dtype):
        return math.prod(shape) * jnp.dtype(dtype).itemsize

    footprint = (2 * nbytes((1,) + planes.shape[1:], jnp.bfloat16)
                 + 2 * nbytes((1, M, C2p), jnp.bfloat16)
                 + nbytes((Ho + 2, Wo + 16, C1), jnp.bfloat16)
                 + 2 * sum(nbytes(a.shape, a.dtype) for a in args[1:]))
    vmem_limit = int(min(2 * footprint + (8 << 20), 60 << 20))

    out = pl.pallas_call(
        kernel,
        out_shape=jax.ShapeDtypeStruct((N, M, C2p), jnp.bfloat16),
        grid_spec=pltpu.PrefetchScalarGridSpec(
            num_scalar_prefetch=0,
            grid=(N,),
            in_specs=in_specs,
            out_specs=pl.BlockSpec((1, M, C2p), lambda i: (i, 0, 0)),
            scratch_shapes=[pltpu.VMEM((Ho + 2, Wo + 16, C1), jnp.bfloat16)],
        ),
        compiler_params=pltpu.CompilerParams(
            dimension_semantics=("parallel",),
            vmem_limit_bytes=vmem_limit),
    )(*args)

    return out[:, :, :C2].reshape(N, Ho, Wo, C2)          # NHWC, bf16


def residual_block_forward(x_nchw, p):
    """PyTorch-layout (NCHW) convenience wrapper around the NHWC kernel."""
    y = residual_block_nhwc(jnp.transpose(x_nchw, (0, 2, 3, 1)), p)
    return jnp.transpose(y, (0, 3, 1, 2)).astype(x_nchw.dtype)


# -------------------- deterministic params & JAX reference ------------------

def init_block_params(key, cin, cout, stride):
    ks = jax.random.split(key, 6)

    def bn_params(k, c):
        k1, k2, k3, k4 = jax.random.split(k, 4)
        return (1.0 + 0.1 * jax.random.normal(k1, (c,), jnp.float32),
                0.1 * jax.random.normal(k2, (c,), jnp.float32),
                0.1 * jax.random.normal(k3, (c,), jnp.float32),
                1.0 + 0.1 * jax.random.uniform(k4, (c,), jnp.float32))

    p = {'stride': stride,
         'w1': 0.1 * jax.random.normal(ks[0], (3, 3, cin, cout), jnp.float32),
         'bn1': bn_params(ks[1], cout),
         'w2': 0.1 * jax.random.normal(ks[2], (3, 3, cout, cout), jnp.float32),
         'bn2': bn_params(ks[3], cout)}
    if stride != 1 or cin != cout:                    # standard BasicBlock downsample
        p['wd'] = 0.1 * jax.random.normal(ks[4], (1, 1, cin, cout), jnp.float32)
        p['bnd'] = bn_params(ks[5], cout)
    return p


def residual_block_reference(x_nchw, p):
    x = jnp.transpose(x_nchw, (0, 2, 3, 1)).astype(jnp.float32)

    def conv(a, w, stride, pad):
        return jax.lax.conv_general_dilated(
            a, w, (stride, stride), pad,
            dimension_numbers=('NHWC', 'HWIO', 'NHWC'))

    def bn(a, bnp):
        gamma, beta, mean, var = bnp
        return (a - mean) * gamma * jax.lax.rsqrt(var + 1e-5) + beta

    out = jax.nn.relu(bn(conv(x, p['w1'], p['stride'], ((1, 1), (1, 1))), p['bn1']))
    out = bn(conv(out, p['w2'], 1, ((1, 1), (1, 1))), p['bn2'])
    if 'wd' in p:
        res = bn(conv(x, p['wd'], p['stride'], ((0, 0), (0, 0))), p['bnd'])
    else:
        res = x
    return jnp.transpose(jax.nn.relu(out + res), (0, 3, 1, 2))


# ----------------------------------- main ------------------------------------

if __name__ == "__main__":
    key = jax.random.PRNGKey(0)
    kx, kA, kB = jax.random.split(key, 3)
    x = jax.random.normal(kx, (2, 4, 16, 16), jnp.float32)        # NCHW, like PyTorch

    # Block A: stride-2, channel change -> 1x1-conv+BN downsample path.
    pA = init_block_params(kA, 4, 8, stride=2)
    # Block B: stride-1, same channels -> identity skip path.
    pB = init_block_params(kB, 8, 8, stride=1)

    @jax.jit
    def run_chain(x_in):
        # NCHW<->NHWC only at the ends of the chain; the blocks exchange
        # activations in the kernel's NHWC / bf16 layout.
        h = jnp.transpose(x_in, (0, 2, 3, 1)).astype(jnp.bfloat16)
        a = residual_block_nhwc(h, pA)
        b = residual_block_nhwc(a, pB)
        to_nchw = lambda t: jnp.transpose(t.astype(jnp.float32), (0, 3, 1, 2))
        return to_nchw(a), to_nchw(b)

    yA, yB = run_chain(x)
    jax.block_until_ready(yB)

    rA = residual_block_reference(x, pA)
    rB = residual_block_reference(rA, pB)
    assert yA.shape == (2, 8, 8, 8) and yB.shape == (2, 8, 8, 8)
    errA = float(jnp.max(jnp.abs(yA - rA)))
    errB = float(jnp.max(jnp.abs(yB - rB)))
    # bf16 activations/weights end-to-end vs. a pure-f32 reference chain.
    assert errA < 1e-1 and errB < 1e-1, f"mismatch: errA={errA}, errB={errB}"
    print("KERNEL_OK")
</pallas_src>

<mosaic_0001>
module attributes {stable_mosaic.version = 11 : i64} {
  func.func @kernel(%arg0: i32, %arg1: memref<1x36x9x4xbf16, #tpu.memory_space<vmem>>, %arg2: memref<9x4x8xbf16, #tpu.memory_space<vmem>>, %arg3: memref<1x8xf32, #tpu.memory_space<vmem>>, %arg4: memref<9x8x128xbf16, #tpu.memory_space<vmem>>, %arg5: memref<1x128xf32, #tpu.memory_space<vmem>>, %arg6: memref<4x128xbf16, #tpu.memory_space<vmem>>, %arg7: memref<1x128xf32, #tpu.memory_space<vmem>>, %arg8: memref<1x64x128xbf16, #tpu.memory_space<vmem>>, %arg9: memref<10x24x8xbf16, #tpu.memory_space<vmem>>) attributes {dimension_semantics = [#tpu.dimension_semantics<parallel>], iteration_bounds = array<i64: 2>, scalar_prefetch = 0 : i64, scratch_operands = 1 : i64, tpu.core_type = #tpu.core_type<tc>, window_params = [{transform_indices = @transform_0, window_bounds = array<i64: 1, 36, 9, 4>}, {pipeline_mode = #tpu.pipeline_mode<synchronous>, transform_indices = @transform_1, window_bounds = array<i64: 9, 4, 8>}, {pipeline_mode = #tpu.pipeline_mode<synchronous>, transform_indices = @transform_2, window_bounds = array<i64: 1, 8>}, {pipeline_mode = #tpu.pipeline_mode<synchronous>, transform_indices = @transform_3, window_bounds = array<i64: 9, 8, 128>}, {pipeline_mode = #tpu.pipeline_mode<synchronous>, transform_indices = @transform_4, window_bounds = array<i64: 1, 128>}, {pipeline_mode = #tpu.pipeline_mode<synchronous>, transform_indices = @transform_5, window_bounds = array<i64: 4, 128>}, {pipeline_mode = #tpu.pipeline_mode<synchronous>, transform_indices = @transform_6, window_bounds = array<i64: 1, 128>}, {transform_indices = @transform_7, window_bounds = array<i64: 1, 64, 128>}]} {
    %cst = arith.constant 0.000000e+00 : bf16
    %0 = vector.broadcast %cst : bf16 to vector<24x8xbf16>
    %c0 = arith.constant 0 : index
    %c0_0 = arith.constant 0 : index
    %c0_1 = arith.constant 0 : index
    %1 = vector.load %arg9[%c0, %c0_0, %c0_1] : memref<10x24x8xbf16, #tpu.memory_space<vmem>>, vector<1x24x8xbf16>
    %2 = vector.shape_cast %1 : vector<1x24x8xbf16> to vector<24x8xbf16>
    %3 = vector.shape_cast %0 : vector<24x8xbf16> to vector<1x24x8xbf16>
    tpu.vector_store %arg9[%c0, %c0_0, %c0_1], %3 {strides = array<i32>} : memref<10x24x8xbf16, #tpu.memory_space<vmem>>, vector<1x24x8xbf16>,
    %cst_2 = arith.constant 0.000000e+00 : bf16
    %4 = vector.broadcast %cst_2 : bf16 to vector<24x8xbf16>
    %c9 = arith.constant 9 : index
    %c0_3 = arith.constant 0 : index
    %c0_4 = arith.constant 0 : index
    %5 = vector.load %arg9[%c9, %c0_3, %c0_4] : memref<10x24x8xbf16, #tpu.memory_space<vmem>>, vector<1x24x8xbf16>
    %6 = vector.shape_cast %5 : vector<1x24x8xbf16> to vector<24x8xbf16>
    %7 = vector.shape_cast %4 : vector<24x8xbf16> to vector<1x24x8xbf16>
    tpu.vector_store %arg9[%c9, %c0_3, %c0_4], %7 {strides = array<i32>} : memref<10x24x8xbf16, #tpu.memory_space<vmem>>, vector<1x24x8xbf16>,
    %cst_5 = arith.constant 0.000000e+00 : bf16
    %8 = vector.broadcast %cst_5 : bf16 to vector<8x8x8xbf16>
    %c1 = arith.constant 1 : index
    %c0_6 = arith.constant 0 : index
    %c0_7 = arith.constant 0 : index
    %9 = vector.load %arg9[%c1, %c0_6, %c0_7] : memref<10x24x8xbf16, #tpu.memory_space<vmem>>, vector<8x8x8xbf16>
    tpu.vector_store %arg9[%c1, %c0_6, %c0_7], %8 {strides = array<i32>} : memref<10x24x8xbf16, #tpu.memory_space<vmem>>, vector<8x8x8xbf16>,
    %cst_8 = arith.constant 0.000000e+00 : bf16
    %10 = vector.broadcast %cst_8 : bf16 to vector<8x8x8xbf16>
    %c1_9 = arith.constant 1 : index
    %c16 = arith.constant 16 : index
    %c0_10 = arith.constant 0 : index
    %11 = vector.load %arg9[%c1_9, %c16, %c0_10] : memref<10x24x8xbf16, #tpu.memory_space<vmem>>, vector<8x8x8xbf16>
    tpu.vector_store %arg9[%c1_9, %c16, %c0_10], %10 {strides = array<i32>} : memref<10x24x8xbf16, #tpu.memory_space<vmem>>, vector<8x8x8xbf16>,
    %cst_11 = arith.constant 0.000000e+00 : f32
    %12 = vector.broadcast %cst_11 : f32 to vector<64x8xf32>
    %c0_12 = arith.constant 0 : index
    %c0_13 = arith.constant 0 : index
    %c0_14 = arith.constant 0 : index
    %c0_15 = arith.constant 0 : index
    %13 = vector.load %arg1[%c0_12, %c0_13, %c0_14, %c0_15] : memref<1x36x9x4xbf16, #tpu.memory_space<vmem>>, vector<1x8x8x4xbf16>
    %14 = vector.shape_cast %13 : vector<1x8x8x4xbf16> to vector<8x8x4xbf16>
    %15 = vector.shape_cast %14 : vector<8x8x4xbf16> to vector<64x4xbf16>
    %c0_16 = arith.constant 0 : index
    %c0_17 = arith.constant 0 : index
    %c0_18 = arith.constant 0 : index
    %16 = vector.load %arg2[%c0_16, %c0_17, %c0_18] : memref<9x4x8xbf16, #tpu.memory_space<vmem>>, vector<1x4x8xbf16>
    %17 = vector.shape_cast %16 : vector<1x4x8xbf16> to vector<4x8xbf16>
    %cst_19 = arith.constant dense<0.000000e+00> : vector<64x8xf32>
    %18 = tpu.matmul %15, %17, %cst_19 {dimension_numbers = #tpu.dot_dimension_numbers<[1], [0], [0], [1], [0, 0, 1, 1], [], []>} : vector<64x4xbf16>, vector<4x8xbf16>, vector<64x8xf32> -> vector<64x8xf32>
    %19 = arith.addf %12, %18 : vector<64x8xf32>
    %c0_20 = arith.constant 0 : index
    %c9_21 = arith.constant 9 : index
    %c0_22 = arith.constant 0 : index
    %c0_23 = arith.constant 0 : index
    %20 = vector.load %arg1[%c0_20, %c9_21, %c0_22, %c0_23] : memref<1x36x9x4xbf16, #tpu.memory_space<vmem>>, vector<1x8x8x4xbf16>
    %21 = vector.shape_cast %20 : vector<1x8x8x4xbf16> to vector<8x8x4xbf16>
    %22 = vector.shape_cast %21 : vector<8x8x4xbf16> to vector<64x4xbf16>
    %c1_24 = arith.constant 1 : index
    %c0_25 = arith.constant 0 : index
    %c0_26 = arith.constant 0 : index
    %23 = vector.load %arg2[%c1_24, %c0_25, %c0_26] : memref<9x4x8xbf16, #tpu.memory_space<vmem>>, vector<1x4x8xbf16>
    %24 = vector.shape_cast %23 : vector<1x4x8xbf16> to vector<4x8xbf16>
    %cst_27 = arith.constant dense<0.000000e+00> : vector<64x8xf32>
    %25 = tpu.matmul %22, %24, %cst_27 {dimension_numbers = #tpu.dot_dimension_numbers<[1], [0], [0], [1], [0, 0, 1, 1], [], []>} : vector<64x4xbf16>, vector<4x8xbf16>, vector<64x8xf32> -> vector<64x8xf32>
    %26 = arith.addf %19, %25 : vector<64x8xf32>
    %c0_28 = arith.constant 0 : index
    %c0_29 = arith.constant 0 : index
    %c1_30 = arith.constant 1 : index
    %c0_31 = arith.constant 0 : index
    %27 = vector.load %arg1[%c0_28, %c0_29, %c1_30, %c0_31] : memref<1x36x9x4xbf16, #tpu.memory_space<vmem>>, vector<1x8x8x4xbf16>
    %28 = vector.shape_cast %27 : vector<1x8x8x4xbf16> to vector<8x8x4xbf16>
    %29 = vector.shape_cast %28 : vector<8x8x4xbf16> to vector<64x4xbf16>
    %c2 = arith.constant 2 : index
    %c0_32 = arith.constant 0 : index
    %c0_33 = arith.constant 0 : index
    %30 = vector.load %arg2[%c2, %c0_32, %c0_33] : memref<9x4x8xbf16, #tpu.memory_space<vmem>>, vector<1x4x8xbf16>
    %31 = vector.shape_cast %30 : vector<1x4x8xbf16> to vector<4x8xbf16>
    %cst_34 = arith.constant dense<0.000000e+00> : vector<64x8xf32>
    %32 = tpu.matmul %29, %31, %cst_34 {dimension_numbers = #tpu.dot_dimension_numbers<[1], [0], [0], [1], [0, 0, 1, 1], [], []>} : vector<64x4xbf16>, vector<4x8xbf16>, vector<64x8xf32> -> vector<64x8xf32>
    %33 = arith.addf %26, %32 : vector<64x8xf32>
    %c0_35 = arith.constant 0 : index
    %c18 = arith.constant 18 : index
    %c0_36 = arith.constant 0 : index
    %c0_37 = arith.constant 0 : index
    %34 = vector.load %arg1[%c0_35, %c18, %c0_36, %c0_37] : memref<1x36x9x4xbf16, #tpu.memory_space<vmem>>, vector<1x8x8x4xbf16>
    %35 = vector.shape_cast %34 : vector<1x8x8x4xbf16> to vector<8x8x4xbf16>
    %36 = vector.shape_cast %35 : vector<8x8x4xbf16> to vector<64x4xbf16>
    %c3 = arith.constant 3 : index
    %c0_38 = arith.constant 0 : index
    %c0_39 = arith.constant 0 : index
    %37 = vector.load %arg2[%c3, %c0_38, %c0_39] : memref<9x4x8xbf16, #tpu.memory_space<vmem>>, vector<1x4x8xbf16>
    %38 = vector.shape_cast %37 : vector<1x4x8xbf16> to vector<4x8xbf16>
    %cst_40 = arith.constant dense<0.000000e+00> : vector<64x8xf32>
    %39 = tpu.matmul %36, %38, %cst_40 {dimension_numbers = #tpu.dot_dimension_numbers<[1], [0], [0], [1], [0, 0, 1, 1], [], []>} : vector<64x4xbf16>, vector<4x8xbf16>, vector<64x8xf32> -> vector<64x8xf32>
    %40 = arith.addf %33, %39 : vector<64x8xf32>
    %c0_41 = arith.constant 0 : index
    %c27 = arith.constant 27 : index
    %c0_42 = arith.constant 0 : index
    %c0_43 = arith.constant 0 : index
    %41 = vector.load %arg1[%c0_41, %c27, %c0_42, %c0_43] : memref<1x36x9x4xbf16, #tpu.memory_space<vmem>>, vector<1x8x8x4xbf16>
    %42 = vector.shape_cast %41 : vector<1x8x8x4xbf16> to vector<8x8x4xbf16>
    %43 = vector.shape_cast %42 : vector<8x8x4xbf16> to vector<64x4xbf16>
    %c4 = arith.constant 4 : index
    %c0_44 = arith.constant 0 : index
    %c0_45 = arith.constant 0 : index
    %44 = vector.load %arg2[%c4, %c0_44, %c0_45] : memref<9x4x8xbf16, #tpu.memory_space<vmem>>, vector<1x4x8xbf16>
    %45 = vector.shape_cast %44 : vector<1x4x8xbf16> to vector<4x8xbf16>
    %cst_46 = arith.constant dense<0.000000e+00> : vector<64x8xf32>
    %46 = tpu.matmul %43, %45, %cst_46 {dimension_numbers = #tpu.dot_dimension_numbers<[1], [0], [0], [1], [0, 0, 1, 1], [], []>} : vector<64x4xbf16>, vector<4x8xbf16>, vector<64x8xf32> -> vector<64x8xf32>
    %47 = arith.addf %40, %46 : vector<64x8xf32>
    %c0_47 = arith.constant 0 : index
    %c18_48 = arith.constant 18 : index
    %c1_49 = arith.constant 1 : index
    %c0_50 = arith.constant 0 : index
    %48 = vector.load %arg1[%c0_47, %c18_48, %c1_49, %c0_50] : memref<1x36x9x4xbf16, #tpu.memory_space<vmem>>, vector<1x8x8x4xbf16>
    %49 = vector.shape_cast %48 : vector<1x8x8x4xbf16> to vector<8x8x4xbf16>
    %50 = vector.shape_cast %49 : vector<8x8x4xbf16> to vector<64x4xbf16>
    %c5 = arith.constant 5 : index
    %c0_51 = arith.constant 0 : index
    %c0_52 = arith.constant 0 : index
    %51 = vector.load %arg2[%c5, %c0_51, %c0_52] : memref<9x4x8xbf16, #tpu.memory_space<vmem>>, vector<1x4x8xbf16>
    %52 = vector.shape_cast %51 : vector<1x4x8xbf16> to vector<4x8xbf16>
    %cst_53 = arith.constant dense<0.000000e+00> : vector<64x8xf32>
    %53 = tpu.matmul %50, %52, %cst_53 {dimension_numbers = #tpu.dot_dimension_numbers<[1], [0], [0], [1], [0, 0, 1, 1], [], []>} : vector<64x4xbf16>, vector<4x8xbf16>, vector<64x8xf32> -> vector<64x8xf32>
    %54 = arith.addf %47, %53 : vector<64x8xf32>
    %c0_54 = arith.constant 0 : index
    %c1_55 = arith.constant 1 : index
    %c0_56 = arith.constant 0 : index
    %c0_57 = arith.constant 0 : index
    %55 = vector.load %arg1[%c0_54, %c1_55, %c0_56, %c0_57] : memref<1x36x9x4xbf16, #tpu.memory_space<vmem>>, vector<1x8x8x4xbf16>
    %56 = vector.shape_cast %55 : vector<1x8x8x4xbf16> to vector<8x8x4xbf16>
    %57 = vector.shape_cast %56 : vector<8x8x4xbf16> to vector<64x4xbf16>
    %c6 = arith.constant 6 : index
    %c0_58 = arith.constant 0 : index
    %c0_59 = arith.constant 0 : index
    %58 = vector.load %arg2[%c6, %c0_58, %c0_59] : memref<9x4x8xbf16, #tpu.memory_space<vmem>>, vector<1x4x8xbf16>
    %59 = vector.shape_cast %58 : vector<1x4x8xbf16> to vector<4x8xbf16>
    %cst_60 = arith.constant dense<0.000000e+00> : vector<64x8xf32>
    %60 = tpu.matmul %57, %59, %cst_60 {dimension_numbers = #tpu.dot_dimension_numbers<[1], [0], [0], [1], [0, 0, 1, 1], [], []>} : vector<64x4xbf16>, vector<4x8xbf16>, vector<64x8xf32> -> vector<64x8xf32>
    %61 = arith.addf %54, %60 : vector<64x8xf32>
    %c0_61 = arith.constant 0 : index
    %c10 = arith.constant 10 : index
    %c0_62 = arith.constant 0 : index
    %c0_63 = arith.constant 0 : index
    %62 = vector.load %arg1[%c0_61, %c10, %c0_62, %c0_63] : memref<1x36x9x4xbf16, #tpu.memory_space<vmem>>, vector<1x8x8x4xbf16>
    %63 = vector.shape_cast %62 : vector<1x8x8x4xbf16> to vector<8x8x4xbf16>
    %64 = vector.shape_cast %63 : vector<8x8x4xbf16> to vector<64x4xbf16>
    %c7 = arith.constant 7 : index
    %c0_64 = arith.constant 0 : index
    %c0_65 = arith.constant 0 : index
    %65 = vector.load %arg2[%c7, %c0_64, %c0_65] : memref<9x4x8xbf16, #tpu.memory_space<vmem>>, vector<1x4x8xbf16>
    %66 = vector.shape_cast %65 : vector<1x4x8xbf16> to vector<4x8xbf16>
    %cst_66 = arith.constant dense<0.000000e+00> : vector<64x8xf32>
    %67 = tpu.matmul %64, %66, %cst_66 {dimension_numbers = #tpu.dot_dimension_numbers<[1], [0], [0], [1], [0, 0, 1, 1], [], []>} : vector<64x4xbf16>, vector<4x8xbf16>, vector<64x8xf32> -> vector<64x8xf32>
    %68 = arith.addf %61, %67 : vector<64x8xf32>
    %c0_67 = arith.constant 0 : index
    %c1_68 = arith.constant 1 : index
    %c1_69 = arith.constant 1 : index
    %c0_70 = arith.constant 0 : index
    %69 = vector.load %arg1[%c0_67, %c1_68, %c1_69, %c0_70] : memref<1x36x9x4xbf16, #tpu.memory_space<vmem>>, vector<1x8x8x4xbf16>
    %70 = vector.shape_cast %69 : vector<1x8x8x4xbf16> to vector<8x8x4xbf16>
    %71 = vector.shape_cast %70 : vector<8x8x4xbf16> to vector<64x4xbf16>
    %c8 = arith.constant 8 : index
    %c0_71 = arith.constant 0 : index
    %c0_72 = arith.constant 0 : index
    %72 = vector.load %arg2[%c8, %c0_71, %c0_72] : memref<9x4x8xbf16, #tpu.memory_space<vmem>>, vector<1x4x8xbf16>
    %73 = vector.shape_cast %72 : vector<1x4x8xbf16> to vector<4x8xbf16>
    %cst_73 = arith.constant dense<0.000000e+00> : vector<64x8xf32>
    %74 = tpu.matmul %71, %73, %cst_73 {dimension_numbers = #tpu.dot_dimension_numbers<[1], [0], [0], [1], [0, 0, 1, 1], [], []>} : vector<64x4xbf16>, vector<4x8xbf16>, vector<64x8xf32> -> vector<64x8xf32>
    %75 = arith.addf %68, %74 : vector<64x8xf32>
    %c0_74 = arith.constant 0 : index
    %c0_75 = arith.constant 0 : index
    %76 = vector.load %arg3[%c0_74, %c0_75] : memref<1x8xf32, #tpu.memory_space<vmem>>, vector<1x8xf32>
    %77 = vector.broadcast %76 : vector<1x8xf32> to vector<64x8xf32>
    %78 = arith.addf %75, %77 : vector<64x8xf32>
    %cst_76 = arith.constant 0.000000e+00 : f32
    %79 = vector.broadcast %cst_76 : f32 to vector<64x8xf32>
    %80 = arith.maximumf %78, %79 : vector<64x8xf32>
    %81 = vector.shape_cast %80 : vector<64x8xf32> to vector<8x8x8xf32>
    %82 = arith.truncf %81 : vector<8x8x8xf32> to vector<8x8x8xbf16>
    %c1_77 = arith.constant 1 : index
    %c8_78 = arith.constant 8 : index
    %c0_79 = arith.constant 0 : index
    %83 = vector.load %arg9[%c1_77, %c8_78, %c0_79] : memref<10x24x8xbf16, #tpu.memory_space<vmem>>, vector<8x8x8xbf16>
    tpu.vector_store %arg9[%c1_77, %c8_78, %c0_79], %82 {strides = array<i32>} : memref<10x24x8xbf16, #tpu.memory_space<vmem>>, vector<8x8x8xbf16>,
    %cst_80 = arith.constant 0.000000e+00 : f32
    %84 = vector.broadcast %cst_80 : f32 to vector<64x128xf32>
    %c0_81 = arith.constant 0 : index
    %c7_82 = arith.constant 7 : index
    %c0_83 = arith.constant 0 : index
    %85 = vector.load %arg9[%c0_81, %c7_82, %c0_83] : memref<10x24x8xbf16, #tpu.memory_space<vmem>>, vector<8x8x8xbf16>
    %86 = vector.shape_cast %85 : vector<8x8x8xbf16> to vector<64x8xbf16>
    %c0_84 = arith.constant 0 : index
    %c0_85 = arith.constant 0 : index
    %c0_86 = arith.constant 0 : index
    %87 = vector.load %arg4[%c0_84, %c0_85, %c0_86] : memref<9x8x128xbf16, #tpu.memory_space<vmem>>, vector<1x8x128xbf16>
    %88 = vector.shape_cast %87 : vector<1x8x128xbf16> to vector<8x128xbf16>
    %cst_87 = arith.constant dense<0.000000e+00> : vector<64x128xf32>
    %89 = tpu.matmul %86, %88, %cst_87 {dimension_numbers = #tpu.dot_dimension_numbers<[1], [0], [0], [1], [0, 0, 1, 1], [], []>} : vector<64x8xbf16>, vector<8x128xbf16>, vector<64x128xf32> -> vector<64x128xf32>
    %90 = arith.addf %84, %89 : vector<64x128xf32>
    %c0_88 = arith.constant 0 : index
    %c8_89 = arith.constant 8 : index
    %c0_90 = arith.constant 0 : index
    %91 = vector.load %arg9[%c0_88, %c8_89, %c0_90] : memref<10x24x8xbf16, #tpu.memory_space<vmem>>, vector<8x8x8xbf16>
    %92 = vector.shape_cast %91 : vector<8x8x8xbf16> to vector<64x8xbf16>
    %c1_91 = arith.constant 1 : index
    %c0_92 = arith.constant 0 : index
    %c0_93 = arith.constant 0 : index
    %93 = vector.load %arg4[%c1_91, %c0_92, %c0_93] : memref<9x8x128xbf16, #tpu.memory_space<vmem>>, vector<1x8x128xbf16>
    %94 = vector.shape_cast %93 : vector<1x8x128xbf16> to vector<8x128xbf16>
    %cst_94 = arith.constant dense<0.000000e+00> : vector<64x128xf32>
    %95 = tpu.matmul %92, %94, %cst_94 {dimension_numbers = #tpu.dot_dimension_numbers<[1], [0], [0], [1], [0, 0, 1, 1], [], []>} : vector<64x8xbf16>, vector<8x128xbf16>, vector<64x128xf32> -> vector<64x128xf32>
    %96 = arith.addf %90, %95 : vector<64x128xf32>
    %c0_95 = arith.constant 0 : index
    %c9_96 = arith.constant 9 : index
    %c0_97 = arith.constant 0 : index
    %97 = vector.load %arg9[%c0_95, %c9_96, %c0_97] : memref<10x24x8xbf16, #tpu.memory_space<vmem>>, vector<8x8x8xbf16>
    %98 = vector.shape_cast %97 : vector<8x8x8xbf16> to vector<64x8xbf16>
    %c2_98 = arith.constant 2 : index
    %c0_99 = arith.constant 0 : index
    %c0_100 = arith.constant 0 : index
    %99 = vector.load %arg4[%c2_98, %c0_99, %c0_100] : memref<9x8x128xbf16, #tpu.memory_space<vmem>>, vector<1x8x128xbf16>
    %100 = vector.shape_cast %99 : vector<1x8x128xbf16> to vector<8x128xbf16>
    %cst_101 = arith.constant dense<0.000000e+00> : vector<64x128xf32>
    %101 = tpu.matmul %98, %100, %cst_101 {dimension_numbers = #tpu.dot_dimension_numbers<[1], [0], [0], [1], [0, 0, 1, 1], [], []>} : vector<64x8xbf16>, vector<8x128xbf16>, vector<64x128xf32> -> vector<64x128xf32>
    %102 = arith.addf %96, %101 : vector<64x128xf32>
    %c1_102 = arith.constant 1 : index
    %c7_103 = arith.constant 7 : index
    %c0_104 = arith.constant 0 : index
    %103 = vector.load %arg9[%c1_102, %c7_103, %c0_104] : memref<10x24x8xbf16, #tpu.memory_space<vmem>>, vector<8x8x8xbf16>
    %104 = vector.shape_cast %103 : vector<8x8x8xbf16> to vector<64x8xbf16>
    %c3_105 = arith.constant 3 : index
    %c0_106 = arith.constant 0 : index
    %c0_107 = arith.constant 0 : index
    %105 = vector.load %arg4[%c3_105, %c0_106, %c0_107] : memref<9x8x128xbf16, #tpu.memory_space<vmem>>, vector<1x8x128xbf16>
    %106 = vector.shape_cast %105 : vector<1x8x128xbf16> to vector<8x128xbf16>
    %cst_108 = arith.constant dense<0.000000e+00> : vector<64x128xf32>
    %107 = tpu.matmul %104, %106, %cst_108 {dimension_numbers = #tpu.dot_dimension_numbers<[1], [0], [0], [1], [0, 0, 1, 1], [], []>} : vector<64x8xbf16>, vector<8x128xbf16>, vector<64x128xf32> -> vector<64x128xf32>
    %108 = arith.addf %102, %107 : vector<64x128xf32>
    %c1_109 = arith.constant 1 : index
    %c8_110 = arith.constant 8 : index
    %c0_111 = arith.constant 0 : index
    %109 = vector.load %arg9[%c1_109, %c8_110, %c0_111] : memref<10x24x8xbf16, #tpu.memory_space<vmem>>, vector<8x8x8xbf16>
    %110 = vector.shape_cast %109 : vector<8x8x8xbf16> to vector<64x8xbf16>
    %c4_112 = arith.constant 4 : index
    %c0_113 = arith.constant 0 : index
    %c0_114 = arith.constant 0 : index
    %111 = vector.load %arg4[%c4_112, %c0_113, %c0_114] : memref<9x8x128xbf16, #tpu.memory_space<vmem>>, vector<1x8x128xbf16>
    %112 = vector.shape_cast %111 : vector<1x8x128xbf16> to vector<8x128xbf16>
    %cst_115 = arith.constant dense<0.000000e+00> : vector<64x128xf32>
    %113 = tpu.matmul %110, %112, %cst_115 {dimension_numbers = #tpu.dot_dimension_numbers<[1], [0], [0], [1], [0, 0, 1, 1], [], []>} : vector<64x8xbf16>, vector<8x128xbf16>, vector<64x128xf32> -> vector<64x128xf32>
    %114 = arith.addf %108, %113 : vector<64x128xf32>
    %c1_116 = arith.constant 1 : index
    %c9_117 = arith.constant 9 : index
    %c0_118 = arith.constant 0 : index
    %115 = vector.load %arg9[%c1_116, %c9_117, %c0_118] : memref<10x24x8xbf16, #tpu.memory_space<vmem>>, vector<8x8x8xbf16>
    %116 = vector.shape_cast %115 : vector<8x8x8xbf16> to vector<64x8xbf16>
    %c5_119 = arith.constant 5 : index
    %c0_120 = arith.constant 0 : index
    %c0_121 = arith.constant 0 : index
    %117 = vector.load %arg4[%c5_119, %c0_120, %c0_121] : memref<9x8x128xbf16, #tpu.memory_space<vmem>>, vector<1x8x128xbf16>
    %118 = vector.shape_cast %117 : vector<1x8x128xbf16> to vector<8x128xbf16>
    %cst_122 = arith.constant dense<0.000000e+00> : vector<64x128xf32>
    %119 = tpu.matmul %116, %118, %cst_122 {dimension_numbers = #tpu.dot_dimension_numbers<[1], [0], [0], [1], [0, 0, 1, 1], [], []>} : vector<64x8xbf16>, vector<8x128xbf16>, vector<64x128xf32> -> vector<64x128xf32>
    %120 = arith.addf %114, %119 : vector<64x128xf32>
    %c2_123 = arith.constant 2 : index
    %c7_124 = arith.constant 7 : index
    %c0_125 = arith.constant 0 : index
    %121 = vector.load %arg9[%c2_123, %c7_124, %c0_125] : memref<10x24x8xbf16, #tpu.memory_space<vmem>>, vector<8x8x8xbf16>
    %122 = vector.shape_cast %121 : vector<8x8x8xbf16> to vector<64x8xbf16>
    %c6_126 = arith.constant 6 : index
    %c0_127 = arith.constant 0 : index
    %c0_128 = arith.constant 0 : index
    %123 = vector.load %arg4[%c6_126, %c0_127, %c0_128] : memref<9x8x128xbf16, #tpu.memory_space<vmem>>, vector<1x8x128xbf16>
    %124 = vector.shape_cast %123 : vector<1x8x128xbf16> to vector<8x128xbf16>
    %cst_129 = arith.constant dense<0.000000e+00> : vector<64x128xf32>
    %125 = tpu.matmul %122, %124, %cst_129 {dimension_numbers = #tpu.dot_dimension_numbers<[1], [0], [0], [1], [0, 0, 1, 1], [], []>} : vector<64x8xbf16>, vector<8x128xbf16>, vector<64x128xf32> -> vector<64x128xf32>
    %126 = arith.addf %120, %125 : vector<64x128xf32>
    %c2_130 = arith.constant 2 : index
    %c8_131 = arith.constant 8 : index
    %c0_132 = arith.constant 0 : index
    %127 = vector.load %arg9[%c2_130, %c8_131, %c0_132] : memref<10x24x8xbf16, #tpu.memory_space<vmem>>, vector<8x8x8xbf16>
    %128 = vector.shape_cast %127 : vector<8x8x8xbf16> to vector<64x8xbf16>
    %c7_133 = arith.constant 7 : index
    %c0_134 = arith.constant 0 : index
    %c0_135 = arith.constant 0 : index
    %129 = vector.load %arg4[%c7_133, %c0_134, %c0_135] : memref<9x8x128xbf16, #tpu.memory_space<vmem>>, vector<1x8x128xbf16>
    %130 = vector.shape_cast %129 : vector<1x8x128xbf16> to vector<8x128xbf16>
    %cst_136 = arith.constant dense<0.000000e+00> : vector<64x128xf32>
    %131 = tpu.matmul %128, %130, %cst_136 {dimension_numbers = #tpu.dot_dimension_numbers<[1], [0], [0], [1], [0, 0, 1, 1], [], []>} : vector<64x8xbf16>, vector<8x128xbf16>, vector<64x128xf32> -> vector<64x128xf32>
    %132 = arith.addf %126, %131 : vector<64x128xf32>
    %c2_137 = arith.constant 2 : index
    %c9_138 = arith.constant 9 : index
    %c0_139 = arith.constant 0 : index
    %133 = vector.load %arg9[%c2_137, %c9_138, %c0_139] : memref<10x24x8xbf16, #tpu.memory_space<vmem>>, vector<8x8x8xbf16>
    %134 = vector.shape_cast %133 : vector<8x8x8xbf16> to vector<64x8xbf16>
    %c8_140 = arith.constant 8 : index
    %c0_141 = arith.constant 0 : index
    %c0_142 = arith.constant 0 : index
    %135 = vector.load %arg4[%c8_140, %c0_141, %c0_142] : memref<9x8x128xbf16, #tpu.memory_space<vmem>>, vector<1x8x128xbf16>
    %136 = vector.shape_cast %135 : vector<1x8x128xbf16> to vector<8x128xbf16>
    %cst_143 = arith.constant dense<0.000000e+00> : vector<64x128xf32>
    %137 = tpu.matmul %134, %136, %cst_143 {dimension_numbers = #tpu.dot_dimension_numbers<[1], [0], [0], [1], [0, 0, 1, 1], [], []>} : vector<64x8xbf16>, vector<8x128xbf16>, vector<64x128xf32> -> vector<64x128xf32>
    %138 = arith.addf %132, %137 : vector<64x128xf32>
    %c0_144 = arith.constant 0 : index
    %c27_145 = arith.constant 27 : index
    %c0_146 = arith.constant 0 : index
    %c0_147 = arith.constant 0 : index
    %139 = vector.load %arg1[%c0_144, %c27_145, %c0_146, %c0_147] : memref<1x36x9x4xbf16, #tpu.memory_space<vmem>>, vector<1x8x8x4xbf16>
    %140 = vector.shape_cast %139 : vector<1x8x8x4xbf16> to vector<8x8x4xbf16>
    %141 = vector.shape_cast %140 : vector<8x8x4xbf16> to vector<64x4xbf16>
    %c0_148 = arith.constant 0 : index
    %c0_149 = arith.constant 0 : index
    %142 = vector.load %arg6[%c0_148, %c0_149] : memref<4x128xbf16, #tpu.memory_space<vmem>>, vector<4x128xbf16>
    %cst_150 = arith.constant dense<0.000000e+00> : vector<64x128xf32>
    %143 = tpu.matmul %141, %142, %cst_150 {dimension_numbers = #tpu.dot_dimension_numbers<[1], [0], [0], [1], [0, 0, 1, 1], [], []>} : vector<64x4xbf16>, vector<4x128xbf16>, vector<64x128xf32> -> vector<64x128xf32>
    %c0_151 = arith.constant 0 : index
    %c0_152 = arith.constant 0 : index
    %144 = vector.load %arg5[%c0_151, %c0_152] : memref<1x128xf32, #tpu.memory_space<vmem>>, vector<1x128xf32>
    %145 = vector.broadcast %144 : vector<1x128xf32> to vector<64x128xf32>
    %146 = arith.addf %138, %145 : vector<64x128xf32>
    %147 = arith.addf %146, %143 : vector<64x128xf32>
    %c0_153 = arith.constant 0 : index
    %c0_154 = arith.constant 0 : index
    %148 = vector.load %arg7[%c0_153, %c0_154] : memref<1x128xf32, #tpu.memory_space<vmem>>, vector<1x128xf32>
    %149 = vector.broadcast %148 : vector<1x128xf32> to vector<64x128xf32>
    %150 = arith.addf %147, %149 : vector<64x128xf32>
    %cst_155 = arith.constant 0.000000e+00 : f32
    %151 = vector.broadcast %cst_155 : f32 to vector<64x128xf32>
    %152 = arith.maximumf %150, %151 : vector<64x128xf32>
    %153 = arith.truncf %152 : vector<64x128xf32> to vector<64x128xbf16>
    %c0_156 = arith.constant 0 : index
    %c0_157 = arith.constant 0 : index
    %c0_158 = arith.constant 0 : index
    %154 = vector.load %arg8[%c0_156, %c0_157, %c0_158] : memref<1x64x128xbf16, #tpu.memory_space<vmem>>, vector<1x64x128xbf16>
    %155 = vector.shape_cast %154 : vector<1x64x128xbf16> to vector<64x128xbf16>
    %156 = vector.shape_cast %153 : vector<64x128xbf16> to vector<1x64x128xbf16>
    tpu.vector_store %arg8[%c0_156, %c0_157, %c0_158], %156 {strides = array<i32>} : memref<1x64x128xbf16, #tpu.memory_space<vmem>>, vector<1x64x128xbf16>,
    return
  }
  func.func @transform_0(%arg0: i32) -> (i32, i32, i32, i32) {
    %c0_i32 = arith.constant 0 : i32
    %c0_i32_0 = arith.constant 0 : i32
    %c0_i32_1 = arith.constant 0 : i32
    %c0_i32_2 = arith.constant 0 : i32
    return %arg0, %c0_i32, %c0_i32_0, %c0_i32_1 : i32, i32, i32, i32
  }
  func.func @transform_1(%arg0: i32) -> (i32, i32, i32) {
    %c0_i32 = arith.constant 0 : i32
    %c0_i32_0 = arith.constant 0 : i32
    %c0_i32_1 = arith.constant 0 : i32
    %c0_i32_2 = arith.constant 0 : i32
    return %c0_i32, %c0_i32_0, %c0_i32_1 : i32, i32, i32
  }
  func.func @transform_2(%arg0: i32) -> (i32, i32) {
    %c0_i32 = arith.constant 0 : i32
    %c0_i32_0 = arith.constant 0 : i32
    %c0_i32_1 = arith.constant 0 : i32
    return %c0_i32, %c0_i32_0 : i32, i32
  }
  func.func @transform_3(%arg0: i32) -> (i32, i32, i32) {
    %c0_i32 = arith.constant 0 : i32
    %c0_i32_0 = arith.constant 0 : i32
    %c0_i32_1 = arith.constant 0 : i32
    %c0_i32_2 = arith.constant 0 : i32
    return %c0_i32, %c0_i32_0, %c0_i32_1 : i32, i32, i32
  }
  func.func @transform_4(%arg0: i32) -> (i32, i32) {
    %c0_i32 = arith.constant 0 : i32
    %c0_i32_0 = arith.constant 0 : i32
    %c0_i32_1 = arith.constant 0 : i32
    return %c0_i32, %c0_i32_0 : i32, i32
  }
  func.func @transform_5(%arg0: i32) -> (i32, i32) {
    %c0_i32 = arith.constant 0 : i32
    %c0_i32_0 = arith.constant 0 : i32
    %c0_i32_1 = arith.constant 0 : i32
    return %c0_i32, %c0_i32_0 : i32, i32
  }
  func.func @transform_6(%arg0: i32) -> (i32, i32) {
    %c0_i32 = arith.constant 0 : i32
    %c0_i32_0 = arith.constant 0 : i32
    %c0_i32_1 = arith.constant 0 : i32
    return %c0_i32, %c0_i32_0 : i32, i32
  }
  func.func @transform_7(%arg0: i32) -> (i32, i32, i32) {
    %c0_i32 = arith.constant 0 : i32
    %c0_i32_0 = arith.constant 0 : i32
    %c0_i32_1 = arith.constant 0 : i32
    return %arg0, %c0_i32, %c0_i32_0 : i32, i32, i32
  }
}

module attributes {stable_mosaic.version = 11 : i64} {
  func.func @kernel(%arg0: i32, %arg1: memref<1x10x10x8xbf16, #tpu.memory_space<vmem>>, %arg2: memref<9x8x8xbf16, #tpu.memory_space<vmem>>, %arg3: memref<1x8xf32, #tpu.memory_space<vmem>>, %arg4: memref<9x8x128xbf16, #tpu.memory_space<vmem>>, %arg5: memref<1x128xf32, #tpu.memory_space<vmem>>, %arg6: memref<8x128xbf16, #tpu.memory_space<vmem>>, %arg7: memref<1x128xf32, #tpu.memory_space<vmem>>, %arg8: memref<1x64x128xbf16, #tpu.memory_space<vmem>>, %arg9: memref<10x24x8xbf16, #tpu.memory_space<vmem>>) attributes {dimension_semantics = [#tpu.dimension_semantics<parallel>], iteration_bounds = array<i64: 2>, scalar_prefetch = 0 : i64, scratch_operands = 1 : i64, tpu.core_type = #tpu.core_type<tc>, window_params = [{transform_indices = @transform_0, window_bounds = array<i64: 1, 10, 10, 8>}, {pipeline_mode = #tpu.pipeline_mode<synchronous>, transform_indices = @transform_1, window_bounds = array<i64: 9, 8, 8>}, {pipeline_mode = #tpu.pipeline_mode<synchronous>, transform_indices = @transform_2, window_bounds = array<i64: 1, 8>}, {pipeline_mode = #tpu.pipeline_mode<synchronous>, transform_indices = @transform_3, window_bounds = array<i64: 9, 8, 128>}, {pipeline_mode = #tpu.pipeline_mode<synchronous>, transform_indices = @transform_4, window_bounds = array<i64: 1, 128>}, {pipeline_mode = #tpu.pipeline_mode<synchronous>, transform_indices = @transform_5, window_bounds = array<i64: 8, 128>}, {pipeline_mode = #tpu.pipeline_mode<synchronous>, transform_indices = @transform_6, window_bounds = array<i64: 1, 128>}, {transform_indices = @transform_7, window_bounds = array<i64: 1, 64, 128>}]} {
    %cst = arith.constant 0.000000e+00 : bf16
    %0 = vector.broadcast %cst : bf16 to vector<24x8xbf16>
    %c0 = arith.constant 0 : index
    %c0_0 = arith.constant 0 : index
    %c0_1 = arith.constant 0 : index
    %1 = vector.load %arg9[%c0, %c0_0, %c0_1] : memref<10x24x8xbf16, #tpu.memory_space<vmem>>, vector<1x24x8xbf16>
    %2 = vector.shape_cast %1 : vector<1x24x8xbf16> to vector<24x8xbf16>
    %3 = vector.shape_cast %0 : vector<24x8xbf16> to vector<1x24x8xbf16>
    tpu.vector_store %arg9[%c0, %c0_0, %c0_1], %3 {strides = array<i32>} : memref<10x24x8xbf16, #tpu.memory_space<vmem>>, vector<1x24x8xbf16>,
    %cst_2 = arith.constant 0.000000e+00 : bf16
    %4 = vector.broadcast %cst_2 : bf16 to vector<24x8xbf16>
    %c9 = arith.constant 9 : index
    %c0_3 = arith.constant 0 : index
    %c0_4 = arith.constant 0 : index
    %5 = vector.load %arg9[%c9, %c0_3, %c0_4] : memref<10x24x8xbf16, #tpu.memory_space<vmem>>, vector<1x24x8xbf16>
    %6 = vector.shape_cast %5 : vector<1x24x8xbf16> to vector<24x8xbf16>
    %7 = vector.shape_cast %4 : vector<24x8xbf16> to vector<1x24x8xbf16>
    tpu.vector_store %arg9[%c9, %c0_3, %c0_4], %7 {strides = array<i32>} : memref<10x24x8xbf16, #tpu.memory_space<vmem>>, vector<1x24x8xbf16>,
    %cst_5 = arith.constant 0.000000e+00 : bf16
    %8 = vector.broadcast %cst_5 : bf16 to vector<8x8x8xbf16>
    %c1 = arith.constant 1 : index
    %c0_6 = arith.constant 0 : index
    %c0_7 = arith.constant 0 : index
    %9 = vector.load %arg9[%c1, %c0_6, %c0_7] : memref<10x24x8xbf16, #tpu.memory_space<vmem>>, vector<8x8x8xbf16>
    tpu.vector_store %arg9[%c1, %c0_6, %c0_7], %8 {strides = array<i32>} : memref<10x24x8xbf16, #tpu.memory_space<vmem>>, vector<8x8x8xbf16>,
    %cst_8 = arith.constant 0.000000e+00 : bf16
    %10 = vector.broadcast %cst_8 : bf16 to vector<8x8x8xbf16>
    %c1_9 = arith.constant 1 : index
    %c16 = arith.constant 16 : index
    %c0_10 = arith.constant 0 : index
    %11 = vector.load %arg9[%c1_9, %c16, %c0_10] : memref<10x24x8xbf16, #tpu.memory_space<vmem>>, vector<8x8x8xbf16>
    tpu.vector_store %arg9[%c1_9, %c16, %c0_10], %10 {strides = array<i32>} : memref<10x24x8xbf16, #tpu.memory_space<vmem>>, vector<8x8x8xbf16>,
    %cst_11 = arith.constant 0.000000e+00 : f32
    %12 = vector.broadcast %cst_11 : f32 to vector<64x8xf32>
    %c0_12 = arith.constant 0 : index
    %c0_13 = arith.constant 0 : index
    %c0_14 = arith.constant 0 : index
    %c0_15 = arith.constant 0 : index
    %13 = vector.load %arg1[%c0_12, %c0_13, %c0_14, %c0_15] : memref<1x10x10x8xbf16, #tpu.memory_space<vmem>>, vector<1x8x8x8xbf16>
    %14 = vector.shape_cast %13 : vector<1x8x8x8xbf16> to vector<8x8x8xbf16>
    %15 = vector.shape_cast %14 : vector<8x8x8xbf16> to vector<64x8xbf16>
    %c0_16 = arith.constant 0 : index
    %c0_17 = arith.constant 0 : index
    %c0_18 = arith.constant 0 : index
    %16 = vector.load %arg2[%c0_16, %c0_17, %c0_18] : memref<9x8x8xbf16, #tpu.memory_space<vmem>>, vector<1x8x8xbf16>
    %17 = vector.shape_cast %16 : vector<1x8x8xbf16> to vector<8x8xbf16>
    %cst_19 = arith.constant dense<0.000000e+00> : vector<64x8xf32>
    %18 = tpu.matmul %15, %17, %cst_19 {dimension_numbers = #tpu.dot_dimension_numbers<[1], [0], [0], [1], [0, 0, 1, 1], [], []>} : vector<64x8xbf16>, vector<8x8xbf16>, vector<64x8xf32> -> vector<64x8xf32>
    %19 = arith.addf %12, %18 : vector<64x8xf32>
    %c0_20 = arith.constant 0 : index
    %c0_21 = arith.constant 0 : index
    %c1_22 = arith.constant 1 : index
    %c0_23 = arith.constant 0 : index
    %20 = vector.load %arg1[%c0_20, %c0_21, %c1_22, %c0_23] : memref<1x10x10x8xbf16, #tpu.memory_space<vmem>>, vector<1x8x8x8xbf16>
    %21 = vector.shape_cast %20 : vector<1x8x8x8xbf16> to vector<8x8x8xbf16>
    %22 = vector.shape_cast %21 : vector<8x8x8xbf16> to vector<64x8xbf16>
    %c1_24 = arith.constant 1 : index
    %c0_25 = arith.constant 0 : index
    %c0_26 = arith.constant 0 : index
    %23 = vector.load %arg2[%c1_24, %c0_25, %c0_26] : memref<9x8x8xbf16, #tpu.memory_space<vmem>>, vector<1x8x8xbf16>
    %24 = vector.shape_cast %23 : vector<1x8x8xbf16> to vector<8x8xbf16>
    %cst_27 = arith.constant dense<0.000000e+00> : vector<64x8xf32>
    %25 = tpu.matmul %22, %24, %cst_27 {dimension_numbers = #tpu.dot_dimension_numbers<[1], [0], [0], [1], [0, 0, 1, 1], [], []>} : vector<64x8xbf16>, vector<8x8xbf16>, vector<64x8xf32> -> vector<64x8xf32>
    %26 = arith.addf %19, %25 : vector<64x8xf32>
    %c0_28 = arith.constant 0 : index
    %c0_29 = arith.constant 0 : index
    %c2 = arith.constant 2 : index
    %c0_30 = arith.constant 0 : index
    %27 = vector.load %arg1[%c0_28, %c0_29, %c2, %c0_30] : memref<1x10x10x8xbf16, #tpu.memory_space<vmem>>, vector<1x8x8x8xbf16>
    %28 = vector.shape_cast %27 : vector<1x8x8x8xbf16> to vector<8x8x8xbf16>
    %29 = vector.shape_cast %28 : vector<8x8x8xbf16> to vector<64x8xbf16>
    %c2_31 = arith.constant 2 : index
    %c0_32 = arith.constant 0 : index
    %c0_33 = arith.constant 0 : index
    %30 = vector.load %arg2[%c2_31, %c0_32, %c0_33] : memref<9x8x8xbf16, #tpu.memory_space<vmem>>, vector<1x8x8xbf16>
    %31 = vector.shape_cast %30 : vector<1x8x8xbf16> to vector<8x8xbf16>
    %cst_34 = arith.constant dense<0.000000e+00> : vector<64x8xf32>
    %32 = tpu.matmul %29, %31, %cst_34 {dimension_numbers = #tpu.dot_dimension_numbers<[1], [0], [0], [1], [0, 0, 1, 1], [], []>} : vector<64x8xbf16>, vector<8x8xbf16>, vector<64x8xf32> -> vector<64x8xf32>
    %33 = arith.addf %26, %32 : vector<64x8xf32>
    %c0_35 = arith.constant 0 : index
    %c1_36 = arith.constant 1 : index
    %c0_37 = arith.constant 0 : index
    %c0_38 = arith.constant 0 : index
    %34 = vector.load %arg1[%c0_35, %c1_36, %c0_37, %c0_38] : memref<1x10x10x8xbf16, #tpu.memory_space<vmem>>, vector<1x8x8x8xbf16>
    %35 = vector.shape_cast %34 : vector<1x8x8x8xbf16> to vector<8x8x8xbf16>
    %36 = vector.shape_cast %35 : vector<8x8x8xbf16> to vector<64x8xbf16>
    %c3 = arith.constant 3 : index
    %c0_39 = arith.constant 0 : index
    %c0_40 = arith.constant 0 : index
    %37 = vector.load %arg2[%c3, %c0_39, %c0_40] : memref<9x8x8xbf16, #tpu.memory_space<vmem>>, vector<1x8x8xbf16>
    %38 = vector.shape_cast %37 : vector<1x8x8xbf16> to vector<8x8xbf16>
    %cst_41 = arith.constant dense<0.000000e+00> : vector<64x8xf32>
    %39 = tpu.matmul %36, %38, %cst_41 {dimension_numbers = #tpu.dot_dimension_numbers<[1], [0], [0], [1], [0, 0, 1, 1], [], []>} : vector<64x8xbf16>, vector<8x8xbf16>, vector<64x8xf32> -> vector<64x8xf32>
    %40 = arith.addf %33, %39 : vector<64x8xf32>
    %c0_42 = arith.constant 0 : index
    %c1_43 = arith.constant 1 : index
    %c1_44 = arith.constant 1 : index
    %c0_45 = arith.constant 0 : index
    %41 = vector.load %arg1[%c0_42, %c1_43, %c1_44, %c0_45] : memref<1x10x10x8xbf16, #tpu.memory_space<vmem>>, vector<1x8x8x8xbf16>
    %42 = vector.shape_cast %41 : vector<1x8x8x8xbf16> to vector<8x8x8xbf16>
    %43 = vector.shape_cast %42 : vector<8x8x8xbf16> to vector<64x8xbf16>
    %c4 = arith.constant 4 : index
    %c0_46 = arith.constant 0 : index
    %c0_47 = arith.constant 0 : index
    %44 = vector.load %arg2[%c4, %c0_46, %c0_47] : memref<9x8x8xbf16, #tpu.memory_space<vmem>>, vector<1x8x8xbf16>
    %45 = vector.shape_cast %44 : vector<1x8x8xbf16> to vector<8x8xbf16>
    %cst_48 = arith.constant dense<0.000000e+00> : vector<64x8xf32>
    %46 = tpu.matmul %43, %45, %cst_48 {dimension_numbers = #tpu.dot_dimension_numbers<[1], [0], [0], [1], [0, 0, 1, 1], [], []>} : vector<64x8xbf16>, vector<8x8xbf16>, vector<64x8xf32> -> vector<64x8xf32>
    %47 = arith.addf %40, %46 : vector<64x8xf32>
    %c0_49 = arith.constant 0 : index
    %c1_50 = arith.constant 1 : index
    %c2_51 = arith.constant 2 : index
    %c0_52 = arith.constant 0 : index
    %48 = vector.load %arg1[%c0_49, %c1_50, %c2_51, %c0_52] : memref<1x10x10x8xbf16, #tpu.memory_space<vmem>>, vector<1x8x8x8xbf16>
    %49 = vector.shape_cast %48 : vector<1x8x8x8xbf16> to vector<8x8x8xbf16>
    %50 = vector.shape_cast %49 : vector<8x8x8xbf16> to vector<64x8xbf16>
    %c5 = arith.constant 5 : index
    %c0_53 = arith.constant 0 : index
    %c0_54 = arith.constant 0 : index
    %51 = vector.load %arg2[%c5, %c0_53, %c0_54] : memref<9x8x8xbf16, #tpu.memory_space<vmem>>, vector<1x8x8xbf16>
    %52 = vector.shape_cast %51 : vector<1x8x8xbf16> to vector<8x8xbf16>
    %cst_55 = arith.constant dense<0.000000e+00> : vector<64x8xf32>
    %53 = tpu.matmul %50, %52, %cst_55 {dimension_numbers = #tpu.dot_dimension_numbers<[1], [0], [0], [1], [0, 0, 1, 1], [], []>} : vector<64x8xbf16>, vector<8x8xbf16>, vector<64x8xf32> -> vector<64x8xf32>
    %54 = arith.addf %47, %53 : vector<64x8xf32>
    %c0_56 = arith.constant 0 : index
    %c2_57 = arith.constant 2 : index
    %c0_58 = arith.constant 0 : index
    %c0_59 = arith.constant 0 : index
    %55 = vector.load %arg1[%c0_56, %c2_57, %c0_58, %c0_59] : memref<1x10x10x8xbf16, #tpu.memory_space<vmem>>, vector<1x8x8x8xbf16>
    %56 = vector.shape_cast %55 : vector<1x8x8x8xbf16> to vector<8x8x8xbf16>
    %57 = vector.shape_cast %56 : vector<8x8x8xbf16> to vector<64x8xbf16>
    %c6 = arith.constant 6 : index
    %c0_60 = arith.constant 0 : index
    %c0_61 = arith.constant 0 : index
    %58 = vector.load %arg2[%c6, %c0_60, %c0_61] : memref<9x8x8xbf16, #tpu.memory_space<vmem>>, vector<1x8x8xbf16>
    %59 = vector.shape_cast %58 : vector<1x8x8xbf16> to vector<8x8xbf16>
    %cst_62 = arith.constant dense<0.000000e+00> : vector<64x8xf32>
    %60 = tpu.matmul %57, %59, %cst_62 {dimension_numbers = #tpu.dot_dimension_numbers<[1], [0], [0], [1], [0, 0, 1, 1], [], []>} : vector<64x8xbf16>, vector<8x8xbf16>, vector<64x8xf32> -> vector<64x8xf32>
    %61 = arith.addf %54, %60 : vector<64x8xf32>
    %c0_63 = arith.constant 0 : index
    %c2_64 = arith.constant 2 : index
    %c1_65 = arith.constant 1 : index
    %c0_66 = arith.constant 0 : index
    %62 = vector.load %arg1[%c0_63, %c2_64, %c1_65, %c0_66] : memref<1x10x10x8xbf16, #tpu.memory_space<vmem>>, vector<1x8x8x8xbf16>
    %63 = vector.shape_cast %62 : vector<1x8x8x8xbf16> to vector<8x8x8xbf16>
    %64 = vector.shape_cast %63 : vector<8x8x8xbf16> to vector<64x8xbf16>
    %c7 = arith.constant 7 : index
    %c0_67 = arith.constant 0 : index
    %c0_68 = arith.constant 0 : index
    %65 = vector.load %arg2[%c7, %c0_67, %c0_68] : memref<9x8x8xbf16, #tpu.memory_space<vmem>>, vector<1x8x8xbf16>
    %66 = vector.shape_cast %65 : vector<1x8x8xbf16> to vector<8x8xbf16>
    %cst_69 = arith.constant dense<0.000000e+00> : vector<64x8xf32>
    %67 = tpu.matmul %64, %66, %cst_69 {dimension_numbers = #tpu.dot_dimension_numbers<[1], [0], [0], [1], [0, 0, 1, 1], [], []>} : vector<64x8xbf16>, vector<8x8xbf16>, vector<64x8xf32> -> vector<64x8xf32>
    %68 = arith.addf %61, %67 : vector<64x8xf32>
    %c0_70 = arith.constant 0 : index
    %c2_71 = arith.constant 2 : index
    %c2_72 = arith.constant 2 : index
    %c0_73 = arith.constant 0 : index
    %69 = vector.load %arg1[%c0_70, %c2_71, %c2_72, %c0_73] : memref<1x10x10x8xbf16, #tpu.memory_space<vmem>>, vector<1x8x8x8xbf16>
    %70 = vector.shape_cast %69 : vector<1x8x8x8xbf16> to vector<8x8x8xbf16>
    %71 = vector.shape_cast %70 : vector<8x8x8xbf16> to vector<64x8xbf16>
    %c8 = arith.constant 8 : index
    %c0_74 = arith.constant 0 : index
    %c0_75 = arith.constant 0 : index
    %72 = vector.load %arg2[%c8, %c0_74, %c0_75] : memref<9x8x8xbf16, #tpu.memory_space<vmem>>, vector<1x8x8xbf16>
    %73 = vector.shape_cast %72 : vector<1x8x8xbf16> to vector<8x8xbf16>
    %cst_76 = arith.constant dense<0.000000e+00> : vector<64x8xf32>
    %74 = tpu.matmul %71, %73, %cst_76 {dimension_numbers = #tpu.dot_dimension_numbers<[1], [0], [0], [1], [0, 0, 1, 1], [], []>} : vector<64x8xbf16>, vector<8x8xbf16>, vector<64x8xf32> -> vector<64x8xf32>
    %75 = arith.addf %68, %74 : vector<64x8xf32>
    %c0_77 = arith.constant 0 : index
    %c0_78 = arith.constant 0 : index
    %76 = vector.load %arg3[%c0_77, %c0_78] : memref<1x8xf32, #tpu.memory_space<vmem>>, vector<1x8xf32>
    %77 = vector.broadcast %76 : vector<1x8xf32> to vector<64x8xf32>
    %78 = arith.addf %75, %77 : vector<64x8xf32>
    %cst_79 = arith.constant 0.000000e+00 : f32
    %79 = vector.broadcast %cst_79 : f32 to vector<64x8xf32>
    %80 = arith.maximumf %78, %79 : vector<64x8xf32>
    %81 = vector.shape_cast %80 : vector<64x8xf32> to vector<8x8x8xf32>
    %82 = arith.truncf %81 : vector<8x8x8xf32> to vector<8x8x8xbf16>
    %c1_80 = arith.constant 1 : index
    %c8_81 = arith.constant 8 : index
    %c0_82 = arith.constant 0 : index
    %83 = vector.load %arg9[%c1_80, %c8_81, %c0_82] : memref<10x24x8xbf16, #tpu.memory_space<vmem>>, vector<8x8x8xbf16>
    tpu.vector_store %arg9[%c1_80, %c8_81, %c0_82], %82 {strides = array<i32>} : memref<10x24x8xbf16, #tpu.memory_space<vmem>>, vector<8x8x8xbf16>,
    %cst_83 = arith.constant 0.000000e+00 : f32
    %84 = vector.broadcast %cst_83 : f32 to vector<64x128xf32>
    %c0_84 = arith.constant 0 : index
    %c7_85 = arith.constant 7 : index
    %c0_86 = arith.constant 0 : index
    %85 = vector.load %arg9[%c0_84, %c7_85, %c0_86] : memref<10x24x8xbf16, #tpu.memory_space<vmem>>, vector<8x8x8xbf16>
    %86 = vector.shape_cast %85 : vector<8x8x8xbf16> to vector<64x8xbf16>
    %c0_87 = arith.constant 0 : index
    %c0_88 = arith.constant 0 : index
    %c0_89 = arith.constant 0 : index
    %87 = vector.load %arg4[%c0_87, %c0_88, %c0_89] : memref<9x8x128xbf16, #tpu.memory_space<vmem>>, vector<1x8x128xbf16>
    %88 = vector.shape_cast %87 : vector<1x8x128xbf16> to vector<8x128xbf16>
    %cst_90 = arith.constant dense<0.000000e+00> : vector<64x128xf32>
    %89 = tpu.matmul %86, %88, %cst_90 {dimension_numbers = #tpu.dot_dimension_numbers<[1], [0], [0], [1], [0, 0, 1, 1], [], []>} : vector<64x8xbf16>, vector<8x128xbf16>, vector<64x128xf32> -> vector<64x128xf32>
    %90 = arith.addf %84, %89 : vector<64x128xf32>
    %c0_91 = arith.constant 0 : index
    %c8_92 = arith.constant 8 : index
    %c0_93 = arith.constant 0 : index
    %91 = vector.load %arg9[%c0_91, %c8_92, %c0_93] : memref<10x24x8xbf16, #tpu.memory_space<vmem>>, vector<8x8x8xbf16>
    %92 = vector.shape_cast %91 : vector<8x8x8xbf16> to vector<64x8xbf16>
    %c1_94 = arith.constant 1 : index
    %c0_95 = arith.constant 0 : index
    %c0_96 = arith.constant 0 : index
    %93 = vector.load %arg4[%c1_94, %c0_95, %c0_96] : memref<9x8x128xbf16, #tpu.memory_space<vmem>>, vector<1x8x128xbf16>
    %94 = vector.shape_cast %93 : vector<1x8x128xbf16> to vector<8x128xbf16>
    %cst_97 = arith.constant dense<0.000000e+00> : vector<64x128xf32>
    %95 = tpu.matmul %92, %94, %cst_97 {dimension_numbers = #tpu.dot_dimension_numbers<[1], [0], [0], [1], [0, 0, 1, 1], [], []>} : vector<64x8xbf16>, vector<8x128xbf16>, vector<64x128xf32> -> vector<64x128xf32>
    %96 = arith.addf %90, %95 : vector<64x128xf32>
    %c0_98 = arith.constant 0 : index
    %c9_99 = arith.constant 9 : index
    %c0_100 = arith.constant 0 : index
    %97 = vector.load %arg9[%c0_98, %c9_99, %c0_100] : memref<10x24x8xbf16, #tpu.memory_space<vmem>>, vector<8x8x8xbf16>
    %98 = vector.shape_cast %97 : vector<8x8x8xbf16> to vector<64x8xbf16>
    %c2_101 = arith.constant 2 : index
    %c0_102 = arith.constant 0 : index
    %c0_103 = arith.constant 0 : index
    %99 = vector.load %arg4[%c2_101, %c0_102, %c0_103] : memref<9x8x128xbf16, #tpu.memory_space<vmem>>, vector<1x8x128xbf16>
    %100 = vector.shape_cast %99 : vector<1x8x128xbf16> to vector<8x128xbf16>
    %cst_104 = arith.constant dense<0.000000e+00> : vector<64x128xf32>
    %101 = tpu.matmul %98, %100, %cst_104 {dimension_numbers = #tpu.dot_dimension_numbers<[1], [0], [0], [1], [0, 0, 1, 1], [], []>} : vector<64x8xbf16>, vector<8x128xbf16>, vector<64x128xf32> -> vector<64x128xf32>
    %102 = arith.addf %96, %101 : vector<64x128xf32>
    %c1_105 = arith.constant 1 : index
    %c7_106 = arith.constant 7 : index
    %c0_107 = arith.constant 0 : index
    %103 = vector.load %arg9[%c1_105, %c7_106, %c0_107] : memref<10x24x8xbf16, #tpu.memory_space<vmem>>, vector<8x8x8xbf16>
    %104 = vector.shape_cast %103 : vector<8x8x8xbf16> to vector<64x8xbf16>
    %c3_108 = arith.constant 3 : index
    %c0_109 = arith.constant 0 : index
    %c0_110 = arith.constant 0 : index
    %105 = vector.load %arg4[%c3_108, %c0_109, %c0_110] : memref<9x8x128xbf16, #tpu.memory_space<vmem>>, vector<1x8x128xbf16>
    %106 = vector.shape_cast %105 : vector<1x8x128xbf16> to vector<8x128xbf16>
    %cst_111 = arith.constant dense<0.000000e+00> : vector<64x128xf32>
    %107 = tpu.matmul %104, %106, %cst_111 {dimension_numbers = #tpu.dot_dimension_numbers<[1], [0], [0], [1], [0, 0, 1, 1], [], []>} : vector<64x8xbf16>, vector<8x128xbf16>, vector<64x128xf32> -> vector<64x128xf32>
    %108 = arith.addf %102, %107 : vector<64x128xf32>
    %c1_112 = arith.constant 1 : index
    %c8_113 = arith.constant 8 : index
    %c0_114 = arith.constant 0 : index
    %109 = vector.load %arg9[%c1_112, %c8_113, %c0_114] : memref<10x24x8xbf16, #tpu.memory_space<vmem>>, vector<8x8x8xbf16>
    %110 = vector.shape_cast %109 : vector<8x8x8xbf16> to vector<64x8xbf16>
    %c4_115 = arith.constant 4 : index
    %c0_116 = arith.constant 0 : index
    %c0_117 = arith.constant 0 : index
    %111 = vector.load %arg4[%c4_115, %c0_116, %c0_117] : memref<9x8x128xbf16, #tpu.memory_space<vmem>>, vector<1x8x128xbf16>
    %112 = vector.shape_cast %111 : vector<1x8x128xbf16> to vector<8x128xbf16>
    %cst_118 = arith.constant dense<0.000000e+00> : vector<64x128xf32>
    %113 = tpu.matmul %110, %112, %cst_118 {dimension_numbers = #tpu.dot_dimension_numbers<[1], [0], [0], [1], [0, 0, 1, 1], [], []>} : vector<64x8xbf16>, vector<8x128xbf16>, vector<64x128xf32> -> vector<64x128xf32>
    %114 = arith.addf %108, %113 : vector<64x128xf32>
    %c1_119 = arith.constant 1 : index
    %c9_120 = arith.constant 9 : index
    %c0_121 = arith.constant 0 : index
    %115 = vector.load %arg9[%c1_119, %c9_120, %c0_121] : memref<10x24x8xbf16, #tpu.memory_space<vmem>>, vector<8x8x8xbf16>
    %116 = vector.shape_cast %115 : vector<8x8x8xbf16> to vector<64x8xbf16>
    %c5_122 = arith.constant 5 : index
    %c0_123 = arith.constant 0 : index
    %c0_124 = arith.constant 0 : index
    %117 = vector.load %arg4[%c5_122, %c0_123, %c0_124] : memref<9x8x128xbf16, #tpu.memory_space<vmem>>, vector<1x8x128xbf16>
    %118 = vector.shape_cast %117 : vector<1x8x128xbf16> to vector<8x128xbf16>
    %cst_125 = arith.constant dense<0.000000e+00> : vector<64x128xf32>
    %119 = tpu.matmul %116, %118, %cst_125 {dimension_numbers = #tpu.dot_dimension_numbers<[1], [0], [0], [1], [0, 0, 1, 1], [], []>} : vector<64x8xbf16>, vector<8x128xbf16>, vector<64x128xf32> -> vector<64x128xf32>
    %120 = arith.addf %114, %119 : vector<64x128xf32>
    %c2_126 = arith.constant 2 : index
    %c7_127 = arith.constant 7 : index
    %c0_128 = arith.constant 0 : index
    %121 = vector.load %arg9[%c2_126, %c7_127, %c0_128] : memref<10x24x8xbf16, #tpu.memory_space<vmem>>, vector<8x8x8xbf16>
    %122 = vector.shape_cast %121 : vector<8x8x8xbf16> to vector<64x8xbf16>
    %c6_129 = arith.constant 6 : index
    %c0_130 = arith.constant 0 : index
    %c0_131 = arith.constant 0 : index
    %123 = vector.load %arg4[%c6_129, %c0_130, %c0_131] : memref<9x8x128xbf16, #tpu.memory_space<vmem>>, vector<1x8x128xbf16>
    %124 = vector.shape_cast %123 : vector<1x8x128xbf16> to vector<8x128xbf16>
    %cst_132 = arith.constant dense<0.000000e+00> : vector<64x128xf32>
    %125 = tpu.matmul %122, %124, %cst_132 {dimension_numbers = #tpu.dot_dimension_numbers<[1], [0], [0], [1], [0, 0, 1, 1], [], []>} : vector<64x8xbf16>, vector<8x128xbf16>, vector<64x128xf32> -> vector<64x128xf32>
    %126 = arith.addf %120, %125 : vector<64x128xf32>
    %c2_133 = arith.constant 2 : index
    %c8_134 = arith.constant 8 : index
    %c0_135 = arith.constant 0 : index
    %127 = vector.load %arg9[%c2_133, %c8_134, %c0_135] : memref<10x24x8xbf16, #tpu.memory_space<vmem>>, vector<8x8x8xbf16>
    %128 = vector.shape_cast %127 : vector<8x8x8xbf16> to vector<64x8xbf16>
    %c7_136 = arith.constant 7 : index
    %c0_137 = arith.constant 0 : index
    %c0_138 = arith.constant 0 : index
    %129 = vector.load %arg4[%c7_136, %c0_137, %c0_138] : memref<9x8x128xbf16, #tpu.memory_space<vmem>>, vector<1x8x128xbf16>
    %130 = vector.shape_cast %129 : vector<1x8x128xbf16> to vector<8x128xbf16>
    %cst_139 = arith.constant dense<0.000000e+00> : vector<64x128xf32>
    %131 = tpu.matmul %128, %130, %cst_139 {dimension_numbers = #tpu.dot_dimension_numbers<[1], [0], [0], [1], [0, 0, 1, 1], [], []>} : vector<64x8xbf16>, vector<8x128xbf16>, vector<64x128xf32> -> vector<64x128xf32>
    %132 = arith.addf %126, %131 : vector<64x128xf32>
    %c2_140 = arith.constant 2 : index
    %c9_141 = arith.constant 9 : index
    %c0_142 = arith.constant 0 : index
    %133 = vector.load %arg9[%c2_140, %c9_141, %c0_142] : memref<10x24x8xbf16, #tpu.memory_space<vmem>>, vector<8x8x8xbf16>
    %134 = vector.shape_cast %133 : vector<8x8x8xbf16> to vector<64x8xbf16>
    %c8_143 = arith.constant 8 : index
    %c0_144 = arith.constant 0 : index
    %c0_145 = arith.constant 0 : index
    %135 = vector.load %arg4[%c8_143, %c0_144, %c0_145] : memref<9x8x128xbf16, #tpu.memory_space<vmem>>, vector<1x8x128xbf16>
    %136 = vector.shape_cast %135 : vector<1x8x128xbf16> to vector<8x128xbf16>
    %cst_146 = arith.constant dense<0.000000e+00> : vector<64x128xf32>
    %137 = tpu.matmul %134, %136, %cst_146 {dimension_numbers = #tpu.dot_dimension_numbers<[1], [0], [0], [1], [0, 0, 1, 1], [], []>} : vector<64x8xbf16>, vector<8x128xbf16>, vector<64x128xf32> -> vector<64x128xf32>
    %138 = arith.addf %132, %137 : vector<64x128xf32>
    %c0_147 = arith.constant 0 : index
    %c1_148 = arith.constant 1 : index
    %c1_149 = arith.constant 1 : index
    %c0_150 = arith.constant 0 : index
    %139 = vector.load %arg1[%c0_147, %c1_148, %c1_149, %c0_150] : memref<1x10x10x8xbf16, #tpu.memory_space<vmem>>, vector<1x8x8x8xbf16>
    %140 = vector.shape_cast %139 : vector<1x8x8x8xbf16> to vector<8x8x8xbf16>
    %141 = vector.shape_cast %140 : vector<8x8x8xbf16> to vector<64x8xbf16>
    %c0_151 = arith.constant 0 : index
    %c0_152 = arith.constant 0 : index
    %142 = vector.load %arg6[%c0_151, %c0_152] : memref<8x128xbf16, #tpu.memory_space<vmem>>, vector<8x128xbf16>
    %cst_153 = arith.constant dense<0.000000e+00> : vector<64x128xf32>
    %143 = tpu.matmul %141, %142, %cst_153 {dimension_numbers = #tpu.dot_dimension_numbers<[1], [0], [0], [1], [0, 0, 1, 1], [], []>} : vector<64x8xbf16>, vector<8x128xbf16>, vector<64x128xf32> -> vector<64x128xf32>
    %c0_154 = arith.constant 0 : index
    %c0_155 = arith.constant 0 : index
    %144 = vector.load %arg5[%c0_154, %c0_155] : memref<1x128xf32, #tpu.memory_space<vmem>>, vector<1x128xf32>
    %145 = vector.broadcast %144 : vector<1x128xf32> to vector<64x128xf32>
    %146 = arith.addf %138, %145 : vector<64x128xf32>
    %147 = arith.addf %146, %143 : vector<64x128xf32>
    %c0_156 = arith.constant 0 : index
    %c0_157 = arith.constant 0 : index
    %148 = vector.load %arg7[%c0_156, %c0_157] : memref<1x128xf32, #tpu.memory_space<vmem>>, vector<1x128xf32>
    %149 = vector.broadcast %148 : vector<1x128xf32> to vector<64x128xf32>
    %150 = arith.addf %147, %149 : vector<64x128xf32>
    %cst_158 = arith.constant 0.000000e+00 : f32
    %151 = vector.broadcast %cst_158 : f32 to vector<64x128xf32>
    %152 = arith.maximumf %150, %151 : vector<64x128xf32>
    %153 = arith.truncf %152 : vector<64x128xf32> to vector<64x128xbf16>
    %c0_159 = arith.constant 0 : index
    %c0_160 = arith.constant 0 : index
    %c0_161 = arith.constant 0 : index
    %154 = vector.load %arg8[%c0_159, %c0_160, %c0_161] : memref<1x64x128xbf16, #tpu.memory_space<vmem>>, vector<1x64x128xbf16>
    %155 = vector.shape_cast %154 : vector<1x64x128xbf16> to vector<64x128xbf16>
    %156 = vector.shape_cast %153 : vector<64x128xbf16> to vector<1x64x128xbf16>
    tpu.vector_store %arg8[%c0_159, %c0_160, %c0_161], %156 {strides = array<i32>} : memref<1x64x128xbf16, #tpu.memory_space<vmem>>, vector<1x64x128xbf16>,
    return
  }
  func.func @transform_0(%arg0: i32) -> (i32, i32, i32, i32) {
    %c0_i32 = arith.constant 0 : i32
    %c0_i32_0 = arith.constant 0 : i32
    %c0_i32_1 = arith.constant 0 : i32
    %c0_i32_2 = arith.constant 0 : i32
    return %arg0, %c0_i32, %c0_i32_0, %c0_i32_1 : i32, i32, i32, i32
  }
  func.func @transform_1(%arg0: i32) -> (i32, i32, i32) {
    %c0_i32 = arith.constant 0 : i32
    %c0_i32_0 = arith.constant 0 : i32
    %c0_i32_1 = arith.constant 0 : i32
    %c0_i32_2 = arith.constant 0 : i32
    return %c0_i32, %c0_i32_0, %c0_i32_1 : i32, i32, i32
  }
  func.func @transform_2(%arg0: i32) -> (i32, i32) {
    %c0_i32 = arith.constant 0 : i32
    %c0_i32_0 = arith.constant 0 : i32
    %c0_i32_1 = arith.constant 0 : i32
    return %c0_i32, %c0_i32_0 : i32, i32
  }
  func.func @transform_3(%arg0: i32) -> (i32, i32, i32) {
    %c0_i32 = arith.constant 0 : i32
    %c0_i32_0 = arith.constant 0 : i32
    %c0_i32_1 = arith.constant 0 : i32
    %c0_i32_2 = arith.constant 0 : i32
    return %c0_i32, %c0_i32_0, %c0_i32_1 : i32, i32, i32
  }
  func.func @transform_4(%arg0: i32) -> (i32, i32) {
    %c0_i32 = arith.constant 0 : i32
    %c0_i32_0 = arith.constant 0 : i32
    %c0_i32_1 = arith.constant 0 : i32
    return %c0_i32, %c0_i32_0 : i32, i32
  }
  func.func @transform_5(%arg0: i32) -> (i32, i32) {
    %c0_i32 = arith.constant 0 : i32
    %c0_i32_0 = arith.constant 0 : i32
    %c0_i32_1 = arith.constant 0 : i32
    return %c0_i32, %c0_i32_0 : i32, i32
  }
  func.func @transform_6(%arg0: i32) -> (i32, i32) {
    %c0_i32 = arith.constant 0 : i32
    %c0_i32_0 = arith.constant 0 : i32
    %c0_i32_1 = arith.constant 0 : i32
    return %c0_i32, %c0_i32_0 : i32, i32
  }
  func.func @transform_7(%arg0: i32) -> (i32, i32, i32) {
    %c0_i32 = arith.constant 0 : i32
    %c0_i32_0 = arith.constant 0 : i32
    %c0_i32_1 = arith.constant 0 : i32
    return %arg0, %c0_i32, %c0_i32_0 : i32, i32, i32
  }
}

</mosaic_0001>

<bundles_post_ra>
// kernel: run_chain.2
= control target key start
LH: loop header
LB: loop body
LE: loop exit
PB: predicated region body
PF: predicated region fallthrough
CT: control target
= control target key end

     0   :  { %s4535_s24 = smov 0   ;;  %s5141_s0 = inlined_call_operand.vmem [shape: bf16[2,36,9,4], index: 0, kind: input, shape index: {}]   ;;  %s5142_s1 = inlined_call_operand.vmem [shape: bf16[9,4,8], index: 1, kind: input, shape index: {}]   ;;  %s5143_s2 = inlined_call_operand.vmem [shape: f32[1,8], index: 2, kind: input, shape index: {}]   ;;  %s5144_s3 = inlined_call_operand.vmem [shape: bf16[9,8,128], index: 3, kind: input, shape index: {}]   ;;  %s5145_s4 = inlined_call_operand.vmem [shape: f32[1,128], index: 4, kind: input, shape index: {}]   ;;  %s5146_s5 = inlined_call_operand.vmem [shape: bf16[4,128], index: 5, kind: input, shape index: {}]   ;;  %s5147_s6 = inlined_call_operand.vmem [shape: f32[1,128], index: 6, kind: input, shape index: {}]   ;;  %s5148_s7 = inlined_call_operand.vmem [shape: bf16[2,64,128], index: 7, kind: output, shape index: {}]  }
   0x1 LB: > { %s3660_s25 = sadd.s32 4294967295, %s4492_s24   ;;  %p3664_p0 = scmp.ge.s32.totalorder %s4492_s24, 1  ;;  %s4492_s24 = sphi %s4535_s24, %s17_s24  }
   0x2   : > { %p237_p1 = scmp.lt.s32.totalorder %s4492_s24, 3 }
   0x4   : > { %p238_p2 = pnand %p3664_p0, %p237_p1 }
   0x5   : > { %v3676_v0 = vld [vmem:[%s5142_s1 + $0x2] sm:$0x3] (!%p238_p2)  ;;  %vm358_vm0 = vcmask (!%p238_p2), 1041408   ;;  %p269_p3 = scmp.lt.s32.totalorder (!%p238_p2), %s3660_s25, 1  ;;  %v313_v2 = vld [vmem:[%s5142_s1] sm:$0x3] (!%p238_p2) }
   0x6   : > { %241 = sbr.rel (%p238_p2) target bundleno = 754 (0x2f2), region = 48  ;;  %4416 = vmatprep.subr.msk.bf16.mxu0 (!%p238_p2), %vm358_vm0, %v3676_v0  ;;  %v360_v1 = vsel (!%p238_p2), %vm358_vm0, %v3676_v0, 0  ;;  %vm345_vm1 = vcmask (!%p238_p2), 31744   ;;  %v460_v3 = vsel (!%p238_p2), %vm358_vm0, %v313_v2, 0  ;;  %v3693_v5 = vld [vmem:[%s5142_s1 + $0x4] sm:$0x3] (!%p238_p2) }
   0x7   : > { %4081 = vmatpush3.bf16.msra.mxu0 (!%p238_p2), %v360_v1  ;;  %vm543_vm2 = vsmask.f32 (!%p238_p2), 3328  ;;  %vm544_vm3 = vsmask.f32 (!%p238_p2), 7440  ;;  %v685_v50 = vsel (!%p238_p2), %vm358_vm0, %v3693_v5, 0  ;;  %vm280_vm5 = vcmask (!%p238_p2), 60416  }
   0x8   : > { %4417 = vmatprep.subr.msk.bf16.mxu0 (!%p238_p2), %vm358_vm0, %v313_v2  ;;  %vm4588_vm4 = vmor (!%p238_p2), %vm543_vm2, %vm544_vm3  ;;  %v3710_v55 = vld [vmem:[%s5142_s1 + $0x6] sm:$0x3] (!%p238_p2)  ;;  %vm1894_vm6 = vcmask (!%p238_p2), 1043456   ;;  %vm1881_vm7 = vcmask (!%p238_p2), 64512   ;;  %vm1751_vm8 = vsmask.f32 (!%p238_p2), 256 }
   0x9   : > { %vm1752_vm9 = vsmask.f32 (!%p238_p2), 4368 }
   0xa   : > { %vm4816_vm10 = vmor (!%p238_p2), %vm1751_vm8, %vm1752_vm9 }
   0xd   : > { %s5154_s25 = smov (!%p269_p3, %s3660_s25), 1 }
   0xe   : > { %s4436_s30 = smul.u32 288, %s5154_s25 }
  0x10   : > { %s4558_s10 = scalar_lea.vmem %s5141_s0, %s4436_s30 }
  0x11   : > { %v4446_v4 = vld [vmem:[%s4558_s10 + $0x48] ss:$8 sps:$4 sm:$0xff]   ;;  %v4447_v6 = vld [vmem:[%s4558_s10 + $0x58] ss:$8 sps:$4 sm:$0xff]   ;;  %v528_v11 = vld [vmem:[%s4558_s10 + $0x4] sm:$0x1] }
  0x12   : > { %4082 = vmatprep.mubr.msk.bf16.mxu0 %vm345_vm1, %v4446_v4  ;;  %v4448_v7 = vld [vmem:[%s4558_s10 + $0x68] ss:$8 sps:$4 sm:$0xff]   ;;  %v4449_v8 = vld [vmem:[%s4558_s10 + $0x78] ss:$8 sps:$4 sm:$0xff]   ;;  %v530_v13 = vld [vmem:[%s4558_s10 + $0xc] sm:$0x1] }
  0x13   : > { %4083 = vmatmul.mubr.msk.bf16.vlgmr.msra.gmra.mrb[0].mxu0 %vm345_vm1, %v4447_v6  ;;  %v4450_v9 = vld [vmem:[%s4558_s10] ss:$8 sps:$4 sm:$0xff]   ;;  %v556_v17 = vshll.u32 %v528_v11, 16  ;;  %v531_v19 = vld [vmem:[%s4558_s10 + $0x10] sm:$0xf]  ;;  %v570_v23 = vshll.u32 %v530_v13, 16 }
  0x14   : > { %4091 = vmatpush3.bf16.msra.mxu0 %v460_v3  ;;  %4086 = vmatprep.mubr.msk.bf16.mxu0 %vm345_vm1, %v4448_v7  ;;  %v527_v10 = vld [vmem:[%s4558_s10] sm:$0xf]  ;;  %v529_v12 = vld [vmem:[%s4558_s10 + $0x8] sm:$0xf]  ;;  %v533_v24 = vld [vmem:[%s4558_s10 + $0x18] sm:$0xf] }
  0x15   : > { %4418 = vmatprep.subr.msk.bf16.mxu0 %vm358_vm0, %v3693_v5  ;;  %v547_v14 = vshrl.u32 %v527_v10, 16  ;;  %v550_v15 = vshll.u32 %v527_v10, 16  ;;  %v561_v16 = vshrl.u32 %v529_v12, 16  ;;  %v564_v18 = vshll.u32 %v529_v12, 16  ;;  %v4451_v28 = vld [vmem:[%s4558_s10 + $0x10] ss:$8 sps:$4 sm:$0xff]  }
  0x16   : > { %v575_v26 = vshrl.u32 %v531_v19, 16  ;;  %v578_v27 = vshll.u32 %v531_v19, 16  ;;  %v532_v30 = vld [vmem:[%s4558_s10 + $0x14] sm:$0x1]  ;;  %v589_v31 = vshrl.u32 %v533_v24, 16  ;;  %v592_v32 = vshll.u32 %v533_v24, 16 }
  0x17   : > { %v549_v20 = vrot.slane %v547_v14, 4  ;;  %v552_v21 = vrot.slane %v550_v15, 5  ;;  %v563_v22 = vrot.slane %v561_v16, 4  ;;  %v566_v25 = vrot.slane %v564_v18, 5  ;;  %v535_v33 = vld [vmem:[%s4558_s10 + $0x20] sm:$0xf] }
  0x18   : > { %v4452_v34 = vld [vmem:[%s4558_s10 + $0x20] ss:$8 sps:$4 sm:$0xff]   ;;  %v558_v35 = vrot.slane %v556_v17, 5  ;;  %v534_v37 = vld [vmem:[%s4558_s10 + $0x1c] sm:$0x1]  ;;  %v577_v38 = vrot.slane %v575_v26, 4 }
  0x19   : > { %v553_v29 = vor.u32 %v552_v21, %v549_v20  ;;  %v567_v36 = vor.u32 %v566_v25, %v563_v22  ;;  %v580_v39 = vrot.slane %v578_v27, 5  ;;  %v572_v42 = vrot.slane %v570_v23, 5  ;;  %v537_v45 = vld [vmem:[%s4558_s10 + $0x28] sm:$0xf]  ;;  %v536_v48 = vld [vmem:[%s4558_s10 + $0x24] sm:$0x1] }
  0x1a   : > { %v591_v43 = vrot.slane %v589_v31, 4  ;;  %v594_v44 = vrot.slane %v592_v32, 5  ;;  %v584_v47 = vshll.u32 %v532_v30, 16  ;;  %v603_v49 = vshrl.u32 %v535_v33, 16  ;;  %v538_v52 = vld [vmem:[%s4558_s10 + $0x2c] sm:$0x1] }
  0x1b   : > { %4087 = vmatmul.mubr.msk.bf16.gmra.mrb[4].mxu0 %vm345_vm1, %v4449_v8  ;;  %v554_v41 = vrot.slane %v553_v29, 4  ;;  %v568_v46 = vrot.slane %v567_v36, 4  ;;  %v598_v51 = vshll.u32 %v534_v37, 16  ;;  %v606_v53 = vshll.u32 %v535_v33, 16  ;;  %v539_v59 = vld [vmem:[%s4558_s10 + $0x30] sm:$0xf] }
  0x1c   : > { %4092 = vmatprep.mubr.msk.bf16.mxu0 %vm345_vm1, %v4450_v9  ;;  %v581_v56 = vor.u32 %v580_v39, %v577_v38  ;;  %v605_v57 = vrot.slane %v603_v49, 4  ;;  %v617_v58 = vshrl.u32 %v537_v45, 16  ;;  %v595_v61 = vor.u32 %v594_v44, %v591_v43  ;;  %v541_v0 = vld [vmem:[%s4558_s10 + $0x38] sm:$0xf]  ;;  %v540_v13 = vld [vmem:[%s4558_s10 + $0x34] sm:$0x1] }
  0x1d   : > { %v559_v54 = vsel %vm4588_vm4, %v554_v41, %v558_v35  ;;  %v573_v60 = vsel %vm4588_vm4, %v568_v46, %v572_v42  ;;  %v608_v62 = vrot.slane %v606_v53, 5  ;;  %v612_v63 = vshll.u32 %v536_v48, 16  ;;  %v4453_v5 = vld [vmem:[%s4558_s10 + $0x30] ss:$8 sps:$4 sm:$0xff]   ;;  %v542_v19 = vld [vmem:[%s4558_s10 + $0x3c] sm:$0x1] }
  0x1e   : > { %v586_v1 = vrot.slane %v584_v47, 5  ;;  %v619_v2 = vrot.slane %v617_v58, 4  ;;  %v620_v3 = vshll.u32 %v537_v45, 16  ;;  %v626_v4 = vshll.u32 %v538_v52, 16  ;;  %v3727_v43 = vld [vmem:[%s5142_s1 + $0x8] sm:$0x3] }
  0x1f   : > { %v600_v6 = vrot.slane %v598_v51, 5  ;;  %v609_v7 = vor.u32 %v608_v62, %v605_v57  ;;  %v631_v8 = vshrl.u32 %v539_v59, 16  ;;  %v634_v9 = vshll.u32 %v539_v59, 16  ;;  %v4454_v47 = vld [vmem:[%s4558_s10 + $0x90] ss:$8 sps:$4 sm:$0xff]  }
  0x20   : > { %v3694_v10 = vcombine.low %v559_v54, %v573_v60  ;;  %v582_v11 = vrot.slane %v581_v56, 4  ;;  %v622_v12 = vrot.slane %v620_v3, 5  ;;  %v596_v14 = vrot.slane %v595_v61, 4  ;;  %v4455_v48 = vld [vmem:[%s4558_s10 + $0xa0] ss:$8 sps:$4 sm:$0xff]  }
  0x21   : > { %v614_v15 = vrot.slane %v612_v63, 5  ;;  %v628_v16 = vrot.slane %v626_v4, 5  ;;  %v645_v17 = vshrl.u32 %v541_v0, 16  ;;  %v633_v20 = vrot.slane %v631_v8, 4  ;;  %v3736_v49 = vld [vmem:[%s4558_s10 + $0x90] sm:$0xf] }
  0x22   : > { %v623_v18 = vor.u32 %v622_v12, %v619_v2  ;;  %v636_v21 = vrot.slane %v634_v9, 5  ;;  %v648_v22 = vshll.u32 %v541_v0, 16  ;;  %v610_v23 = vrot.slane %v609_v7, 4  ;;  %v4456_v51 = vld [vmem:[%s4558_s10 + $0xb0] ss:$8 sps:$4 sm:$0xff]  }
  0x23   : > { %4093 = vmatmul.mubr.msk.bf16.vlgmr.msra.gmra.mrb[0].mxu0 %vm345_vm1, %v4451_v28  ;;  %v647_v24 = vrot.slane %v645_v17, 4  ;;  %v587_v27 = vsel %vm4588_vm4, %v582_v11, %v586_v1  ;;  %v640_v28 = vshll.u32 %v540_v13, 16  ;;  %v601_v29 = vsel %vm4588_vm4, %v596_v14, %v600_v6  ;;  %v3738_v52 = vld [vmem:[%s4558_s10 + $0x98] sm:$0xf]  ;;  %v3752_v53 = vld [vmem:[%s5142_s1 + $0xa] sm:$0x3] }
  0x24   : > { %4101 = vmatpush3.bf16.msra.mxu0 %v685_v50  ;;  %4096 = vmatprep.mubr.msk.bf16.mxu0 %vm345_vm1, %v4452_v34  ;;  %v624_v25 = vrot.slane %v623_v18, 4  ;;  %v650_v26 = vrot.slane %v648_v22, 5  ;;  %v637_v30 = vor.u32 %v636_v21, %v633_v20  ;;  %v654_v32 = vshll.u32 %v542_v19, 16  ;;  %v3737_v54 = vld [vmem:[%s4558_s10 + $0x94] sm:$0x1] }
  0x25   : > { %4419 = vmatprep.subr.msk.bf16.mxu0 %vm358_vm0, %v3710_v55  ;;  %v615_v33 = vsel %vm4588_vm4, %v610_v23, %v614_v15  ;;  %v3695_v35 = vcombine.low %v587_v27, %v601_v29  ;;  %v642_v36 = vrot.slane %v640_v28, 5  ;;  %v804_v42 = vsel %vm358_vm0, %v3710_v55, 0  ;;  %v3739_v55 = vld [vmem:[%s4558_s10 + $0x9c] sm:$0x1]  ;;  %v4457_v60 = vld [vmem:[%s4558_s10 + $0xc0] ss:$8 sps:$4 sm:$0xff]  }
  0x26   : > { %v651_v31 = vor.u32 %v650_v26, %v647_v24  ;;  %v629_v34 = vsel %vm4588_vm4, %v624_v25, %v628_v16  ;;  %v638_v38 = vrot.slane %v637_v30, 4  ;;  %v656_v41 = vrot.slane %v654_v32, 5  ;;  %v3740_v63 = vld [vmem:[%s4558_s10 + $0xa0] sm:$0xf]  ;;  %v3744_v8 = vld [vmem:[%s4558_s10 + $0xb0] sm:$0xf] }
  0x27   : > { %v3696_v37 = vcombine.low %v615_v33, %v629_v34  ;;  %v923_v50 = vsel %vm358_vm0, %v3727_v43, 0  ;;  %v1015_v56 = vshrl.u32 %v3736_v49, 16  ;;  %v1018_v57 = vshll.u32 %v3736_v49, 16  ;;  %v4458_v0 = vld [vmem:[%s4558_s10 + $0xd8] ss:$8 sps:$4 sm:$0xff]  }
  0x28   : > { %v652_v39 = vrot.slane %v651_v31, 4  ;;  %v643_v44 = vsel %vm4588_vm4, %v638_v38, %v642_v36  ;;  %v1029_v58 = vshrl.u32 %v3738_v52, 16  ;;  %v1032_v59 = vshll.u32 %v3738_v52, 16  ;;  %v3746_v9 = vld [vmem:[%s4558_s10 + $0xb8] sm:$0xf] }
  0x29   : > { %v1024_v61 = vshll.u32 %v3737_v54, 16  ;;  %v1038_v62 = vshll.u32 %v3739_v55, 16  ;;  %v1017_v1 = vrot.slane %v1015_v56, 4  ;;  %v1020_v2 = vrot.slane %v1018_v57, 5  ;;  %v3741_v12 = vld [vmem:[%s4558_s10 + $0xa4] sm:$0x1] }
  0x2a   : > { %v657_v45 = vsel %vm4588_vm4, %v652_v39, %v656_v41  ;;  %v1031_v3 = vrot.slane %v1029_v58, 4  ;;  %v1034_v4 = vrot.slane %v1032_v59, 5  ;;  %v1043_v6 = vshrl.u32 %v3740_v63, 16  ;;  %v3743_v13 = vld [vmem:[%s4558_s10 + $0xac] sm:$0x1] }
  0x2b   : > { %4097 = vmatmul.mubr.msk.bf16.gmra.mrb[4].mxu0 %vm345_vm1, %v4453_v5  ;;  %v3697_v46 = vcombine.low %v643_v44, %v657_v45  ;;  %v3742_v5 = vld [vmem:[%s4558_s10 + $0xa8] sm:$0xf]  ;;  %v1046_v7 = vshll.u32 %v3740_v63, 16  ;;  %v1153_v16 = vsel %vm358_vm0, %v3752_v53, 0  ;;  %v1026_v17 = vrot.slane %v1024_v61, 5 }
  0x2c   : > { %4102 = vmatprep.mubr.msk.bf16.mxu0 %vm345_vm1, %v3694_v10  ;;  %v1021_v10 = vor.u32 %v1020_v2, %v1017_v1  ;;  %v1035_v11 = vor.u32 %v1034_v4, %v1031_v3  ;;  %v1057_v14 = vshrl.u32 %v3742_v5, 16  ;;  %v1060_v15 = vshll.u32 %v3742_v5, 16  ;;  %v4459_v27 = vld [vmem:[%s4558_s10 + $0xe8] ss:$8 sps:$4 sm:$0xff]   ;;  %v4460_v32 = vld [vmem:[%s4558_s10 + $0xf8] ss:$8 sps:$4 sm:$0xff]  }
  0x2d   : > { %v1040_v18 = vrot.slane %v1038_v62, 5  ;;  %v1071_v19 = vshrl.u32 %v3744_v8, 16  ;;  %v1074_v20 = vshll.u32 %v3744_v8, 16  ;;  %v1085_v21 = vshrl.u32 %v3746_v9, 16  ;;  %v3769_v33 = vld [vmem:[%s5142_s1 + $0xc] sm:$0x3] }
  0x2e   : > { %v1088_v22 = vshll.u32 %v3746_v9, 16  ;;  %v1045_v23 = vrot.slane %v1043_v6, 4  ;;  %v1048_v24 = vrot.slane %v1046_v7, 5  ;;  %v1052_v25 = vshll.u32 %v3741_v12, 16  ;;  %v3748_v34 = vld [vmem:[%s4558_s10 + $0xc0] sm:$0xf] }
  0x2f   : > { %v1066_v26 = vshll.u32 %v3743_v13, 16  ;;  %v1022_v28 = vrot.slane %v1021_v10, 4  ;;  %v1036_v29 = vrot.slane %v1035_v11, 4  ;;  %v1059_v30 = vrot.slane %v1057_v14, 4  ;;  %v3750_v39 = vld [vmem:[%s4558_s10 + $0xc8] sm:$0xf] }
  0x30   : > { %v1062_v31 = vrot.slane %v1060_v15, 5  ;;  %v1076_v36 = vrot.slane %v1074_v20, 5  ;;  %v1090_v38 = vrot.slane %v1088_v22, 5  ;;  %v1049_v41 = vor.u32 %v1048_v24, %v1045_v23  ;;  %v3747_v44 = vld [vmem:[%s4558_s10 + $0xbc] sm:$0x1] }
  0x31   : > { %v1027_v45 = vsel %vm4588_vm4, %v1022_v28, %v1026_v17  ;;  %v1099_v49 = vshrl.u32 %v3748_v34, 16  ;;  %v1116_v52 = vshll.u32 %v3750_v39, 16  ;;  %v1094_v57 = vshll.u32 %v3747_v44, 16  ;;  %v3749_v58 = vld [vmem:[%s4558_s10 + $0xc4] sm:$0x1] }
  0x32   : > { %v3751_v62 = vld [vmem:[%s4558_s10 + $0xcc] sm:$0x1]  ;;  %v1108_v8 = vshll.u32 %v3749_v58, 16  ;;  %v3786_v22 = vld [vmem:[%s5142_s1 + $0xe] sm:$0x3] }
  0x33   : > { %4103 = vmatmul.mubr.msk.bf16.vlgmr.msra.gmra.mrb[0].mxu0 %vm345_vm1, %v3695_v35  ;;  %v1073_v35 = vrot.slane %v1071_v19, 4  ;;  %v1101_v63 = vrot.slane %v1099_v49, 4  ;;  %v1118_v2 = vrot.slane %v1116_v52, 5  ;;  %v1096_v6 = vrot.slane %v1094_v57, 5  ;;  %v3795_v28 = vld [vmem:[%s4558_s10 + $0x8] sm:$0xf] }
  0x34   : > { %4111 = vmatpush3.bf16.msra.mxu0 %v804_v42  ;;  %4106 = vmatprep.mubr.msk.bf16.mxu0 %vm345_vm1, %v3696_v37  ;;  %v1087_v37 = vrot.slane %v1085_v21, 4  ;;  %v1054_v42 = vrot.slane %v1052_v25, 5  ;;  %v1122_v12 = vshll.u32 %v3751_v62, 16  ;;  %v1272_v21 = vsel %vm358_vm0, %v3769_v33, 0  ;;  %v3803_v52 = vld [vmem:[%s4558_s10 + $0x28] sm:$0xf] }
  0x35   : > { %4420 = vmatprep.subr.msk.bf16.mxu0 %vm358_vm0, %v3727_v43  ;;  %v3745_v43 = vld [vmem:[%s4558_s10 + $0xb4] sm:$0x1]  ;;  %v1077_v54 = vor.u32 %v1076_v36, %v1073_v35  ;;  %v4467_v58 = vld [vmem:[%s4558_s10 + $0x60] ss:$8 sps:$4 sm:$0xff]  }
  0x36   : > { %v1080_v55 = vshll.u32 %v3745_v43, 16  ;;  %v1091_v56 = vor.u32 %v1090_v38, %v1087_v37  ;;  %v1124_v20 = vrot.slane %v1122_v12, 5  ;;  %v4465_v37 = vld [vmem:[%s4558_s10 + $0x38] ss:$8 sps:$4 sm:$0xff]   ;;  %v3796_v38 = vld [vmem:[%s4558_s10 + $0xc] sm:$0x1] }
  0x37   : > { %v1078_v3 = vrot.slane %v1077_v54, 4 }
  0x38   : > { %v1082_v4 = vrot.slane %v1080_v55, 5  ;;  %v1092_v5 = vrot.slane %v1091_v56, 4 }
  0x3a   : > { %v1083_v13 = vsel %vm4588_vm4, %v1078_v3, %v1082_v4  ;;  %v1097_v14 = vsel %vm4588_vm4, %v1092_v5, %v1096_v6  ;;  %v3802_v5 = vld [vmem:[%s4558_s10 + $0x24] sm:$0x1] }
  0x3b   : > { %4107 = vmatmul.mubr.msk.bf16.gmra.mrb[4].mxu0 %vm345_vm1, %v3697_v46  ;;  %v1041_v46 = vsel %vm4588_vm4, %v1036_v29, %v1040_v18  ;;  %v3755_v17 = vcombine.low %v1083_v13, %v1097_v14  ;;  %v4464_v29 = vld [vmem:[%s4558_s10 + $0x28] ss:$8 sps:$4 sm:$0xff]  }
  0x3c   : > { %4112 = vmatprep.mubr.msk.bf16.mxu0 %vm345_vm1, %v4454_v47  ;;  %v1063_v47 = vor.u32 %v1062_v31, %v1059_v30  ;;  %v3753_v59 = vcombine.low %v1027_v45, %v1041_v46  ;;  %v3797_v30 = vld [vmem:[%s4558_s10 + $0x10] sm:$0xf]  ;;  %v1391_v31 = vsel %vm358_vm0, %v3786_v22, 0  ;;  %v3799_v45 = vld [vmem:[%s4558_s10 + $0x18] sm:$0xf] }
  0x3d   : > { %v1497_v35 = vshrl.u32 %v3797_v30, 16  ;;  %v1500_v36 = vshll.u32 %v3797_v30, 16  ;;  %v4466_v46 = vld [vmem:[%s4558_s10 + $0x50] ss:$8 sps:$4 sm:$0xff]   ;;  %v1514_v55 = vshll.u32 %v3799_v45, 16 }
  0x3e   : > { %v1064_v61 = vrot.slane %v1063_v47, 4  ;;  %v3801_v47 = vld [vmem:[%s4558_s10 + $0x20] sm:$0xf] }
  0x3f   : > { %v1499_v43 = vrot.slane %v1497_v35, 4  ;;  %v1502_v44 = vrot.slane %v1500_v36, 5  ;;  %v1525_v56 = vshrl.u32 %v3801_v47, 16  ;;  %v1528_v57 = vshll.u32 %v3801_v47, 16 }
  0x40   : > { %v1516_v6 = vrot.slane %v1514_v55, 5 }
  0x41   : > { %v1503_v54 = vor.u32 %v1502_v44, %v1499_v43 }
  0x43   : > { %4113 = vmatmul.mubr.msk.bf16.vlgmr.msra.gmra.mrb[0].mxu0 %vm345_vm1, %v4455_v48  ;;  %v1068_v48 = vrot.slane %v1066_v26, 5  ;;  %v4462_v26 = vld [vmem:[%s4558_s10 + $0x8] ss:$8 sps:$4 sm:$0xff]   ;;  %v1504_v4 = vrot.slane %v1503_v54, 4 }
  0x44   : > { %4121 = vmatpush3.bf16.msra.mxu0 %v923_v50  ;;  %4116 = vmatprep.mubr.msk.bf16.mxu0 %vm345_vm1, %v4456_v51  ;;  %v1102_v50 = vshll.u32 %v3748_v34, 16  ;;  %v1113_v51 = vshrl.u32 %v3750_v39, 16  ;;  %v1486_v34 = vshll.u32 %v3795_v28, 16 }
  0x45   : > { %4421 = vmatprep.subr.msk.bf16.mxu0 %vm358_vm0, %v3752_v53  ;;  %v4461_v53 = vld [vmem:[%s4558_s10 + $0x108] ss:$8 sps:$4 sm:$0xff]   ;;  %v1069_v9 = vsel %vm4588_vm4, %v1064_v61, %v1068_v48  ;;  %v1492_v48 = vshll.u32 %v3796_v38, 16 }
  0x46   : > { %v1115_v1 = vrot.slane %v1113_v51, 4  ;;  %v1511_v51 = vshrl.u32 %v3799_v45, 16 }
  0x48   : > { %v1119_v11 = vor.u32 %v1118_v2, %v1115_v1  ;;  %v3800_v2 = vld [vmem:[%s4558_s10 + $0x1c] sm:$0x1]  ;;  %v1513_v3 = vrot.slane %v1511_v51, 4 }
  0x4a   : > { %v1120_v19 = vrot.slane %v1119_v11, 4  ;;  %v3807_v11 = vld [vmem:[%s4558_s10 + $0x38] sm:$0xf] }
  0x4b   : > { %4117 = vmatmul.mubr.msk.bf16.gmra.mrb[4].mxu0 %vm345_vm1, %v4457_v60  ;;  %v1050_v60 = vrot.slane %v1049_v41, 4  ;;  %v1488_v41 = vrot.slane %v1486_v34, 5  ;;  %v4469_v34 = vld [vmem:[%s4558_s10 + $0x80] ss:$8 sps:$4 sm:$0xff]  }
  0x4c   : > { %4122 = vmatprep.mubr.msk.bf16.mxu0 %vm345_vm1, %v4458_v0  ;;  %v1104_v0 = vrot.slane %v1102_v50, 5  ;;  %v1125_v24 = vsel %vm4588_vm4, %v1120_v19, %v1124_v20  ;;  %v3804_v19 = vld [vmem:[%s4558_s10 + $0x2c] sm:$0x1]  ;;  %v3806_v20 = vld [vmem:[%s4558_s10 + $0x34] sm:$0x1] }
  0x4d   : > { %v1055_v7 = vsel %vm4588_vm4, %v1050_v60, %v1054_v42  ;;  %v3798_v42 = vld [vmem:[%s4558_s10 + $0x14] sm:$0x1]  ;;  %v1542_v60 = vshll.u32 %v3803_v52, 16  ;;  %v1548_v30 = vshll.u32 %v3804_v19, 16 }
  0x4e   : > { %v1105_v10 = vor.u32 %v1104_v0, %v1101_v63  ;;  %v3754_v15 = vcombine.low %v1055_v7, %v1069_v9  ;;  %v1506_v50 = vshll.u32 %v3798_v42, 16  ;;  %v1494_v0 = vrot.slane %v1492_v48, 5 }
  0x4f   : > { %v1527_v7 = vrot.slane %v1525_v56, 4  ;;  %v1544_v13 = vrot.slane %v1542_v60, 5 }
  0x50   : > { %v1106_v18 = vrot.slane %v1105_v10, 4  ;;  %v1508_v1 = vrot.slane %v1506_v50, 5  ;;  %v4468_v10 = vld [vmem:[%s4558_s10 + $0x70] ss:$8 sps:$4 sm:$0xff]  }
  0x53   : > { %4123 = vmatmul.mubr.msk.bf16.vlgmr.msra.gmra.mrb[0].mxu0 %vm345_vm1, %v4459_v27  ;;  %v4463_v27 = vld [vmem:[%s4558_s10 + $0x18] ss:$8 sps:$4 sm:$0xff]  }
  0x54   : > { %4131 = vmatpush3.bf16.msra.mxu0 %v1153_v16  ;;  %4126 = vmatprep.mubr.msk.bf16.mxu0 %vm345_vm1, %v4460_v32  ;;  %v1110_v16 = vrot.slane %v1108_v8, 5  ;;  %v3811_v32 = vld [vmem:[%s5142_s1 + $0x10] sm:$0x3]  ;;  %v1530_v8 = vrot.slane %v1528_v57, 5 }
  0x55   : > { %4422 = vmatprep.subr.msk.bf16.mxu0 %vm358_vm0, %v3769_v33  ;;  %v1483_v33 = vshrl.u32 %v3795_v28, 16  ;;  %v1621_v9 = vsel %vm358_vm0, %v3811_v32, 0 }
  0x56   : > { %v1111_v23 = vsel %vm4588_vm4, %v1106_v18, %v1110_v16  ;;  %v3809_v16 = vld [vmem:[%s4558_s10 + $0x40] sm:$0xf]  ;;  %v1534_v18 = vshll.u32 %v3802_v5, 16 }
  0x57   : > { %v3756_v25 = vcombine.low %v1111_v23, %v1125_v24  ;;  %v1485_v39 = vrot.slane %v1483_v33, 4  ;;  %v1517_v23 = vor.u32 %v1516_v6, %v1513_v3  ;;  %v1531_v24 = vor.u32 %v1530_v8, %v1527_v7  ;;  %v4789_v6 = vld [vmem:[%s5144_s3] sm:$0xf] }
  0x58   : > { %v1584_v28 = vshll.u32 %v3809_v16, 16  ;;  %v1536_v38 = vrot.slane %v1534_v18, 5  ;;  %v4494_v3 = vmov 0   ;;  %v3820_v7 = vld [vmem:[%s5143_s2] ss:$0 sm:$0xff] }
  0x59   : > { %v1489_v49 = vor.u32 %v1488_v41, %v1485_v39  ;;  %v1518_v36 = vrot.slane %v1517_v23, 4  ;;  %v3808_v39 = vld [vmem:[%s4558_s10 + $0x3c] sm:$0x1]  ;;  %282 = vst.msk [vmem:[#allocation2 + $0x4] sm:$0xf] %vm280_vm5, %v4494_v3 }
  0x5a   : > { %v1586_v44 = vrot.slane %v1584_v28, 5  ;;  %v1576_v51 = vshll.u32 %v3808_v39, 16  ;;  %281 = vst.msk [vmem:[#allocation2] sm:$0xf] %vm280_vm5, %v4494_v3  ;;  %283 = vst.msk [vmem:[#allocation2 + $0x8] sm:$0xf] %vm280_vm5, %v4494_v3 }
  0x5b   : > { %4127 = vmatmul.mubr.msk.bf16.gmra.mrb[4].mxu0 %vm345_vm1, %v4461_v53  ;;  %v3805_v53 = vld [vmem:[%s4558_s10 + $0x30] sm:$0xf]  ;;  %v1490_v63 = vrot.slane %v1489_v49, 4  ;;  %v3810_v49 = vld [vmem:[%s4558_s10 + $0x44] sm:$0x1] }
  0x5c   : > { %4132 = vmatprep.mubr.msk.bf16.mxu0 %vm345_vm1, %v3753_v59  ;;  %v1539_v59 = vshrl.u32 %v3803_v52, 16  ;;  %v1553_v61 = vshrl.u32 %v3805_v53, 16  ;;  %v1556_v62 = vshll.u32 %v3805_v53, 16  ;;  %v1590_v55 = vshll.u32 %v3810_v49, 16  ;;  %285 = vst.msk [vmem:[#allocation2 + $0x6c] sm:$0xf] %vm280_vm5, %v4494_v3 }
  0x5d   : > { %286 = vst.msk [vmem:[#allocation2 + $0x70] sm:$0xf] %vm280_vm5, %v4494_v3  ;;  %287 = vst.msk [vmem:[#allocation2 + $0x74] sm:$0xf] %vm280_vm5, %v4494_v3 }
  0x5e   : > { %v1541_v12 = vrot.slane %v1539_v59, 4  ;;  %v1555_v14 = vrot.slane %v1553_v61, 4  ;;  %v1578_v59 = vrot.slane %v1576_v51, 5  ;;  %289 = vst.msk [vmem:[#allocation2 + $0xc] sm:$0xf] %vm280_vm5, %v4494_v3 }
  0x5f   : > { %290 = vst.msk [vmem:[#allocation2 + $0x18] sm:$0xf] %vm280_vm5, %v4494_v3  ;;  %291 = vst.msk [vmem:[#allocation2 + $0x24] sm:$0xf] %vm280_vm5, %v4494_v3 }
  0x60   : > { %292 = vst.msk [vmem:[#allocation2 + $0x30] sm:$0xf] %vm280_vm5, %v4494_v3  ;;  %293 = vst.msk [vmem:[#allocation2 + $0x3c] sm:$0xf] %vm280_vm5, %v4494_v3 }
  0x61   : > { %294 = vst.msk [vmem:[#allocation2 + $0x48] sm:$0xf] %vm280_vm5, %v4494_v3  ;;  %295 = vst.msk [vmem:[#allocation2 + $0x54] sm:$0xf] %vm280_vm5, %v4494_v3 }
  0x62   : > { %296 = vst.msk [vmem:[#allocation2 + $0x60] sm:$0xf] %vm280_vm5, %v4494_v3  ;;  %297 = vst.msk [vmem:[#allocation2 + $0x14] sm:$0xf] %vm280_vm5, %v4494_v3 }
  0x63   : > { %4133 = vmatmul.mubr.msk.bf16.vlgmr.msra.gmra.mrb[0].mxu0 %vm345_vm1, %v3754_v15  ;;  %v1558_v15 = vrot.slane %v1556_v62, 5  ;;  %298 = vst.msk [vmem:[#allocation2 + $0x20] sm:$0xf] %vm280_vm5, %v4494_v3  ;;  %299 = vst.msk [vmem:[#allocation2 + $0x2c] sm:$0xf] %vm280_vm5, %v4494_v3 }
  0x64   : > { %4141 = vmatpush3.bf16.msra.mxu0 %v1272_v21  ;;  %4136 = vmatprep.mubr.msk.bf16.mxu0 %vm345_vm1, %v3755_v17  ;;  %v1520_v17 = vshll.u32 %v3800_v2, 16  ;;  %v1495_v21 = vsel %vm4588_vm4, %v1490_v63, %v1494_v0  ;;  %v1592_v63 = vrot.slane %v1590_v55, 5  ;;  %300 = vst.msk [vmem:[#allocation2 + $0x38] sm:$0xf] %vm280_vm5, %v4494_v3  ;;  %301 = vst.msk [vmem:[#allocation2 + $0x44] sm:$0xf] %vm280_vm5, %v4494_v3 }
  0x65   : > { %4423 = vmatprep.subr.msk.bf16.mxu0 %vm358_vm0, %v3786_v22  ;;  %v1509_v22 = vsel %vm4588_vm4, %v1504_v4, %v1508_v1  ;;  %302 = vst.msk [vmem:[#allocation2 + $0x50] sm:$0xf] %vm280_vm5, %v4494_v3  ;;  %303 = vst.msk [vmem:[#allocation2 + $0x5c] sm:$0xf] %vm280_vm5, %v4494_v3  ;;  %v3829_v4 = vld [vmem:[%s5144_s3 + $0x4] sm:$0xf] }
  0x66   : > { %v1522_v33 = vrot.slane %v1520_v17, 5  ;;  %v3812_v35 = vcombine.low %v1495_v21, %v1509_v22  ;;  %304 = vst.msk [vmem:[#allocation2 + $0x68] sm:$0xf] %vm280_vm5, %v4494_v3  ;;  %v1896_v5 = vsel %vm1894_vm6, %v3829_v4, 0  ;;  %4426 = vmatprep.subr.msk.bf16.mxu1 %vm1894_vm6, %v3829_v4  ;;  %v1737_v28 = vld [vmem:[#allocation2 + $0xc] sm:$0x8] }
  0x67   : > { %4271 = vmatpush3.bf16.msra.mxu1 %v1896_v5  ;;  %v1743_v49 = vld [vmem:[#allocation2 + $0x30] sm:$0x8] }
  0x68   : > { %v1523_v50 = vsel %vm4588_vm4, %v1518_v36, %v1522_v33  ;;  %4427 = vmatprep.subr.msk.bf16.mxu1 %vm1894_vm6, %v4789_v6 }
  0x6b   : > { %4137 = vmatmul.mubr.msk.bf16.gmra.mrb[4].mxu0 %vm345_vm1, %v3756_v25  ;;  %v1567_v25 = vshrl.u32 %v3807_v11, 16 }
  0x6c   : > { %4142 = vmatprep.mubr.msk.bf16.mxu0 %vm345_vm1, %v4462_v26  ;;  %v1570_v26 = vshll.u32 %v3807_v11, 16 }
  0x6d   : > { %v1569_v41 = vrot.slane %v1567_v25, 4  ;;  %v1735_v25 = vld [vmem:[#allocation2] sm:$0x8] }
  0x6e   : > { %v1572_v42 = vrot.slane %v1570_v26, 5 }
  0x70   : > { %v1573_v53 = vor.u32 %v1572_v42, %v1569_v41  ;;  %v1768_v41 = vshrl.u32 %v1737_v28, 16 }
  0x72   : > { %v1574_v61 = vrot.slane %v1573_v53, 4  ;;  %v2056_v53 = vld [vmem:[#allocation2 + $0x8] sm:$0x1] }
  0x73   : > { %4143 = vmatmul.mubr.msk.bf16.vlgmr.msra.gmra.mrb[0].mxu0 %vm345_vm1, %v4463_v27  ;;  %v1581_v27 = vshrl.u32 %v3809_v16, 16  ;;  %v4796_v16 = vld [vmem:[#allocation2 + $0x4] sm:$0xf] }
  0x74   : > { %4151 = vmatpush3.bf16.msra.mxu0 %v1391_v31  ;;  %4146 = vmatprep.mubr.msk.bf16.mxu0 %vm345_vm1, %v4464_v29  ;;  %v1545_v29 = vor.u32 %v1544_v13, %v1541_v12  ;;  %v1559_v31 = vor.u32 %v1558_v15, %v1555_v14  ;;  %v1579_v0 = vsel %vm4588_vm4, %v1574_v61, %v1578_v59  ;;  %v1760_v23 = vshrl.u32 %v4796_v16, 16  ;;  %v1745_v59 = vld [vmem:[#allocation2 + $0x3c] sm:$0x8] }
  0x75   : > { %4424 = vmatprep.subr.msk.bf16.mxu0 %vm358_vm0, %v3811_v32  ;;  %v1562_v32 = vshll.u32 %v3806_v20, 16  ;;  %v1583_v43 = vrot.slane %v1581_v27, 4  ;;  %v1763_v39 = vshll.u32 %v4796_v16, 16 }
  0x76   : > { %v1546_v45 = vrot.slane %v1545_v29, 4  ;;  %v1560_v47 = vrot.slane %v1559_v31, 4  ;;  %v1762_v33 = vrot.slane %v1760_v23, 7 }
  0x77   : > { %v1564_v48 = vrot.slane %v1562_v32, 5  ;;  %v1587_v54 = vor.u32 %v1586_v44, %v1583_v43  ;;  %v1739_v44 = vld [vmem:[#allocation2 + $0x18] sm:$0x8] }
  0x79   : > { %v1565_v57 = vsel %vm4588_vm4, %v1560_v47, %v1564_v48  ;;  %v1588_v62 = vrot.slane %v1587_v54, 4 }
  0x7b   : > { %4147 = vmatmul.mubr.msk.bf16.gmra.mrb[4].mxu0 %vm345_vm1, %v4465_v37  ;;  %v1532_v37 = vrot.slane %v1531_v24, 4  ;;  %v1593_v1 = vsel %vm4588_vm4, %v1588_v62, %v1592_v63 }
  0x7c   : > { %4152 = vmatprep.mubr.msk.bf16.mxu0 %vm345_vm1, %v4466_v46  ;;  %v1550_v46 = vrot.slane %v1548_v30, 5  ;;  %v3815_v2 = vcombine.low %v1579_v0, %v1593_v1  ;;  %v1807_v0 = vshrl.u32 %v1743_v49, 16 }
  0x7d   : > { %v1537_v52 = vsel %vm4588_vm4, %v1532_v37, %v1536_v38 }
  0x7e   : > { %v1551_v56 = vsel %vm4588_vm4, %v1546_v45, %v1550_v46  ;;  %v2055_v45 = vld [vmem:[#allocation2 + $0x4] sm:$0xf] }
  0x7f   : > { %v3814_v60 = vcombine.low %v1551_v56, %v1565_v57  ;;  %v4807_v56 = vor.u32 %v1763_v39, %v1762_v33  ;;  %v4809_v57 = vrot.slane %v1768_v41, 11 }
  0x83   : > { %4153 = vmatmul.mubr.msk.bf16.vlgmr.msra.gmra.mrb[0].mxu0 %vm345_vm1, %v4467_v58  ;;  %v3813_v58 = vcombine.low %v1523_v50, %v1537_v52 }
  0x84   : > { %4161 = vmatpush3.bf16.msra.mxu0 %v1621_v9  ;;  %4156 = vmatprep.mubr.msk.bf16.mxu0 %vm345_vm1, %v4468_v10 }
  0x85   : > { %4425 = vmatprep.subr.msk.bf16.mxu0 %vm1894_vm6, %v3829_v4  ;;  %v4822_v4 = vld [vmem:[#allocation2 + $0x14] sm:$0x1] }
  0x8b   : > { %4157 = vmatmul.mubr.msk.bf16.gmra.mrb[4].mxu0 %vm345_vm1, %v4469_v34  ;;  %v1755_v34 = vshrl.u32 %v1735_v25, 16 }
  0x8c   : > { %4162 = vmatprep.mubr.msk.bf16.mxu0 %vm345_vm1, %v3812_v35  ;;  %v1741_v35 = vld [vmem:[#allocation2 + $0x24] sm:$0x8] }
  0x8d   : > { %v1794_v48 = vshrl.u32 %v1741_v35, 16  ;;  %v4804_v52 = vrot.slane %v1755_v34, 11 }
  0x8f   : > { %v4820_v3 = vrot.slane %v1794_v48, 11 }
  0x93   : > { %4163 = vmatmul.mubr.msk.bf16.vlgmr.msra.gmra.mrb[0].mxu0 %vm345_vm1, %v3813_v58  ;;  %v1781_v58 = vshrl.u32 %v1739_v44, 16 }
  0x94   : > { %4166 = vmatprep.mubr.msk.bf16.mxu0 %vm345_vm1, %v3814_v60  ;;  %4171 = vmatpush3.bf16.msra.mxu0 %v1896_v5  ;;  %v2072_v5 = vshrl.u32 %v2055_v45, 16 }
  0x9b   : > { %4167 = vmatmul.mubr.msk.bf16.gmra.mrb[4].mxu0 %vm345_vm1, %v3815_v2 }
 0x166   : > { %v4164_v8 = vpop.f32.mrb[0].mxu0 }
 0x167   : > { %v1705_v9 = vadd.f32 %v4164_v8, %v3820_v7  ;;  %v1657_v10 = vpop.f32.mrb[1].mxu0  ;;  %v2081_v8 = vshll.u32 %v2056_v53, 16 }
 0x168   : > { %v1703_v11 = vadd.f32 %v3820_v7, %v1657_v10  ;;  %v4165_v12 = vpop.f32.mrb[2].mxu0 }
 0x169   : > { %v1713_v13 = vmax.f32 %v1705_v9, 0.0  ;;  %v1706_v14 = vadd.f32 %v4165_v12, %v3820_v7  ;;  %v1660_v15 = vpop.f32.mrb[3].mxu0  ;;  %v1820_v12 = vshrl.u32 %v1745_v59, 16 }
 0x16a   : > { %v1711_v17 = vmax.f32 %v1703_v11, 0.0  ;;  %v1704_v18 = vadd.f32 %v3820_v7, %v1660_v15 }
 0x16b   : > { %v1721_v19 = vpack.c.bf16 %v1713_v13, %v1713_v13  ;;  %v1714_v20 = vmax.f32 %v1706_v14, 0.0  ;;  %v4826_v13 = vld [vmem:[#allocation2 + $0x54] sm:$0x8]  ;;  %v4840_v28 = vrot.slane %v1820_v12, 11 }
 0x16c   : > { %v1719_v21 = vpack.c.bf16 %v1711_v17, %v1711_v17  ;;  %v1712_v22 = vmax.f32 %v1704_v18, 0.0  ;;  %v1747_v17 = vld [vmem:[#allocation2 + $0x48] sm:$0x8]  ;;  %v1766_v18 = vsel %vm4816_vm10, %v4804_v52, %v4807_v56  ;;  %v1846_v23 = vshrl.u32 %v4826_v13, 16 }
 0x16d   : > { %1729 = vst.msk [vmem:[#allocation2 + $0x28] sm:$0xf] %vm280_vm5, %v1721_v19  ;;  %v1722_v24 = vpack.c.bf16 %v1714_v20, %v1714_v20  ;;  %v4833_v20 = vrot.slane %v1781_v58, 11  ;;  %v3846_v52 = vld [vmem:[%s5144_s3 + $0x8] sm:$0xf] }
 0x16e   : > { %1727 = vst.msk [vmem:[#allocation2 + $0x10] sm:$0xf] %vm280_vm5, %v1719_v21  ;;  %v1720_v26 = vpack.c.bf16 %v1712_v22, %v1712_v22  ;;  %v4168_v27 = vpop.f32.mrb[4].mxu0  ;;  %v4835_v21 = vrot.slane %v1807_v0, 11 }
 0x16f   : > { %1730 = vst.msk [vmem:[#allocation2 + $0x34] sm:$0xf] %vm280_vm5, %v1722_v24  ;;  %v1709_v29 = vadd.f32 %v4168_v27, %v3820_v7  ;;  %v1673_v30 = vpop.f32.mrb[5].mxu0  ;;  %v2074_v24 = vrot.slane %v2072_v5, 4 }
 0x170   : > { %1728 = vst.msk [vmem:[#allocation2 + $0x1c] sm:$0xf] %vm280_vm5, %v1720_v26  ;;  %v1707_v31 = vadd.f32 %v3820_v7, %v1673_v30  ;;  %v4169_v32 = vpop.f32.mrb[6].mxu0  ;;  %v4838_v26 = vrot.slane %v2081_v8, 5  ;;  %v2095_v30 = vshll.u32 %v4822_v4, 16  ;;  %v2210_v4 = vsel %vm1894_vm6, %v3846_v52, 0 }
 0x171   : > { %v1717_v36 = vmax.f32 %v1709_v29, 0.0  ;;  %v1710_v37 = vadd.f32 %v4169_v32, %v3820_v7  ;;  %v1676_v38 = vpop.f32.mrb[7].mxu0  ;;  %v1833_v29 = vshrl.u32 %v1747_v17, 16  ;;  %v1988_v32 = vsel %vm1894_vm6, %v4789_v6, 0 }
 0x172   : > { %v1715_v42 = vmax.f32 %v1707_v31, 0.0  ;;  %v1708_v43 = vadd.f32 %v3820_v7, %v1676_v38  ;;  %v2075_v7 = vshll.u32 %v2055_v45, 16 }
 0x173   : > { %v1725_v46 = vpack.c.bf16 %v1717_v36, %v1717_v36  ;;  %v1718_v47 = vmax.f32 %v1710_v37, 0.0  ;;  %v3827_v5 = vrot.slane %v1833_v29, 11 }
 0x174   : > { %v1723_v50 = vpack.c.bf16 %v1715_v42, %v1715_v42  ;;  %v1716_v51 = vmax.f32 %v1708_v43, 0.0  ;;  %v1742_v63 = vld [vmem:[#allocation2 + $0x28] sm:$0xf]  ;;  %v2077_v25 = vrot.slane %v2075_v7, 5 }
 0x175   : > { %1733 = vst.msk [vmem:[#allocation2 + $0x58] sm:$0xf] %vm280_vm5, %v1725_v46  ;;  %v1726_v54 = vpack.c.bf16 %v1718_v47, %v1718_v47  ;;  %v1738_v55 = vld [vmem:[#allocation2 + $0x10] sm:$0xf]  ;;  %v1802_v44 = vshll.u32 %v1742_v63, 16 }
 0x176   : > { %1731 = vst.msk [vmem:[#allocation2 + $0x40] sm:$0xf] %vm280_vm5, %v1723_v50  ;;  %v1724_v60 = vpack.c.bf16 %v1716_v51, %v1716_v51  ;;  %v1773_v61 = vshrl.u32 %v1738_v55, 16  ;;  %v3830_v62 = vcombine.low %v4796_v16, %v1738_v55  ;;  %v1776_v10 = vshll.u32 %v1738_v55, 16  ;;  %v1744_v14 = vld [vmem:[#allocation2 + $0x34] sm:$0xf] }
 0x177   : > { %1734 = vst.msk [vmem:[#allocation2 + $0x64] sm:$0xf] %vm280_vm5, %v1726_v54  ;;  %v1740_v1 = vld [vmem:[#allocation2 + $0x1c] sm:$0xf]  ;;  %v1799_v16 = vshrl.u32 %v1742_v63, 16  ;;  %v1812_v27 = vshrl.u32 %v1744_v14, 16  ;;  %v2078_v45 = vor.u32 %v2077_v25, %v2074_v24 }
 0x178   : > { %1732 = vst.msk [vmem:[#allocation2 + $0x4c] sm:$0xf] %vm280_vm5, %v1724_v60  ;;  %v1775_v9 = vrot.slane %v1773_v61, 7  ;;  %4172 = vmatprep.mubr.msk.bf16.mxu0 %vm1881_vm7, %v3830_v62  ;;  %v3831_v11 = vcombine.low %v1740_v1, %v1742_v63  ;;  %v1786_v15 = vshrl.u32 %v1740_v1, 16  ;;  %v2057_v22 = vld [vmem:[#allocation2 + $0x10] sm:$0xf] }
 0x179   : > { %v1801_v34 = vrot.slane %v1799_v16, 7  ;;  %v2086_v35 = vshrl.u32 %v2057_v22, 16  ;;  %v2089_v39 = vshll.u32 %v2057_v22, 16  ;;  %v1789_v43 = vshll.u32 %v1740_v1, 16  ;;  %v2059_v49 = vld [vmem:[#allocation2 + $0x1c] sm:$0xf] }
 0x17a   : > { %4173 = vmatmul.mubr.msk.bf16.vlgmr.msra.gmra.mrb[8].mxu0 %vm1881_vm7, %v3831_v11  ;;  %v1778_v19 = vor.u32 %v1776_v10, %v1775_v9  ;;  %v1788_v33 = vrot.slane %v1786_v15, 7  ;;  %v1814_v46 = vrot.slane %v1812_v27, 7  ;;  %v1815_v55 = vshll.u32 %v1744_v14, 16  ;;  %v2061_v59 = vld [vmem:[#allocation2 + $0x28] sm:$0xf] }
 0x17b   : > { %v1804_v54 = vor.u32 %v1802_v44, %v1801_v34  ;;  %v2091_v58 = vrot.slane %v2089_v39, 5  ;;  %v4858_v61 = vrot.slane %v2078_v45, 4  ;;  %v4860_v62 = vrot.slane %v2095_v30, 5  ;;  %v2063_v12 = vld [vmem:[#allocation2 + $0x34] sm:$0xf] }
 0x17c   : > { %v1779_v38 = vsel %vm4816_vm10, %v4809_v57, %v1778_v19  ;;  %v4848_v42 = vld [vmem:[#allocation2 + $0x58] sm:$0xf]  ;;  %v1791_v53 = vor.u32 %v1789_v43, %v1788_v33  ;;  %v2088_v57 = vrot.slane %v2086_v35, 4  ;;  %v2100_v63 = vshrl.u32 %v2059_v49, 16  ;;  %v2060_v22 = vld [vmem:[#allocation2 + $0x20] sm:$0x1] }
 0x17d   : > { %v1746_v31 = vld [vmem:[#allocation2 + $0x40] sm:$0xf]  ;;  %v3838_v51 = vcombine.low %v1766_v18, %v1779_v38  ;;  %v1851_v60 = vshrl.u32 %v4848_v42, 16  ;;  %v1817_v1 = vor.u32 %v1815_v55, %v1814_v46  ;;  %v2103_v7 = vshll.u32 %v2059_v49, 16  ;;  %v2062_v33 = vld [vmem:[#allocation2 + $0x2c] sm:$0x1] }
 0x17e   : > { %v1825_v36 = vshrl.u32 %v1746_v31, 16  ;;  %v3832_v37 = vcombine.low %v1744_v14, %v1746_v31  ;;  %v1828_v48 = vshll.u32 %v1746_v31, 16  ;;  %v2065_v0 = vld [vmem:[#allocation2 + $0x40] sm:$0xf]  ;;  %v1792_v9 = vsel %vm4816_vm10, %v4833_v20, %v1791_v53  ;;  %v2066_v44 = vld [vmem:[#allocation2 + $0x44] sm:$0x1] }
 0x17f   : > { %v1748_v41 = vld [vmem:[#allocation2 + $0x4c] sm:$0xf]  ;;  %v1805_v10 = vsel %vm4816_vm10, %v4820_v3, %v1804_v54  ;;  %v2114_v11 = vshrl.u32 %v2061_v59, 16  ;;  %v2092_v15 = vor.u32 %v2091_v58, %v2088_v57  ;;  %v2142_v16 = vshrl.u32 %v2065_v0, 16  ;;  %v2064_v49 = vld [vmem:[#allocation2 + $0x38] sm:$0x1] }
 0x180   : > { %v1827_v47 = vrot.slane %v1825_v36, 7  ;;  %4176 = vmatprep.mubr.msk.bf16.mxu1 %vm1881_vm7, %v3832_v37  ;;  %v3833_v6 = vcombine.low %v1748_v41, %v4848_v42  ;;  %v1838_v50 = vshrl.u32 %v1748_v41, 16  ;;  %v2145_v17 = vshll.u32 %v2065_v0, 16 }
 0x181   : > { %v1841_v18 = vshll.u32 %v1748_v41, 16  ;;  %v1853_v19 = vrot.slane %v1851_v60, 7  ;;  %v2102_v24 = vrot.slane %v2100_v63, 4  ;;  %v2117_v25 = vshll.u32 %v2061_v59, 16  ;;  %v2287_v59 = vld [vmem:[#allocation2 + $0x18] sm:$0x8] }
 0x182   : > { %v1830_v56 = vor.u32 %v1828_v48, %v1827_v47  ;;  %4177 = vmatmul.mubr.msk.bf16.vlgmr.msra.gmra.mrb[0].mxu1 %vm1881_vm7, %v3833_v6  ;;  %v1840_v8 = vrot.slane %v1838_v50, 7  ;;  %v3839_v27 = vcombine.low %v1792_v9, %v1805_v10  ;;  %v1818_v20 = vsel %vm4816_vm10, %v4835_v21, %v1817_v1  ;;  %v2067_v21 = vld [vmem:[#allocation2 + $0x4c] sm:$0xf]  ;;  %v2069_v6 = vld [vmem:[#allocation2 + $0x58] sm:$0xf] }
 0x183   : > { %4181 = vmatpush3.bf16.msra.mxu1 %v1988_v32  ;;  %4182 = vmatprep.mubr.msk.bf16.mxu1 %vm1881_vm7, %v3838_v51  ;;  %v2128_v3 = vshrl.u32 %v2063_v12, 16  ;;  %v2131_v29 = vshll.u32 %v2063_v12, 16  ;;  %v1854_v30 = vshll.u32 %v4848_v42, 16  ;;  %v2105_v34 = vrot.slane %v2103_v7, 5  ;;  %v4899_v60 = vld [vmem:[#allocation2 + $0x1c] sm:$0xf] }
 0x184   : > { %4428 = vmatprep.subr.msk.bf16.mxu1 %vm1894_vm6, %v3846_v52  ;;  %v1831_v14 = vsel %vm4816_vm10, %v4840_v28, %v1830_v56  ;;  %v1843_v32 = vor.u32 %v1841_v18, %v1840_v8  ;;  %v4880_v28 = vld [vmem:[%s5144_s3 + $0xc] sm:$0xf]  ;;  %v2093_v35 = vrot.slane %v2092_v15, 4  ;;  %v2109_v36 = vshll.u32 %v2060_v22, 16  ;;  %v4901_v9 = vld [vmem:[#allocation2 + $0x10] sm:$0xf] }
 0x185   : > { %v3840_v31 = vcombine.low %v1818_v20, %v1831_v14  ;;  %v2144_v37 = vrot.slane %v2142_v16, 4  ;;  %v2147_v38 = vrot.slane %v2145_v17, 5  ;;  %v3828_v39 = vrot.slane %v1846_v23, 11  ;;  %v2285_v12 = vld [vmem:[#allocation2 + $0xc] sm:$0x8] }
 0x186   : > { %v1856_v41 = vor.u32 %v1854_v30, %v1853_v19  ;;  %v2116_v42 = vrot.slane %v2114_v11, 4  ;;  %v2119_v43 = vrot.slane %v2117_v25, 5  ;;  %v2084_v45 = vsel %vm4588_vm4, %v4858_v61, %v4838_v26  ;;  %v2070_v17 = vld [vmem:[#allocation2 + $0x5c] sm:$0x1] }
 0x187   : > { %v2123_v46 = vshll.u32 %v2062_v33, 16  ;;  %v2130_v47 = vrot.slane %v2128_v3, 4  ;;  %v2133_v48 = vrot.slane %v2131_v29, 5  ;;  %v1844_v13 = vsel %vm4816_vm10, %v3827_v5, %v1843_v32 }
 0x188   : > { %v2106_v23 = vor.u32 %v2105_v34, %v2102_v24  ;;  %v2156_v50 = vshrl.u32 %v2067_v21, 16  ;;  %v2159_v51 = vshll.u32 %v2067_v21, 16  ;;  %v2098_v52 = vsel %vm4588_vm4, %v2093_v35, %v4860_v62  ;;  %v4911_v34 = vld [vmem:[#allocation2 + $0x34] sm:$0xf]  ;;  %v2291_v21 = vld [vmem:[#allocation2 + $0x30] sm:$0x8] }
 0x189   : > { %v2111_v53 = vrot.slane %v2109_v36, 5  ;;  %v2148_v26 = vor.u32 %v2147_v38, %v2144_v37  ;;  %v2151_v54 = vshll.u32 %v2066_v44, 16  ;;  %v1857_v55 = vsel %vm4816_vm10, %v3828_v39, %v1856_v41  ;;  %v4917_v39 = vld [vmem:[#allocation2 + $0x4c] sm:$0xf] }
 0x18a   : > { %4183 = vmatmul.mubr.msk.bf16.vlgmr.msra.gmra.mrb[4].mxu1 %vm1881_vm7, %v3839_v27  ;;  %v2120_v56 = vor.u32 %v2119_v43, %v2116_v42  ;;  %v2170_v57 = vshrl.u32 %v2069_v6, 16  ;;  %v2173_v58 = vshll.u32 %v2069_v6, 16  ;;  %v3841_v61 = vcombine.low %v1844_v13, %v1857_v55  ;;  %v4928_v6 = vld [vmem:[#allocation2 + $0x40] sm:$0xf] }
 0x18b   : > { %4191 = vmatpush3.bf16.msra.mxu1 %v2210_v4  ;;  %4186 = vmatprep.mubr.msk.bf16.mxu1 %vm1881_vm7, %v3840_v31  ;;  %v2125_v63 = vrot.slane %v2123_v46, 5  ;;  %v2134_v0 = vor.u32 %v2133_v48, %v2130_v47  ;;  %v2137_v1 = vshll.u32 %v2064_v49, 16  ;;  %v2068_v4 = vld [vmem:[#allocation2 + $0x50] sm:$0x1]  ;;  %v3847_v5 = vcombine.low %v2084_v45, %v2098_v52  ;;  %v4922_v45 = vld [vmem:[#allocation2 + $0x28] sm:$0xf] }
 0x18c   : > { %4429 = vmatprep.subr.msk.bf16.mxu1 %vm1894_vm6, %v4880_v28  ;;  %v2107_v7 = vrot.slane %v2106_v23, 4  ;;  %v2158_v62 = vrot.slane %v2156_v50, 4  ;;  %v2161_v8 = vrot.slane %v2159_v51, 5  ;;  %v2149_v10 = vrot.slane %v2148_v26, 4  ;;  %v2289_v49 = vld [vmem:[#allocation2 + $0x24] sm:$0x8] }
 0x18d   : > { %v2153_v11 = vrot.slane %v2151_v54, 5  ;;  %v2315_v14 = vshrl.u32 %v2287_v59, 16  ;;  %v2320_v15 = vshrl.u32 %v4899_v60, 16  ;;  %v2121_v16 = vrot.slane %v2120_v56, 4  ;;  %v2295_v54 = vld [vmem:[#allocation2 + $0x48] sm:$0x8] }
 0x18e   : > { %v2165_v18 = vshll.u32 %v2068_v4, 16  ;;  %v2172_v19 = vrot.slane %v2170_v57, 4  ;;  %v2175_v22 = vrot.slane %v2173_v58, 5  ;;  %v2135_v24 = vrot.slane %v2134_v0, 4  ;;  %v2293_v57 = vld [vmem:[#allocation2 + $0x3c] sm:$0x8] }
 0x18f   : > { %v2139_v25 = vrot.slane %v2137_v1, 5  ;;  %v2307_v27 = vshrl.u32 %v4901_v9, 16  ;;  %v2112_v20 = vsel %vm4588_vm4, %v2107_v7, %v2111_v53  ;;  %v2162_v3 = vor.u32 %v2161_v8, %v2158_v62  ;;  %v4941_v7 = vld [vmem:[#allocation2 + $0x64] sm:$0xf] }
 0x190   : > { %v2302_v29 = vshrl.u32 %v2285_v12, 16  ;;  %v2154_v30 = vsel %vm4588_vm4, %v2149_v10, %v2153_v11  ;;  %v2179_v31 = vshll.u32 %v2070_v17, 16  ;;  %v3856_v32 = vrot.slane %v2315_v14, 11  ;;  %v4949_v17 = vld [vmem:[#allocation2 + $0x58] sm:$0xf] }
 0x191   : > { %v2322_v33 = vrot.slane %v2320_v15, 7  ;;  %v2126_v35 = vsel %vm4588_vm4, %v2121_v16, %v2125_v63  ;;  %v2432_v36 = vsel %vm1894_vm6, %v4880_v28, 0  ;;  %v2167_v37 = vrot.slane %v2165_v18, 5  ;;  %v3872_v28 = vld [vmem:[%s5144_s3 + $0x10] sm:$0xf] }
 0x192   : > { %4187 = vmatmul.mubr.msk.bf16.gmra.mrb[0].mxu1 %vm1881_vm7, %v3841_v61  ;;  %v2176_v38 = vor.u32 %v2175_v22, %v2172_v19  ;;  %v3848_v41 = vcombine.low %v2112_v20, %v2126_v35  ;;  %v2140_v42 = vsel %vm4588_vm4, %v2135_v24, %v2139_v25  ;;  %v2309_v43 = vrot.slane %v2307_v27, 7  ;;  %v2297_v35 = vld [vmem:[#allocation2 + $0x54] sm:$0x8] }
 0x193   : > { %4192 = vmatprep.mubr.msk.bf16.mxu1 %vm1881_vm7, %v3847_v5  ;;  %v2323_v44 = vshll.u32 %v4899_v60, 16  ;;  %v3849_v46 = vcombine.low %v2140_v42, %v2154_v30  ;;  %v2163_v47 = vrot.slane %v2162_v3, 4  ;;  %v2346_v48 = vshrl.u32 %v4911_v34, 16  ;;  %v2299_v3 = vld [vmem:[#allocation2 + $0x60] sm:$0x8] }
 0x194   : > { %v2310_v13 = vshll.u32 %v4901_v9, 16  ;;  %v2341_v50 = vshrl.u32 %v2291_v21, 16  ;;  %v2372_v51 = vshrl.u32 %v4917_v39, 16  ;;  %v2177_v52 = vrot.slane %v2176_v38, 4 }
 0x195   : > { %v2325_v23 = vor.u32 %v2323_v44, %v2322_v33  ;;  %v2181_v53 = vrot.slane %v2179_v31, 5  ;;  %v2333_v26 = vshrl.u32 %v4922_v45, 16  ;;  %v3855_v55 = vrot.slane %v2302_v29, 11 }
 0x196   : > { %v2312_v56 = vor.u32 %v2310_v13, %v2309_v43  ;;  %v2359_v58 = vshrl.u32 %v4928_v6, 16  ;;  %v2168_v59 = vsel %vm4588_vm4, %v2163_v47, %v2167_v37  ;;  %v2328_v61 = vshrl.u32 %v2289_v49, 16 }
 0x197   : > { %v2348_v63 = vrot.slane %v2346_v48, 7  ;;  %v2326_v0 = vsel %vm4816_vm10, %v3856_v32, %v2325_v23  ;;  %v3858_v1 = vrot.slane %v2341_v50, 11  ;;  %v2367_v4 = vshrl.u32 %v2295_v54, 16  ;;  %v2617_v54 = vld [vmem:[#allocation2 + $0x10] sm:$0xf] }
 0x198   : > { %v2374_v5 = vrot.slane %v2372_v51, 7  ;;  %v2182_v62 = vsel %vm4588_vm4, %v2177_v52, %v2181_v53  ;;  %v2335_v8 = vrot.slane %v2333_v26, 7  ;;  %v2349_v10 = vshll.u32 %v4911_v34, 16  ;;  %v3881_v51 = vld [vmem:[%s5144_s3 + $0x14] sm:$0xf] }
 0x199   : > { %v2354_v11 = vshrl.u32 %v2293_v57, 16  ;;  %v3850_v12 = vcombine.low %v2168_v59, %v2182_v62  ;;  %v2313_v14 = vsel %vm4816_vm10, %v3855_v55, %v2312_v56  ;;  %v2361_v15 = vrot.slane %v2359_v58, 7  ;;  %v2627_v62 = vld [vmem:[#allocation2 + $0x4c] sm:$0xf] }
 0x19a   : > { %4193 = vmatmul.mubr.msk.bf16.vlgmr.msra.gmra.mrb[4].mxu1 %vm1881_vm7, %v3848_v41  ;;  %v2375_v16 = vshll.u32 %v4917_v39, 16  ;;  %v3864_v18 = vcombine.low %v2313_v14, %v2326_v0  ;;  %v2336_v19 = vshll.u32 %v4922_v45, 16  ;;  %v2351_v22 = vor.u32 %v2349_v10, %v2348_v63 }
 0x19b   : > { %4201 = vmatpush3.bf16.msra.mxu1 %v2432_v36  ;;  %4196 = vmatprep.mubr.msk.bf16.mxu1 %vm1881_vm7, %v3849_v46  ;;  %v2398_v24 = vshrl.u32 %v4941_v7, 16  ;;  %v2362_v25 = vshll.u32 %v4928_v6, 16  ;;  %v3860_v27 = vrot.slane %v2367_v4, 11  ;;  %v3857_v29 = vrot.slane %v2328_v61, 11  ;;  %v2623_v4 = vld [vmem:[#allocation2 + $0x34] sm:$0xf] }
 0x19c   : > { %4430 = vmatprep.subr.msk.bf16.mxu1 %vm1894_vm6, %v3872_v28  ;;  %v2377_v20 = vor.u32 %v2375_v16, %v2374_v5  ;;  %v2338_v30 = vor.u32 %v2336_v19, %v2335_v8  ;;  %v2385_v31 = vshrl.u32 %v4949_v17, 16  ;;  %v3859_v32 = vrot.slane %v2354_v11, 11  ;;  %v2620_v5 = vld [vmem:[#allocation2 + $0x20] sm:$0x1]  ;;  %v2618_v8 = vld [vmem:[#allocation2 + $0x14] sm:$0x1] }
 0x19d   : > { %v2364_v33 = vor.u32 %v2362_v25, %v2361_v15  ;;  %v2352_v36 = vsel %vm4816_vm10, %v3858_v1, %v2351_v22  ;;  %v2393_v37 = vshrl.u32 %v2299_v3, 16  ;;  %v2400_v38 = vrot.slane %v2398_v24, 7  ;;  %v2625_v16 = vld [vmem:[#allocation2 + $0x40] sm:$0xf] }
 0x19e   : > { %v2378_v21 = vsel %vm4816_vm10, %v3860_v27, %v2377_v20  ;;  %v2339_v41 = vsel %vm4816_vm10, %v3857_v29, %v2338_v30  ;;  %v2380_v42 = vshrl.u32 %v2297_v35, 16  ;;  %v2387_v43 = vrot.slane %v2385_v31, 7  ;;  %v2622_v29 = vld [vmem:[#allocation2 + $0x2c] sm:$0x1]  ;;  %v2624_v30 = vld [vmem:[#allocation2 + $0x38] sm:$0x1] }
 0x19f   : > { %v2401_v44 = vshll.u32 %v4941_v7, 16  ;;  %v3865_v46 = vcombine.low %v2339_v41, %v2352_v36  ;;  %v2542_v47 = vsel %vm1894_vm6, %v3872_v28, 0  ;;  %v2365_v48 = vsel %vm4816_vm10, %v3859_v32, %v2364_v33  ;;  %v2619_v28 = vld [vmem:[#allocation2 + $0x1c] sm:$0xf]  ;;  %v4990_v35 = vld [vmem:[%s5144_s3 + $0x18] sm:$0xf] }
 0x1a0   : > { %v3866_v13 = vcombine.low %v2365_v48, %v2378_v21  ;;  %v2388_v23 = vshll.u32 %v4949_v17, 16  ;;  %v3862_v49 = vrot.slane %v2393_v37, 11  ;;  %v3861_v52 = vrot.slane %v2380_v42, 11  ;;  %v2631_v42 = vld [vmem:[#allocation2 + $0x64] sm:$0xf] }
 0x1a1   : > { %v2403_v50 = vor.u32 %v2401_v44, %v2400_v38  ;;  %v2648_v55 = vshrl.u32 %v2619_v28, 16  ;;  %v2651_v56 = vshll.u32 %v2619_v28, 16  ;;  %v2634_v59 = vshrl.u32 %v2617_v54, 16  ;;  %v2848_v38 = vld [vmem:[#allocation2 + $0x18] sm:$0x8] }
 0x1a2   : > { %4197 = vmatmul.mubr.msk.bf16.gmra.mrb[0].mxu1 %vm1881_vm7, %v3850_v12  ;;  %v2390_v53 = vor.u32 %v2388_v23, %v2387_v43  ;;  %v2637_v61 = vshll.u32 %v2617_v54, 16  ;;  %v3873_v63 = vcombine.low %v4901_v9, %v4899_v60  ;;  %v2621_v12 = vld [vmem:[#allocation2 + $0x28] sm:$0xf]  ;;  %v2676_v14 = vshrl.u32 %v2623_v4, 16  ;;  %v2628_v44 = vld [vmem:[#allocation2 + $0x50] sm:$0x1] }
 0x1a3   : > { %4202 = vmatprep.mubr.msk.bf16.mxu1 %vm1881_vm7, %v3864_v18  ;;  %v2404_v26 = vsel %vm4816_vm10, %v3862_v49, %v2403_v50  ;;  %v2650_v0 = vrot.slane %v2648_v55, 4  ;;  %v2653_v1 = vrot.slane %v2651_v56, 5  ;;  %v2636_v10 = vrot.slane %v2634_v59, 4  ;;  %v2629_v23 = vld [vmem:[#allocation2 + $0x58] sm:$0xf] }
 0x1a4   : > { %v2391_v57 = vsel %vm4816_vm10, %v3861_v52, %v2390_v53  ;;  %v2639_v11 = vrot.slane %v2637_v61, 5  ;;  %v2679_v15 = vshll.u32 %v2623_v4, 16  ;;  %v2657_v19 = vshll.u32 %v2620_v5, 16  ;;  %v4998_v61 = vld [vmem:[#allocation2 + $0x1c] sm:$0xf] }
 0x1a5   : > { %v3867_v58 = vcombine.low %v2391_v57, %v2404_v26  ;;  %v2654_v18 = vor.u32 %v2653_v1, %v2650_v0  ;;  %v2704_v22 = vshrl.u32 %v2627_v62, 16  ;;  %v2707_v60 = vshll.u32 %v2627_v62, 16  ;;  %v2632_v5 = vld [vmem:[#allocation2 + $0x68] sm:$0x1] }
 0x1a6   : > { %v2772_v9 = vsel %vm1894_vm6, %v3881_v51, 0  ;;  %v2643_v24 = vshll.u32 %v2618_v8, 16  ;;  %v2662_v25 = vshrl.u32 %v2621_v12, 16  ;;  %v2665_v27 = vshll.u32 %v2621_v12, 16  ;;  %v5004_v12 = vld [vmem:[#allocation2 + $0x28] sm:$0xf] }
 0x1a7   : > { %v3874_v20 = vcombine.low %v4922_v45, %v4911_v34  ;;  %v2640_v3 = vor.u32 %v2639_v11, %v2636_v10  ;;  %v2690_v31 = vshrl.u32 %v2625_v16, 16  ;;  %v2693_v32 = vshll.u32 %v2625_v16, 16 }
 0x1a8   : > { %v3875_v33 = vcombine.low %v4928_v6, %v4917_v39  ;;  %v2678_v36 = vrot.slane %v2676_v14, 4  ;;  %v2681_v37 = vrot.slane %v2679_v15, 5  ;;  %v2655_v21 = vrot.slane %v2654_v18, 4  ;;  %v2850_v18 = vld [vmem:[#allocation2 + $0x24] sm:$0x8] }
 0x1a9   : > { %v2659_v34 = vrot.slane %v2657_v19, 5  ;;  %v2706_v45 = vrot.slane %v2704_v22, 4  ;;  %v2709_v41 = vrot.slane %v2707_v60, 5  ;;  %v2664_v43 = vrot.slane %v2662_v25, 4  ;;  %v2630_v19 = vld [vmem:[#allocation2 + $0x5c] sm:$0x1] }
 0x1aa   : > { %4203 = vmatmul.mubr.msk.bf16.vlgmr.msra.gmra.mrb[4].mxu1 %vm1881_vm7, %v3865_v46  ;;  %v2667_v39 = vrot.slane %v2665_v27, 5  ;;  %v2685_v6 = vshll.u32 %v2624_v30, 16  ;;  %v2641_v46 = vrot.slane %v2640_v3, 4  ;;  %v2692_v48 = vrot.slane %v2690_v31, 4 }
 0x1ab   : > { %4211 = vmatpush3.bf16.msra.mxu1 %v2542_v47  ;;  %4206 = vmatprep.mubr.msk.bf16.mxu1 %vm1881_vm7, %v3866_v13  ;;  %v2645_v47 = vrot.slane %v2643_v24, 5  ;;  %v2695_v13 = vrot.slane %v2693_v32, 5  ;;  %v2671_v49 = vshll.u32 %v2622_v29, 16  ;;  %v2682_v50 = vor.u32 %v2681_v37, %v2678_v36  ;;  %v5014_v36 = vld [vmem:[#allocation2 + $0x40] sm:$0xf] }
 0x1ac   : > { %4431 = vmatprep.subr.msk.bf16.mxu1 %vm1894_vm6, %v3881_v51  ;;  %v2626_v51 = vld [vmem:[#allocation2 + $0x44] sm:$0x1]  ;;  %v2732_v52 = vshrl.u32 %v2631_v42, 16  ;;  %v2735_v53 = vshll.u32 %v2631_v42, 16  ;;  %v2660_v28 = vsel %vm4588_vm4, %v2655_v21, %v2659_v34  ;;  %v2710_v26 = vor.u32 %v2709_v41, %v2706_v45  ;;  %v5020_v45 = vld [vmem:[#allocation2 + $0x4c] sm:$0xf] }
 0x1ad   : > { %v2713_v54 = vshll.u32 %v2628_v44, 16  ;;  %v2865_v55 = vshrl.u32 %v2848_v38, 16  ;;  %v2668_v56 = vor.u32 %v2667_v39, %v2664_v43  ;;  %v2687_v57 = vrot.slane %v2685_v6, 5  ;;  %v2852_v6 = vld [vmem:[#allocation2 + $0x30] sm:$0x8] }
 0x1ae   : > { %v2721_v59 = vshll.u32 %v2629_v23, 16  ;;  %v2646_v0 = vsel %vm4588_vm4, %v2641_v46, %v2645_v47  ;;  %v2696_v1 = vor.u32 %v2695_v13, %v2692_v48  ;;  %v2699_v4 = vshll.u32 %v2626_v51, 16  ;;  %v5025_v44 = vld [vmem:[#allocation2 + $0x34] sm:$0xf]  ;;  %v2854_v46 = vld [vmem:[#allocation2 + $0x3c] sm:$0x8] }
 0x1af   : > { %v3882_v62 = vcombine.low %v2646_v0, %v2660_v28  ;;  %v2683_v8 = vrot.slane %v2682_v50, 4  ;;  %v2734_v10 = vrot.slane %v2732_v52, 4  ;;  %v2737_v11 = vrot.slane %v2735_v53, 5  ;;  %v2858_v51 = vld [vmem:[#allocation2 + $0x54] sm:$0x8] }
 0x1b0   : > { %v2673_v14 = vrot.slane %v2671_v49, 5  ;;  %v2711_v15 = vrot.slane %v2710_v26, 4  ;;  %v2715_v16 = vrot.slane %v2713_v54, 5  ;;  %v2723_v60 = vrot.slane %v2721_v59, 5  ;;  %v5036_v53 = vld [vmem:[#allocation2 + $0x70] sm:$0xf] }
 0x1b1   : > { %v2697_v24 = vrot.slane %v2696_v1, 4  ;;  %v2701_v25 = vrot.slane %v2699_v4, 5  ;;  %v2883_v27 = vshrl.u32 %v5004_v12, 16  ;;  %v2738_v3 = vor.u32 %v2737_v11, %v2734_v10  ;;  %v5046_v10 = vld [vmem:[#allocation2 + $0x64] sm:$0xf] }
 0x1b2   : > { %4207 = vmatmul.mubr.msk.bf16.gmra.mrb[0].mxu1 %vm1881_vm7, %v3867_v58  ;;  %v2718_v58 = vshrl.u32 %v2629_v23, 16  ;;  %v3890_v29 = vrot.slane %v2865_v55, 11  ;;  %v2716_v30 = vsel %vm4588_vm4, %v2711_v15, %v2715_v16  ;;  %v2727_v31 = vshll.u32 %v2630_v19, 16  ;;  %v5031_v23 = vld [vmem:[#allocation2 + $0x58] sm:$0xf] }
 0x1b3   : > { %4212 = vmatprep.mubr.msk.bf16.mxu1 %vm1881_vm7, %v3873_v63  ;;  %v3876_v63 = vcombine.low %v4949_v17, %v4941_v7  ;;  %v2870_v7 = vshrl.u32 %v4998_v61, 16  ;;  %v2669_v17 = vrot.slane %v2668_v56, 4  ;;  %v2995_v38 = vsel %vm1894_vm6, %v4990_v35, 0  ;;  %v2856_v56 = vld [vmem:[#allocation2 + $0x48] sm:$0x8] }
 0x1b4   : > { %v2720_v22 = vrot.slane %v2718_v58, 4  ;;  %v2702_v42 = vsel %vm4588_vm4, %v2697_v24, %v2701_v25  ;;  %v2873_v43 = vshll.u32 %v4998_v61, 16  ;;  %v2885_v39 = vrot.slane %v2883_v27, 7  ;;  %v2860_v25 = vld [vmem:[#allocation2 + $0x60] sm:$0x8] }
 0x1b5   : > { %v2872_v32 = vrot.slane %v2870_v7, 7  ;;  %v2674_v37 = vsel %vm4588_vm4, %v2669_v17, %v2673_v14  ;;  %v3884_v47 = vcombine.low %v2702_v42, %v2716_v30  ;;  %v2739_v48 = vrot.slane %v2738_v3, 4  ;;  %v2862_v27 = vld [vmem:[#allocation2 + $0x6c] sm:$0x8] }
 0x1b6   : > { %v2724_v21 = vor.u32 %v2723_v60, %v2720_v22  ;;  %v2909_v13 = vshrl.u32 %v5014_v36, 16  ;;  %v2886_v50 = vshll.u32 %v5004_v12, 16  ;;  %v2922_v52 = vshrl.u32 %v5020_v45, 16 }
 0x1b7   : > { %v2875_v49 = vor.u32 %v2873_v43, %v2872_v32  ;;  %v2729_v26 = vrot.slane %v2727_v31, 5  ;;  %v2896_v54 = vshrl.u32 %v5025_v44, 16  ;;  %v2904_v55 = vshrl.u32 %v2854_v46, 16 }
 0x1b8   : > { %v2725_v28 = vrot.slane %v2724_v21, 4  ;;  %v2888_v58 = vor.u32 %v2886_v50, %v2885_v39  ;;  %v2935_v59 = vshrl.u32 %v5031_v23, 16  ;;  %v2891_v0 = vshrl.u32 %v2852_v6, 16 }
 0x1b9   : > { %v2911_v1 = vrot.slane %v2909_v13, 7  ;;  %v2930_v4 = vshrl.u32 %v2858_v51, 16  ;;  %v2961_v11 = vshrl.u32 %v5036_v53, 16  ;;  %v2898_v15 = vrot.slane %v2896_v54, 7  ;;  %v3180_v54 = vld [vmem:[#allocation2 + $0x1c] sm:$0xf] }
 0x1ba   : > { %4213 = vmatmul.mubr.msk.bf16.vlgmr.msra.gmra.mrb[4].mxu1 %vm1881_vm7, %v3874_v20  ;;  %v2688_v20 = vsel %vm4588_vm4, %v2683_v8, %v2687_v57  ;;  %v2924_v8 = vrot.slane %v2922_v52, 7  ;;  %v2730_v14 = vsel %vm4588_vm4, %v2725_v28, %v2729_v26  ;;  %v3893_v16 = vrot.slane %v2904_v55, 11  ;;  %v3916_v26 = vld [vmem:[%s5144_s3 + $0x20] sm:$0xf] }
 0x1bb   : > { %4221 = vmatpush3.bf16.msra.mxu1 %v2772_v9  ;;  %4216 = vmatprep.mubr.msk.bf16.mxu1 %vm1881_vm7, %v3875_v33  ;;  %v2741_v9 = vshll.u32 %v2632_v5, 16  ;;  %v2878_v33 = vshrl.u32 %v2850_v18, 16  ;;  %v3883_v41 = vcombine.low %v2674_v37, %v2688_v20  ;;  %v2876_v5 = vsel %vm4816_vm10, %v3890_v29, %v2875_v49 }
 0x1bc   : > { %4432 = vmatprep.subr.msk.bf16.mxu1 %vm1894_vm6, %v4990_v35  ;;  %v3907_v35 = vld [vmem:[%s5144_s3 + $0x1c] sm:$0xf]  ;;  %v2912_v18 = vshll.u32 %v5014_v36, 16  ;;  %v2925_v19 = vshll.u32 %v5020_v45, 16  ;;  %v2937_v22 = vrot.slane %v2935_v59, 7  ;;  %v2948_v20 = vshrl.u32 %v5046_v10, 16 }
 0x1bd   : > { %v2743_v34 = vrot.slane %v2741_v9, 5  ;;  %v3891_v57 = vrot.slane %v2878_v33, 11  ;;  %v2899_v9 = vshll.u32 %v5025_v44, 16  ;;  %v2938_v30 = vshll.u32 %v5031_v23, 16 }
 0x1be   : > { %v2914_v24 = vor.u32 %v2912_v18, %v2911_v1  ;;  %v2927_v29 = vor.u32 %v2925_v19, %v2924_v8  ;;  %v3892_v31 = vrot.slane %v2891_v0, 11  ;;  %v3895_v33 = vrot.slane %v2930_v4, 11  ;;  %v3186_v8 = vld [vmem:[#allocation2 + $0x40] sm:$0xf]  ;;  %v3184_v18 = vld [vmem:[#allocation2 + $0x34] sm:$0xf] }
 0x1bf   : > { %v2889_v17 = vsel %vm4816_vm10, %v3891_v57, %v2888_v58  ;;  %v2901_v32 = vor.u32 %v2899_v9, %v2898_v15  ;;  %v2940_v37 = vor.u32 %v2938_v30, %v2937_v22  ;;  %v2956_v21 = vshrl.u32 %v2862_v27, 16  ;;  %v3190_v19 = vld [vmem:[#allocation2 + $0x58] sm:$0xf] }
 0x1c0   : > { %v3899_v60 = vcombine.low %v2876_v5, %v2889_v17  ;;  %v2963_v42 = vrot.slane %v2961_v11, 7  ;;  %v2964_v43 = vshll.u32 %v5036_v53, 16  ;;  %v2951_v46 = vshll.u32 %v5046_v10, 16  ;;  %v3183_v11 = vld [vmem:[#allocation2 + $0x2c] sm:$0x1] }
 0x1c1   : > { %v2902_v6 = vsel %vm4816_vm10, %v3892_v31, %v2901_v32  ;;  %v2941_v13 = vsel %vm4816_vm10, %v3895_v33, %v2940_v37  ;;  %v3897_v52 = vrot.slane %v2956_v21, 11  ;;  %v3197_v57 = vshrl.u32 %v3180_v54, 16  ;;  %v3194_v31 = vld [vmem:[#allocation2 + $0x70] sm:$0xf]  ;;  %v3418_v33 = vld [vmem:[%s5146_s5] sm:$0x3] }
 0x1c2   : > { %4217 = vmatmul.mubr.msk.bf16.gmra.mrb[0].mxu1 %vm1881_vm7, %v3876_v63  ;;  %v2744_v63 = vsel %vm4588_vm4, %v2739_v48, %v2743_v34  ;;  %v2915_v34 = vsel %vm4816_vm10, %v3893_v16, %v2914_v24  ;;  %v3105_v48 = vsel %vm1894_vm6, %v3907_v35, 0  ;;  %v2966_v28 = vor.u32 %v2964_v43, %v2963_v42  ;;  %v3185_v37 = vld [vmem:[#allocation2 + $0x38] sm:$0x1]  ;;  %v3192_v43 = vld [vmem:[#allocation2 + $0x64] sm:$0xf] }
 0x1c3   : > { %4222 = vmatprep.mubr.msk.bf16.mxu1 %vm1881_vm7, %v3882_v62  ;;  %v2917_v62 = vshrl.u32 %v2856_v56, 16  ;;  %v3885_v7 = vcombine.low %v2730_v14, %v2744_v63  ;;  %v3182_v56 = vld [vmem:[#allocation2 + $0x28] sm:$0xf]  ;;  %v3200_v58 = vshll.u32 %v3180_v54, 16  ;;  %v3181_v63 = vld [vmem:[#allocation2 + $0x20] sm:$0x1]  ;;  %v3908_v4 = vcombine.low %v4998_v61, %v5004_v12 }
 0x1c4   : > { %v2967_v55 = vsel %vm4816_vm10, %v3897_v52, %v2966_v28  ;;  %v3211_v0 = vshrl.u32 %v3182_v56, 16  ;;  %v3214_v1 = vshll.u32 %v3182_v56, 16  ;;  %v3199_v5 = vrot.slane %v3197_v57, 4  ;;  %v3188_v14 = vld [vmem:[#allocation2 + $0x4c] sm:$0xf] }
 0x1c5   : > { %v3894_v3 = vrot.slane %v2917_v62, 11  ;;  %v3202_v62 = vrot.slane %v3200_v58, 5  ;;  %v3206_v2 = vshll.u32 %v3181_v63, 16  ;;  %v3242_v17 = vshll.u32 %v3186_v8, 16 }
 0x1c6   : > { %v3213_v15 = vrot.slane %v3211_v0, 4  ;;  %v3216_v16 = vrot.slane %v3214_v1, 5  ;;  %v3253_v9 = vshrl.u32 %v3188_v14, 16  ;;  %v3256_v61 = vshll.u32 %v3188_v14, 16 }
 0x1c7   : > { %v2928_v39 = vsel %vm4816_vm10, %v3894_v3, %v2927_v29  ;;  %v3203_v22 = vor.u32 %v3202_v62, %v3199_v5  ;;  %v3335_v12 = vsel %vm1894_vm6, %v3916_v26, 0  ;;  %v3208_v24 = vrot.slane %v3206_v2, 5 }
 0x1c8   : > { %v3901_v50 = vcombine.low %v2928_v39, %v2941_v13  ;;  %v3228_v27 = vshll.u32 %v3184_v18, 16  ;;  %v3217_v3 = vor.u32 %v3216_v16, %v3213_v15  ;;  %v3267_v29 = vshrl.u32 %v3190_v19, 16  ;;  %v3191_v13 = vld [vmem:[#allocation2 + $0x5c] sm:$0x1]  ;;  %v3195_v16 = vld [vmem:[#allocation2 + $0x74] sm:$0x1] }
 0x1c9   : > { %v3270_v30 = vshll.u32 %v3190_v19, 16  ;;  %v3910_v32 = vcombine.low %v5020_v45, %v5031_v23  ;;  %v3189_v23 = vld [vmem:[#allocation2 + $0x50] sm:$0x1]  ;;  %v3281_v52 = vshrl.u32 %v3192_v43, 16  ;;  %v3284_v28 = vshll.u32 %v3192_v43, 16 }
 0x1ca   : > { %4223 = vmatmul.mubr.msk.bf16.vlgmr.msra.gmra.mrb[4].mxu1 %vm1881_vm7, %v3883_v41  ;;  %v2950_v41 = vrot.slane %v2948_v20, 7  ;;  %v3909_v20 = vcombine.low %v5025_v44, %v5014_v36  ;;  %v3255_v36 = vrot.slane %v3253_v9, 4  ;;  %v3258_v44 = vrot.slane %v3256_v61, 5 }
 0x1cb   : > { %4231 = vmatpush3.bf16.msra.mxu1 %v2995_v38  ;;  %4226 = vmatprep.mubr.msk.bf16.mxu1 %vm1881_vm7, %v3884_v47  ;;  %v2943_v38 = vshrl.u32 %v2860_v25, 16  ;;  %v3900_v47 = vcombine.low %v2902_v6, %v2915_v34  ;;  %v3225_v25 = vshrl.u32 %v3184_v18, 16  ;;  %v3244_v34 = vrot.slane %v3242_v17, 5 }
 0x1cc   : > { %4433 = vmatprep.subr.msk.bf16.mxu1 %vm1894_vm6, %v3907_v35  ;;  %v2953_v51 = vor.u32 %v2951_v46, %v2950_v41  ;;  %v3204_v41 = vrot.slane %v3203_v22, 4  ;;  %v3230_v45 = vrot.slane %v3228_v27, 5  ;;  %v3295_v6 = vshrl.u32 %v3194_v31, 16 }
 0x1cd   : > { %v3896_v49 = vrot.slane %v2943_v38, 11  ;;  %v3187_v38 = vld [vmem:[#allocation2 + $0x44] sm:$0x1]  ;;  %v3227_v39 = vrot.slane %v3225_v25, 4  ;;  %v3298_v46 = vshll.u32 %v3194_v31, 16  ;;  %v3234_v54 = vshll.u32 %v3185_v37, 16 }
 0x1ce   : > { %v3276_v57 = vshll.u32 %v3191_v13, 16  ;;  %v3297_v58 = vrot.slane %v3295_v6, 4  ;;  %v3911_v63 = vcombine.low %v5046_v10, %v5036_v53  ;;  %v3286_v2 = vrot.slane %v3284_v28, 5  ;;  %v4482_v37 = vld [vmem:[%s4558_s10 + $0xd8] ss:$8 sps:$4 sm:$0xff]  }
 0x1cf   : > { %v2954_v35 = vsel %vm4816_vm10, %v3896_v49, %v2953_v51  ;;  %v3269_v49 = vrot.slane %v3267_v29, 4  ;;  %v3231_v56 = vor.u32 %v3230_v45, %v3227_v39  ;;  %v3304_v9 = vshll.u32 %v3195_v16, 16  ;;  %v3941_v39 = vld [vmem:[%s5145_s4] ss:$0 sm:$0xff] }
 0x1d0   : > { %v3902_v59 = vcombine.low %v2954_v35, %v2967_v55  ;;  %v3259_v35 = vor.u32 %v3258_v44, %v3255_v36  ;;  %v3262_v55 = vshll.u32 %v3189_v23, 16  ;;  %v3278_v10 = vrot.slane %v3276_v57, 5  ;;  %v3942_v6 = vld [vmem:[%s5147_s6] ss:$0 sm:$0xff] }
 0x1d1   : > { %v3232_v18 = vrot.slane %v3231_v56, 4  ;;  %v3452_v25 = vsel %vm358_vm0, %v3418_v33, 0  ;;  %v3306_v31 = vrot.slane %v3304_v9, 5 }
 0x1d2   : > { %4227 = vmatmul.mubr.msk.bf16.gmra.mrb[0].mxu1 %vm1881_vm7, %v3885_v7  ;;  %v3239_v7 = vshrl.u32 %v3186_v8, 16  ;;  %v3193_v8 = vld [vmem:[#allocation2 + $0x68] sm:$0x1]  ;;  %v3260_v14 = vrot.slane %v3259_v35, 4  ;;  %v3264_v15 = vrot.slane %v3262_v55, 5 }
 0x1d3   : > { %4232 = vmatprep.mubr.msk.bf16.mxu1 %vm1881_vm7, %v3899_v60  ;;  %v3220_v60 = vshll.u32 %v3183_v11, 16  ;;  %v3283_v11 = vrot.slane %v3281_v52, 4  ;;  %v3290_v17 = vshll.u32 %v3193_v8, 16 }
 0x1d4   : > { %v3241_v21 = vrot.slane %v3239_v7, 4  ;;  %v3236_v7 = vrot.slane %v3234_v54, 5  ;;  %v3265_v61 = vsel %vm4588_vm4, %v3260_v14, %v3264_v15 }
 0x1d5   : > { %v3222_v42 = vrot.slane %v3220_v60, 5  ;;  %v3287_v22 = vor.u32 %v3286_v2, %v3283_v11 }
 0x1d6   : > { %v3245_v51 = vor.u32 %v3244_v34, %v3241_v21  ;;  %v4483_v21 = vld [vmem:[%s4558_s10 + $0xe8] ss:$8 sps:$4 sm:$0xff]   ;;  %v4484_v34 = vld [vmem:[%s4558_s10 + $0xf8] ss:$8 sps:$4 sm:$0xff]  }
 0x1d7   : > { %v3288_v29 = vrot.slane %v3287_v22, 4 }
 0x1d8   : > { %v3246_v62 = vrot.slane %v3245_v51, 4 }
 0x1da   : > { %4233 = vmatmul.mubr.msk.bf16.vlgmr.msra.gmra.mrb[4].mxu1 %vm1881_vm7, %v3900_v47  ;;  %v3218_v47 = vrot.slane %v3217_v3, 4 }
 0x1db   : > { %4241 = vmatpush3.bf16.msra.mxu1 %v3105_v48  ;;  %4236 = vmatprep.mubr.msk.bf16.mxu1 %vm1881_vm7, %v3901_v50  ;;  %v3248_v48 = vshll.u32 %v3187_v38, 16  ;;  %v3272_v50 = vrot.slane %v3270_v30, 5 }
 0x1dc   : > { %4434 = vmatprep.subr.msk.bf16.mxu1 %vm1894_vm6, %v3916_v26  ;;  %v3209_v26 = vsel %vm4588_vm4, %v3204_v41, %v3208_v24  ;;  %v3223_v0 = vsel %vm4588_vm4, %v3218_v47, %v3222_v42  ;;  %v4485_v41 = vld [vmem:[%s4558_s10 + $0x108] ss:$8 sps:$4 sm:$0xff]   ;;  %s3953_s10 = sshll.u32 %s5154_s25, 5 }
 0x1dd   : > { %v3250_v1 = vrot.slane %v3248_v48, 5  ;;  %v3917_v5 = vcombine.low %v3209_v26, %v3223_v0  ;;  %s278_s13 = scalar_lea.vmem %s5148_s7, %s3953_s10 }
 0x1df   : > { %v3251_v19 = vsel %vm4588_vm4, %v3246_v62, %v3250_v1 }
 0x1e2   : > { %4237 = vmatmul.mubr.msk.bf16.gmra.mrb[0].mxu1 %vm1881_vm7, %v3902_v59  ;;  %v3300_v59 = vrot.slane %v3298_v46, 5 }
 0x1e3   : > { %4242 = vmatprep.mubr.msk.bf16.mxu1 %vm1881_vm7, %v3908_v4  ;;  %v3273_v4 = vor.u32 %v3272_v50, %v3269_v49 }
 0x1e4   : > { %v3301_v60 = vor.u32 %v3300_v59, %v3297_v58 }
 0x1e5   : > { %v3274_v53 = vrot.slane %v3273_v4, 4 }
 0x1e6   : > { %v3302_v30 = vrot.slane %v3301_v60, 4 }
 0x1e7   : > { %v3279_v27 = vsel %vm4588_vm4, %v3274_v53, %v3278_v10 }
 0x1e8   : > { %v3919_v3 = vcombine.low %v3265_v61, %v3279_v27 }
 0x1ea   : > { %4243 = vmatmul.mubr.msk.bf16.vlgmr.msra.gmra.mrb[4].mxu1 %vm1881_vm7, %v3909_v20  ;;  %v3292_v20 = vrot.slane %v3290_v17, 5 }
 0x1eb   : > { %4251 = vmatpush3.bf16.msra.mxu1 %v3335_v12  ;;  %4246 = vmatprep.mubr.msk.bf16.mxu1 %vm1881_vm7, %v3910_v32  ;;  %v3237_v12 = vsel %vm4588_vm4, %v3232_v18, %v3236_v7 }
 0x1ec   : > { %4435 = vmatprep.subr.msk.bf16.mxu1 %vm358_vm0, %v3418_v33  ;;  %v3918_v24 = vcombine.low %v3237_v12, %v3251_v19  ;;  %v3293_v32 = vsel %vm4588_vm4, %v3288_v29, %v3292_v20  ;;  %v3307_v33 = vsel %vm4588_vm4, %v3302_v30, %v3306_v31 }
 0x1ed   : > { %v3920_v38 = vcombine.low %v3293_v32, %v3307_v33 }
 0x1f2   : > { %4247 = vmatmul.mubr.msk.bf16.gmra.mrb[0].mxu1 %vm1881_vm7, %v3911_v63 }
 0x1f3   : > { %4252 = vmatprep.mubr.msk.bf16.mxu1 %vm1881_vm7, %v3917_v5 }
 0x1fa   : > { %4253 = vmatmul.mubr.msk.bf16.vlgmr.msra.gmra.mrb[4].mxu1 %vm1881_vm7, %v3918_v24 }
 0x1fb   : > { %4261 = vmatpush3.bf16.msra.mxu1 %v3452_v25  ;;  %4256 = vmatprep.mubr.msk.bf16.mxu1 %vm1881_vm7, %v3919_v3 }
 0x202   : > { %4257 = vmatmul.mubr.msk.bf16.gmra.mrb[0].mxu1 %vm1881_vm7, %v3920_v38 }
 0x203   : > { %4262 = vmatprep.mubr.msk.bf16.mxu1 %vm345_vm1, %v4482_v37 }
 0x20a   : > { %4263 = vmatmul.mubr.msk.bf16.vlgmr.msra.gmra.mrb[4].mxu1 %vm345_vm1, %v4483_v21 }
 0x20b   : > { %4266 = vmatprep.mubr.msk.bf16.mxu1 %vm345_vm1, %v4484_v34 }
 0x212   : > { %4267 = vmatmul.mubr.msk.bf16.gmra.mrb[0].mxu1 %vm345_vm1, %v4485_v41 }
 0x24d   : > { %v4174_v42 = vpop.f32.mrb[8].mxu0 }
 0x24e   : > { %v1932_v36 = vpop.f32.mrb[9].mxu0 }
 0x24f   : > { %v4175_v44 = vpop.f32.mrb[10].mxu0 }
 0x250   : > { %v1935_v40 = vpop.f32.mrb[11].mxu0 }
 0x2dd   : > { %v4264_v43 = vpop.f32.mrb[4].mxu1 }
 0x2de   : > { %v4272_v45 = vadd.f32 %v4264_v43, %v4174_v42  ;;  %v3488_v23 = vpop.f32.mrb[5].mxu1 }
 0x2df   : > { %v4274_v46 = vadd.f32 %v3488_v23, %v1932_v36  ;;  %v4265_v47 = vpop.f32.mrb[6].mxu1 }
 0x2e0   : > { %v4273_v48 = vadd.f32 %v4272_v45, %v3941_v39  ;;  %v4276_v13 = vadd.f32 %v4265_v47, %v4175_v44  ;;  %v3491_v49 = vpop.f32.mrb[7].mxu1 }
 0x2e1   : > { %v4275_v50 = vadd.f32 %v4274_v46, %v3941_v39  ;;  %v4278_v51 = vadd.f32 %v3491_v49, %v1935_v40 }
 0x2e2   : > { %v3551_v52 = vadd.f32 %v4273_v48, %v3942_v6  ;;  %v4277_v28 = vadd.f32 %v4276_v13, %v3941_v39 }
 0x2e3   : > { %v3549_v26 = vadd.f32 %v4275_v50, %v3942_v6  ;;  %v4279_v54 = vadd.f32 %v4278_v51, %v3941_v39 }
 0x2e4   : > { %v3552_v35 = vadd.f32 %v4277_v28, %v3942_v6  ;;  %v3559_v57 = vmax.f32 %v3551_v52, 0.0 }
 0x2e5   : > { %v3550_v55 = vadd.f32 %v4279_v54, %v3942_v6  ;;  %v4268_v56 = vpop.f32.mrb[0].mxu1  ;;  %v3557_v0 = vmax.f32 %v3549_v26, 0.0 }
 0x2e6   : > { %v3560_v58 = vmax.f32 %v3552_v35, 0.0  ;;  %v4280_v59 = vadd.f32 %v4268_v56, %v3941_v39  ;;  %v3504_v63 = vpop.f32.mrb[1].mxu1 }
 0x2e7   : > { %v3558_v1 = vmax.f32 %v3550_v55, 0.0  ;;  %v4281_v4 = vadd.f32 %v3941_v39, %v3504_v63  ;;  %v4269_v5 = vpop.f32.mrb[2].mxu1 }
 0x2e8   : > { %v3970_v62 = vpack.c.bf16 %v3560_v58, %v3559_v57  ;;  %v3555_v8 = vadd.f32 %v4280_v59, %v3942_v6  ;;  %v4282_v11 = vadd.f32 %v4269_v5, %v3941_v39  ;;  %v3507_v2 = vpop.f32.mrb[3].mxu1 }
 0x2e9   : > { %v3965_v14 = vpack.c.bf16 %v3558_v1, %v3557_v0  ;;  %v3553_v15 = vadd.f32 %v4281_v4, %v3942_v6  ;;  %v4283_v16 = vadd.f32 %v3941_v39, %v3507_v2 }
 0x2ea   : > { %3982 = vst [vmem:[%s278_s13 + $0x8] sm:$0xff] %v3970_v62   ;;  %v3556_v18 = vadd.f32 %v4282_v11, %v3942_v6  ;;  %v3563_v53 = vmax.f32 %v3555_v8, 0.0 }
 0x2eb   : > { %3966 = vst [vmem:[%s278_s13] sm:$0xff] %v3965_v14   ;;  %v3554_v7 = vadd.f32 %v4283_v16, %v3942_v6  ;;  %v3561_v17 = vmax.f32 %v3553_v15, 0.0 }
 0x2ec   : > { %v3564_v10 = vmax.f32 %v3556_v18, 0.0 }
 0x2ed   : > { %v3562_v19 = vmax.f32 %v3554_v7, 0.0 }
 0x2ee   : > { %v3980_v22 = vpack.c.bf16 %v3564_v10, %v3563_v53 }
 0x2ef   : > { %v3975_v60 = vpack.c.bf16 %v3562_v19, %v3561_v17 }
 0x2f0   : > { %3984 = vst [vmem:[%s278_s13 + $0x18] sm:$0xff] %v3980_v22  }
 0x2f1   : > { %3983 = vst [vmem:[%s278_s13 + $0x10] sm:$0xff] %v3975_v60  }
 0x2f2 PF: > { %s17_s24 = sadd.s32 1, %s4492_s24  }
 0x2f3   : > { %p14_p4 = scmp.ge.s32.totalorder %s17_s24, 4  }
 0x2f5   :  { %16 = sbr.rel (!%p14_p4) target bundleno = 1 (0x1), region = 102 }

// kernel: run_chain.3
= control target key start
LH: loop header
LB: loop body
LE: loop exit
PB: predicated region body
PF: predicated region fallthrough
CT: control target
= control target key end

     0   :  { %s4765_s24 = smov 0   ;;  %s5627_s0 = inlined_call_operand.vmem [shape: bf16[2,10,10,8], index: 0, kind: input, shape index: {}]   ;;  %s5628_s1 = inlined_call_operand.vmem [shape: bf16[9,8,8], index: 1, kind: input, shape index: {}]   ;;  %s5629_s2 = inlined_call_operand.vmem [shape: f32[1,8], index: 2, kind: input, shape index: {}]   ;;  %s5630_s3 = inlined_call_operand.vmem [shape: bf16[9,8,128], index: 3, kind: input, shape index: {}]   ;;  %s5631_s4 = inlined_call_operand.vmem [shape: f32[1,128], index: 4, kind: input, shape index: {}]   ;;  %s5632_s5 = inlined_call_operand.vmem [shape: bf16[8,128], index: 5, kind: input, shape index: {}]   ;;  %s5633_s6 = inlined_call_operand.vmem [shape: f32[1,128], index: 6, kind: input, shape index: {}]   ;;  %s5634_s7 = inlined_call_operand.vmem [shape: bf16[2,64,128], index: 7, kind: output, shape index: {}]  }
   0x1 LB: > { %s3882_s25 = sadd.s32 4294967295, %s4722_s24   ;;  %p3886_p0 = scmp.ge.s32.totalorder %s4722_s24, 1  ;;  %s4722_s24 = sphi %s4765_s24, %s17_s24  }
   0x2   : > { %p237_p1 = scmp.lt.s32.totalorder %s4722_s24, 3 }
   0x4   : > { %p238_p2 = pnand %p3886_p0, %p237_p1 }
   0x5   : > { %v3890_v0 = vld [vmem:[%s5628_s1 + $0x4] sm:$0xf] (!%p238_p2)  ;;  %vm464_vm0 = vcmask (!%p238_p2), 1043456   ;;  %p269_p3 = scmp.lt.s32.totalorder (!%p238_p2), %s3882_s25, 1  ;;  %v313_v2 = vld [vmem:[%s5628_s1] sm:$0xf] (!%p238_p2) }
   0x6   : > { %241 = sbr.rel (%p238_p2) target bundleno = 771 (0x303), region = 48  ;;  %4662 = vmatprep.subr.msk.bf16.mxu0 (!%p238_p2), %vm464_vm0, %v3890_v0  ;;  %v466_v1 = vsel (!%p238_p2), %vm464_vm0, %v3890_v0, 0  ;;  %vm322_vm1 = vsmask.f32 (!%p238_p2), 3328  ;;  %vm323_vm2 = vsmask.f32 (!%p238_p2), 7440 }
   0x7   : > { %4327 = vmatpush3.bf16.msra.mxu0 (!%p238_p2), %v466_v1  ;;  %vm4825_vm3 = vmor (!%p238_p2), %vm322_vm1, %vm323_vm2  ;;  %vm451_vm4 = vcmask (!%p238_p2), 64512   ;;  %v566_v40 = vsel (!%p238_p2), %vm464_vm0, %v313_v2, 0  ;;  %vm657_vm5 = vcmask (!%p238_p2), 1042432   ;;  %vm658_vm6 = vcmask (!%p238_p2), 1046532   ;;  %v4188_v27 = vld [vmem:[%s5633_s6] ss:$0 sm:$0xff] (!%p238_p2) }
   0x8   : > { %4663 = vmatprep.subr.msk.bf16.mxu0 (!%p238_p2), %vm464_vm0, %v313_v2  ;;  %vm4905_vm7 = vmor (!%p238_p2), %vm657_vm5, %vm658_vm6  ;;  %vm280_vm8 = vcmask (!%p238_p2), 60416   ;;  %vm1863_vm9 = vsmask.f32 (!%p238_p2), 256  ;;  %vm1864_vm10 = vsmask.f32 (!%p238_p2), 4368 }
   0x9   : > { %vm5242_vm11 = vmor (!%p238_p2), %vm1863_vm9, %vm1864_vm10 }
   0xd   : > { %s5642_s25 = smov (!%p269_p3, %s3882_s25), 1 }
   0xe   : > { %s4682_s30 = smul.u32 80, %s5642_s25  ;;  %s4199_s9 = sshll.u32 %s5642_s25, 5 }
   0xf   : > { %s278_s13 = scalar_lea.vmem %s5634_s7, %s4199_s9 }
  0x10   : > { %s4788_s10 = scalar_lea.vmem %s5627_s0, %s4682_s30 }
  0x11   : > { %v4791_v3 = vld [vmem:[%s4788_s10] sm:$0xf]  ;;  %v4794_v4 = vld [vmem:[%s4788_s10 + $0x8] sm:$0xf]  ;;  %v4797_v5 = vld [vmem:[%s4788_s10 + $0x4] sm:$0x1] }
  0x12   : > { %v4800_v6 = vld [vmem:[%s4788_s10 + $0xc] sm:$0x1]  ;;  %v326_v7 = vshrl.u32 %v4791_v3, 16  ;;  %v329_v8 = vshll.u32 %v4791_v3, 16  ;;  %v335_v9 = vshll.u32 %v4797_v5, 16  ;;  %v340_v10 = vshrl.u32 %v4794_v4, 16 }
  0x13   : > { %v343_v11 = vshll.u32 %v4794_v4, 16  ;;  %v349_v12 = vshll.u32 %v4800_v6, 16  ;;  %v4809_v13 = vld [vmem:[%s4788_s10 + $0x10] sm:$0xf]  ;;  %v4812_v18 = vld [vmem:[%s4788_s10 + $0x18] sm:$0xf] }
  0x14   : > { %v328_v14 = vrot.slane %v326_v7, 4  ;;  %v331_v15 = vrot.slane %v329_v8, 5  ;;  %v337_v16 = vrot.slane %v335_v9, 5  ;;  %v342_v17 = vrot.slane %v340_v10, 4  ;;  %v4815_v21 = vld [vmem:[%s4788_s10 + $0x14] sm:$0x1] }
  0x15   : > { %v345_v19 = vrot.slane %v343_v11, 5  ;;  %v351_v20 = vrot.slane %v349_v12, 5  ;;  %v4818_v22 = vld [vmem:[%s4788_s10 + $0x1c] sm:$0x1]  ;;  %v354_v24 = vshrl.u32 %v4809_v13, 16  ;;  %v357_v25 = vshll.u32 %v4809_v13, 16 }
  0x16   : > { %v332_v23 = vor.u32 %v331_v15, %v328_v14  ;;  %v363_v26 = vshll.u32 %v4815_v21, 16  ;;  %v368_v29 = vshrl.u32 %v4812_v18, 16  ;;  %v371_v30 = vshll.u32 %v4812_v18, 16  ;;  %v4833_v32 = vld [vmem:[%s4788_s10 + $0x20] sm:$0xf] }
  0x17   : > { %v346_v28 = vor.u32 %v345_v19, %v342_v17  ;;  %v377_v31 = vshll.u32 %v4818_v22, 16  ;;  %v356_v34 = vrot.slane %v354_v24, 4  ;;  %v359_v35 = vrot.slane %v357_v25, 5  ;;  %v4836_v36 = vld [vmem:[%s4788_s10 + $0x28] sm:$0xf] }
  0x18   : > { %v333_v33 = vrot.slane %v332_v23, 4  ;;  %v370_v38 = vrot.slane %v368_v29, 4  ;;  %v373_v39 = vrot.slane %v371_v30, 5  ;;  %v4840_v41 = vld [vmem:[%s4788_s10 + $0x24] sm:$0x1]  ;;  %v365_v44 = vrot.slane %v363_v26, 5 }
  0x19   : > { %v347_v37 = vrot.slane %v346_v28, 4  ;;  %v360_v43 = vor.u32 %v359_v35, %v356_v34  ;;  %v379_v45 = vrot.slane %v377_v31, 5  ;;  %v4847_v48 = vld [vmem:[%s4788_s10 + $0x2c] sm:$0x1]  ;;  %v382_v49 = vshrl.u32 %v4833_v32, 16 }
  0x1a   : > { %v338_v42 = vsel %vm4825_vm3, %v333_v33, %v337_v16  ;;  %v374_v47 = vor.u32 %v373_v39, %v370_v38  ;;  %v385_v50 = vshll.u32 %v4833_v32, 16  ;;  %v391_v53 = vshll.u32 %v4840_v41, 16  ;;  %v4854_v55 = vld [vmem:[%s4788_s10 + $0x30] sm:$0xf]  ;;  %v4858_v60 = vld [vmem:[%s4788_s10 + $0x34] sm:$0x1] }
  0x1b   : > { %v352_v46 = vsel %vm4825_vm3, %v347_v37, %v351_v20  ;;  %v361_v52 = vrot.slane %v360_v43, 4  ;;  %v396_v54 = vshrl.u32 %v4836_v36, 16  ;;  %v384_v57 = vrot.slane %v382_v49, 4  ;;  %v4865_v1 = vld [vmem:[%s4788_s10 + $0x38] sm:$0xf] }
  0x1c   : > { %v3891_v51 = vcombine.low %v338_v42, %v352_v46  ;;  %v375_v56 = vrot.slane %v374_v47, 4  ;;  %v387_v58 = vrot.slane %v385_v50, 5  ;;  %v399_v59 = vshll.u32 %v4836_v36, 16  ;;  %v4870_v9 = vld [vmem:[%s4788_s10 + $0x3c] sm:$0x1] }
  0x1d   : > { %v366_v61 = vsel %vm4825_vm3, %v361_v52, %v365_v44  ;;  %v393_v62 = vrot.slane %v391_v53, 5  ;;  %v398_v63 = vrot.slane %v396_v54, 4  ;;  %v405_v0 = vshll.u32 %v4847_v48, 16  ;;  %v3915_v23 = vld [vmem:[%s5628_s1 + $0x8] sm:$0xf] }
  0x1e   : > { %4328 = vmatprep.mubr.msk.bf16.mxu0 %vm451_vm4, %v3891_v51  ;;  %v380_v2 = vsel %vm4825_vm3, %v375_v56, %v379_v45  ;;  %v388_v7 = vor.u32 %v387_v58, %v384_v57  ;;  %v401_v8 = vrot.slane %v399_v59, 5  ;;  %v410_v10 = vshrl.u32 %v4854_v55, 16  ;;  %v633_v47 = vld [vmem:[%s4788_s10] sm:$0xe]  ;;  %v634_v49 = vld [vmem:[%s4788_s10 + $0x8] sm:$0xe] }
  0x1f   : > { %v3892_v11 = vcombine.low %v366_v61, %v380_v2  ;;  %v407_v12 = vrot.slane %v405_v0, 5  ;;  %v413_v14 = vshll.u32 %v4854_v55, 16  ;;  %v419_v15 = vshll.u32 %v4858_v60, 16  ;;  %v638_v57 = vld [vmem:[%s4788_s10 + $0x28] sm:$0xe] }
  0x20   : > { %v389_v16 = vrot.slane %v388_v7, 4  ;;  %v402_v17 = vor.u32 %v401_v8, %v398_v63  ;;  %v412_v19 = vrot.slane %v410_v10, 4  ;;  %v424_v20 = vshrl.u32 %v4865_v1, 16  ;;  %v4067_v56 = vld [vmem:[%s5630_s3 + $0x4] sm:$0xf] }
  0x21   : > { %4329 = vmatmul.mubr.msk.bf16.vlgmr.msra.gmra.mrb[0].mxu0 %vm451_vm4, %v3892_v11  ;;  %v415_v24 = vrot.slane %v413_v14, 5  ;;  %v427_v25 = vshll.u32 %v4865_v1, 16  ;;  %v433_v26 = vshll.u32 %v4870_v9, 16  ;;  %v421_v33 = vrot.slane %v419_v15, 5  ;;  %v640_v11 = vld [vmem:[%s4788_s10 + $0x38] sm:$0xe]  ;;  %4672 = vmatprep.subr.msk.bf16.mxu1 %vm464_vm0, %v4067_v56 }
  0x22   : > { %4337 = vmatpush3.bf16.msra.mxu0 %v566_v40  ;;  %v394_v28 = vsel %vm4825_vm3, %v389_v16, %v393_v62  ;;  %v403_v29 = vrot.slane %v402_v17, 4  ;;  %v426_v30 = vrot.slane %v424_v20, 4  ;;  %v3899_v45 = vcombine.low %v4791_v3, %v4794_v4  ;;  %v3941_v14 = vld [vmem:[%s4788_s10 + $0x8] sm:$0xf]  ;;  %v3943_v20 = vld [vmem:[%s4788_s10 + $0x10] sm:$0xf] }
  0x23   : > { %v416_v31 = vor.u32 %v415_v24, %v412_v19  ;;  %v429_v34 = vrot.slane %v427_v25, 5  ;;  %4664 = vmatprep.subr.msk.bf16.mxu0 %vm464_vm0, %v3915_v23  ;;  %v435_v42 = vrot.slane %v433_v26, 5  ;;  %v3900_v50 = vcombine.low %v4809_v13, %v4812_v18  ;;  %v3932_v13 = vld [vmem:[%s5628_s1 + $0xc] sm:$0xf]  ;;  %v635_v18 = vld [vmem:[%s4788_s10 + $0x10] sm:$0xe] }
  0x24   : > { %v408_v35 = vsel %vm4825_vm3, %v403_v29, %v407_v12  ;;  %v719_v51 = vsel %vm464_vm0, %v3915_v23, 0  ;;  %v3901_v3 = vcombine.low %v4833_v32, %v4836_v36  ;;  %v662_v4 = vrot.slane %v4797_v5, 5  ;;  %v636_v32 = vld [vmem:[%s4788_s10 + $0x18] sm:$0xe]  ;;  %v637_v36 = vld [vmem:[%s4788_s10 + $0x20] sm:$0xe] }
  0x25   : > { %v3893_v37 = vcombine.low %v394_v28, %v408_v35  ;;  %v417_v38 = vrot.slane %v416_v31, 4  ;;  %v430_v39 = vor.u32 %v429_v34, %v426_v30  ;;  %v666_v52 = vrot.slane %v4800_v6, 5  ;;  %v3957_v24 = vld [vmem:[%s5628_s1 + $0x10] sm:$0xf]  ;;  %v4957_v30 = vld [vmem:[%s4788_s10 + $0xc] sm:$0x1] }
  0x26   : > { %v3907_v53 = vrot.slane %v633_v47, 9  ;;  %v3908_v54 = vrot.slane %v634_v49, 9  ;;  %v670_v58 = vrot.slane %v4815_v21, 5  ;;  %v3902_v59 = vcombine.low %v4854_v55, %v4865_v1  ;;  %v639_v21 = vld [vmem:[%s4788_s10 + $0x30] sm:$0xe] }
  0x27   : > { %4332 = vmatprep.mubr.msk.bf16.mxu0 %vm451_vm4, %v3893_v37  ;;  %v422_v40 = vsel %vm4825_vm3, %v417_v38, %v421_v33  ;;  %v431_v43 = vrot.slane %v430_v39, 4  ;;  %v674_v61 = vrot.slane %v4818_v22, 5  ;;  %v3909_v63 = vrot.slane %v635_v18, 9  ;;  %v4960_v35 = vld [vmem:[%s4788_s10 + $0x14] sm:$0x1] }
  0x28   : > { %v663_v5 = vsel %vm4905_vm7, %v3907_v53, %v662_v4  ;;  %v667_v6 = vsel %vm4905_vm7, %v3908_v54, %v666_v52  ;;  %v3910_v0 = vrot.slane %v636_v32, 9  ;;  %v3911_v2 = vrot.slane %v637_v36, 9  ;;  %v3945_v39 = vld [vmem:[%s4788_s10 + $0x18] sm:$0xf]  ;;  %v3949_v47 = vld [vmem:[%s4788_s10 + $0x28] sm:$0xf] }
  0x29   : > { %v436_v44 = vsel %vm4825_vm3, %v431_v43, %v435_v42  ;;  %v3916_v62 = vcombine.low %v663_v5, %v667_v6  ;;  %v678_v7 = vrot.slane %v4840_v41, 5  ;;  %v3912_v8 = vrot.slane %v638_v57, 9  ;;  %v4696_v42 = vld [vmem:[%s4788_s10 + $0x8] ss:$8 sps:$4 sm:$0xff]   ;;  %v4697_v53 = vld [vmem:[%s4788_s10 + $0x18] ss:$8 sps:$4 sm:$0xff]  }
  0x2a   : > { %v3894_v46 = vcombine.low %v422_v40, %v436_v44  ;;  %v682_v10 = vrot.slane %v4847_v48, 5  ;;  %v671_v55 = vsel %vm4905_vm7, %v3909_v63, %v670_v58  ;;  %v675_v22 = vsel %vm4905_vm7, %v3910_v0, %v674_v61  ;;  %v3947_v40 = vld [vmem:[%s4788_s10 + $0x20] sm:$0xf]  ;;  %v3951_v49 = vld [vmem:[%s4788_s10 + $0x30] sm:$0xf] }
  0x2b   : > { %v679_v1 = vsel %vm4905_vm7, %v3911_v2, %v678_v7  ;;  %v3913_v48 = vrot.slane %v639_v21, 9  ;;  %v3917_v12 = vcombine.low %v671_v55, %v675_v22  ;;  %v686_v16 = vrot.slane %v4858_v60, 5  ;;  %v4974_v57 = vld [vmem:[%s4788_s10 + $0x1c] sm:$0x1]  ;;  %v4977_v61 = vld [vmem:[%s4788_s10 + $0x24] sm:$0x1] }
  0x2c   : > { %4333 = vmatmul.mubr.msk.bf16.gmra.mrb[4].mxu0 %vm451_vm4, %v3894_v46  ;;  %v683_v41 = vsel %vm4905_vm7, %v3912_v8, %v682_v10  ;;  %v3914_v17 = vrot.slane %v640_v11, 9  ;;  %v690_v19 = vrot.slane %v4870_v9, 5  ;;  %v838_v23 = vsel %vm464_vm0, %v3932_v13, 0  ;;  %v4698_v2 = vld [vmem:[%s4788_s10 + $0x28] ss:$8 sps:$4 sm:$0xff]  }
  0x2d   : > { %4338 = vmatprep.mubr.msk.bf16.mxu0 %vm451_vm4, %v3899_v45  ;;  %v3918_v15 = vcombine.low %v679_v1, %v683_v41  ;;  %v930_v25 = vshrl.u32 %v3941_v14, 16  ;;  %v933_v26 = vshll.u32 %v3941_v14, 16  ;;  %v944_v28 = vshrl.u32 %v3943_v20, 16  ;;  %v3982_v7 = vld [vmem:[%s5628_s1 + $0x14] sm:$0xf] }
  0x2e   : > { %v947_v60 = vshll.u32 %v3943_v20, 16  ;;  %v687_v9 = vsel %vm4905_vm7, %v3913_v48, %v686_v16  ;;  %v691_v29 = vsel %vm4905_vm7, %v3914_v17, %v690_v19  ;;  %v939_v43 = vshll.u32 %v4957_v30, 16  ;;  %v3953_v8 = vld [vmem:[%s4788_s10 + $0x38] sm:$0xf]  ;;  %v3955_v1 = vld [vmem:[%s4788_s10 + $0x40] sm:$0xf] }
  0x2f   : > { %v932_v31 = vrot.slane %v930_v25, 4  ;;  %v935_v33 = vrot.slane %v933_v26, 5  ;;  %v3919_v34 = vcombine.low %v687_v9, %v691_v29  ;;  %v946_v37 = vrot.slane %v944_v28, 4  ;;  %v4988_v48 = vld [vmem:[%s4788_s10 + $0x2c] sm:$0x1] }
  0x30   : > { %v949_v38 = vrot.slane %v947_v60, 5  ;;  %v953_v45 = vshll.u32 %v4960_v35, 16  ;;  %v958_v46 = vshrl.u32 %v3945_v39, 16  ;;  %v975_v4 = vshll.u32 %v3947_v40, 16  ;;  %v4699_v29 = vld [vmem:[%s4788_s10 + $0x38] ss:$8 sps:$4 sm:$0xff]  }
  0x31   : > { %v936_v44 = vor.u32 %v935_v33, %v932_v31  ;;  %v1068_v52 = vsel %vm464_vm0, %v3957_v24, 0  ;;  %v986_v54 = vshrl.u32 %v3949_v47, 16  ;;  %v1000_v5 = vshrl.u32 %v3951_v49, 16 }
  0x32   : > { %v1003_v6 = vshll.u32 %v3951_v49, 16  ;;  %v941_v32 = vrot.slane %v939_v43, 5  ;;  %v955_v36 = vrot.slane %v953_v45, 5  ;;  %v960_v58 = vrot.slane %v958_v46, 4  ;;  %v5007_v49 = vld [vmem:[%s4788_s10 + $0x44] sm:$0x1] }
  0x33   : > { %v937_v18 = vrot.slane %v936_v44, 4  ;;  %v977_v0 = vrot.slane %v975_v4, 5  ;;  %v988_v10 = vrot.slane %v986_v54, 4  ;;  %v1002_v55 = vrot.slane %v1000_v5, 4  ;;  %v3966_v5 = vld [vmem:[%s4788_s10 + $0x8] sm:$0xe] }
  0x34   : > { %4339 = vmatmul.mubr.msk.bf16.vlgmr.msra.gmra.mrb[0].mxu0 %vm451_vm4, %v3900_v50  ;;  %v950_v50 = vor.u32 %v949_v38, %v946_v37  ;;  %v1005_v22 = vrot.slane %v1003_v6, 5  ;;  %v967_v41 = vshll.u32 %v4974_v57, 16  ;;  %v981_v11 = vshll.u32 %v4977_v61, 16  ;;  %v5004_v38 = vld [vmem:[%s4788_s10 + $0x3c] sm:$0x1] }
  0x35   : > { %4347 = vmatpush3.bf16.msra.mxu0 %v719_v51  ;;  %4342 = vmatprep.mubr.msk.bf16.mxu0 %vm451_vm4, %v3901_v3  ;;  %v961_v51 = vshll.u32 %v3945_v39, 16  ;;  %v972_v3 = vshrl.u32 %v3947_v40, 16  ;;  %v942_v14 = vsel %vm4825_vm3, %v937_v18, %v941_v32  ;;  %v1014_v19 = vshrl.u32 %v3953_v8, 16  ;;  %v3967_v6 = vld [vmem:[%s4788_s10 + $0x10] sm:$0xe] }
  0x36   : > { %4665 = vmatprep.subr.msk.bf16.mxu0 %vm464_vm0, %v3932_v13  ;;  %v989_v13 = vshll.u32 %v3949_v47, 16  ;;  %v1017_v20 = vshll.u32 %v3953_v8, 16  ;;  %v995_v26 = vshll.u32 %v4988_v48, 16  ;;  %v1006_v28 = vor.u32 %v1005_v22, %v1002_v55  ;;  %v3968_v22 = vld [vmem:[%s4788_s10 + $0x18] sm:$0xe] }
  0x37   : > { %v974_v63 = vrot.slane %v972_v3, 4  ;;  %v969_v9 = vrot.slane %v967_v41, 5  ;;  %v983_v37 = vrot.slane %v981_v11, 5  ;;  %v1016_v39 = vrot.slane %v1014_v19, 4  ;;  %v3970_v41 = vld [vmem:[%s4788_s10 + $0x28] sm:$0xe] }
  0x38   : > { %v991_v21 = vrot.slane %v989_v13, 5  ;;  %v997_v45 = vrot.slane %v995_v26, 5  ;;  %v1007_v46 = vrot.slane %v1006_v28, 4  ;;  %v1226_v32 = vsel %vm464_vm0, %v3982_v7, 0  ;;  %v3971_v11 = vld [vmem:[%s4788_s10 + $0x30] sm:$0xe] }
  0x39   : > { %v978_v17 = vor.u32 %v977_v0, %v974_v63  ;;  %v3974_v0 = vrot.slane %v3966_v5, 9  ;;  %v3975_v8 = vrot.slane %v3967_v6, 9  ;;  %v4700_v5 = vld [vmem:[%s4788_s10 + $0x10] ss:$8 sps:$4 sm:$0xff]   ;;  %v4014_v6 = vld [vmem:[%s4788_s10 + $0x28] sm:$0xf] }
  0x3a   : > { %v992_v25 = vor.u32 %v991_v21, %v988_v10  ;;  %v1173_v10 = vrot.slane %v4960_v35, 5  ;;  %v3999_v21 = vld [vmem:[%s5628_s1 + $0x18] sm:$0xf] }
  0x3c   : > { %4343 = vmatmul.mubr.msk.bf16.gmra.mrb[4].mxu0 %vm451_vm4, %v3902_v59  ;;  %v951_v59 = vrot.slane %v950_v50, 4  ;;  %v993_v44 = vrot.slane %v992_v25, 4  ;;  %v1174_v35 = vsel %vm4905_vm7, %v3975_v8, %v1173_v10  ;;  %v3979_v25 = vrot.slane %v3971_v11, 9  ;;  %v5093_v11 = vld [vmem:[%s4788_s10 + $0x24] sm:$0x1] }
  0x3d   : > { %4348 = vmatprep.mubr.msk.bf16.mxu0 %vm451_vm4, %v3916_v62  ;;  %v963_v62 = vrot.slane %v961_v51, 5  ;;  %v1023_v51 = vshll.u32 %v5004_v38, 16  ;;  %v1482_v8 = vshll.u32 %v4014_v6, 16 }
  0x3e   : > { %v998_v54 = vsel %vm4825_vm3, %v993_v44, %v997_v45 }
  0x3f   : > { %v964_v16 = vor.u32 %v963_v62, %v960_v58 }
  0x41   : > { %v965_v33 = vrot.slane %v964_v16, 4 }
  0x43   : > { %v970_v50 = vsel %vm4825_vm3, %v965_v33, %v969_v9  ;;  %v3973_v9 = vld [vmem:[%s4788_s10 + $0x40] sm:$0xe] }
  0x44   : > { %4349 = vmatmul.mubr.msk.bf16.vlgmr.msra.gmra.mrb[0].mxu0 %vm451_vm4, %v3917_v12  ;;  %v4991_v12 = vld [vmem:[%s4788_s10 + $0x34] sm:$0x1] }
  0x45   : > { %4357 = vmatpush3.bf16.msra.mxu0 %v838_v23  ;;  %4352 = vmatprep.mubr.msk.bf16.mxu0 %vm451_vm4, %v3918_v15  ;;  %v956_v15 = vsel %vm4825_vm3, %v951_v59, %v955_v36  ;;  %v1028_v23 = vshrl.u32 %v3955_v1, 16  ;;  %v1009_v60 = vshll.u32 %v4991_v12, 16  ;;  %v1025_v36 = vrot.slane %v1023_v51, 5 }
  0x46   : > { %4666 = vmatprep.subr.msk.bf16.mxu0 %vm464_vm0, %v3957_v24  ;;  %v1031_v24 = vshll.u32 %v3955_v1, 16  ;;  %v3958_v31 = vcombine.low %v942_v14, %v956_v15  ;;  %v3969_v1 = vld [vmem:[%s4788_s10 + $0x20] sm:$0xe]  ;;  %v3976_v15 = vrot.slane %v3968_v22, 9  ;;  %v1189_v26 = vrot.slane %v4991_v12, 5 }
  0x47   : > { %v1030_v40 = vrot.slane %v1028_v23, 4  ;;  %v1011_v47 = vrot.slane %v1009_v60, 5  ;;  %v3977_v19 = vrot.slane %v3969_v1, 9  ;;  %v3978_v23 = vrot.slane %v3970_v41, 9  ;;  %v3972_v60 = vld [vmem:[%s4788_s10 + $0x38] sm:$0xe] }
  0x48   : > { %v1033_v43 = vrot.slane %v1031_v24, 5  ;;  %v1185_v24 = vrot.slane %v4988_v48, 5  ;;  %v1190_v48 = vsel %vm4905_vm7, %v3979_v25, %v1189_v26  ;;  %v4020_v25 = vld [vmem:[%s4788_s10 + $0x40] sm:$0xf] }
  0x49   : > { %v1012_v13 = vsel %vm4825_vm3, %v1007_v46, %v1011_v47 }
  0x4a   : > { %v3960_v58 = vcombine.low %v998_v54, %v1012_v13  ;;  %v4012_v13 = vld [vmem:[%s4788_s10 + $0x20] sm:$0xf] }
  0x4c   : > { %4353 = vmatmul.mubr.msk.bf16.gmra.mrb[4].mxu0 %vm451_vm4, %v3919_v34  ;;  %v979_v34 = vrot.slane %v978_v17, 4  ;;  %v1177_v17 = vrot.slane %v4974_v57, 5 }
  0x4d   : > { %4358 = vmatprep.mubr.msk.bf16.mxu0 %vm451_vm4, %v4696_v42  ;;  %v1019_v42 = vrot.slane %v1017_v20, 5  ;;  %v1181_v20 = vrot.slane %v4977_v61, 5  ;;  %v1186_v61 = vsel %vm4905_vm7, %v3978_v23, %v1185_v24  ;;  %v4702_v23 = vld [vmem:[%s4788_s10 + $0x30] ss:$8 sps:$4 sm:$0xff]   ;;  %v4049_v24 = vld [vmem:[%s5628_s1 + $0x20] sm:$0xf] }
  0x4e   : > { %v984_v3 = vsel %vm4825_vm3, %v979_v34, %v983_v37  ;;  %v1178_v28 = vsel %vm4905_vm7, %v3976_v15, %v1177_v17  ;;  %v3985_v33 = vcombine.low %v1186_v61, %v1190_v48  ;;  %v1193_v34 = vrot.slane %v5004_v38, 5  ;;  %v4022_v61 = vld [vmem:[%s4788_s10 + $0x48] sm:$0xf] }
  0x4f   : > { %v1020_v4 = vor.u32 %v1019_v42, %v1016_v39  ;;  %v3959_v18 = vcombine.low %v970_v50, %v984_v3  ;;  %v1182_v57 = vsel %vm4905_vm7, %v3977_v19, %v1181_v20  ;;  %v3981_v37 = vrot.slane %v3973_v9, 9  ;;  %v4010_v42 = vld [vmem:[%s4788_s10 + $0x18] sm:$0xf]  ;;  %v5076_v50 = vld [vmem:[%s4788_s10 + $0x14] sm:$0x1] }
  0x50   : > { %v3984_v12 = vcombine.low %v1178_v28, %v1182_v57  ;;  %v1197_v39 = vrot.slane %v5007_v49, 5  ;;  %v1451_v46 = vshrl.u32 %v4010_v42, 16  ;;  %v1454_v38 = vshll.u32 %v4010_v42, 16 }
  0x51   : > { %v1021_v59 = vrot.slane %v1020_v4, 4  ;;  %v1484_v20 = vrot.slane %v1482_v8, 5  ;;  %v1474_v48 = vshll.u32 %v5093_v11, 16  ;;  %v1524_v42 = vshll.u32 %v4020_v25, 16 }
  0x52   : > { %v1456_v54 = vrot.slane %v1454_v38, 5 }
  0x54   : > { %4359 = vmatmul.mubr.msk.bf16.vlgmr.msra.gmra.mrb[0].mxu0 %vm451_vm4, %v4697_v53  ;;  %v1037_v53 = vshll.u32 %v5007_v49, 16  ;;  %v1198_v49 = vsel %vm4905_vm7, %v3981_v37, %v1197_v39  ;;  %v1521_v39 = vshrl.u32 %v4020_v25, 16 }
  0x55   : > { %4367 = vmatpush3.bf16.msra.mxu0 %v1068_v52  ;;  %4362 = vmatprep.mubr.msk.bf16.mxu0 %vm451_vm4, %v4698_v2  ;;  %v1034_v52 = vor.u32 %v1033_v43, %v1030_v40  ;;  %v1169_v2 = vrot.slane %v4957_v30, 5  ;;  %v1345_v40 = vsel %vm464_vm0, %v3999_v21, 0  ;;  %v4024_v43 = vld [vmem:[%s5628_s1 + $0x1c] sm:$0xf] }
  0x56   : > { %4667 = vmatprep.subr.msk.bf16.mxu0 %vm464_vm0, %v3982_v7  ;;  %v1039_v63 = vrot.slane %v1037_v53, 5  ;;  %v1026_v7 = vsel %vm4825_vm3, %v1021_v59, %v1025_v36  ;;  %v1453_v53 = vrot.slane %v1451_v46, 4  ;;  %v4016_v59 = vld [vmem:[%s4788_s10 + $0x30] sm:$0xf]  ;;  %v1575_v10 = vsel %vm464_vm0, %v4024_v43, 0 }
  0x57   : > { %v1035_v62 = vrot.slane %v1034_v52, 4  ;;  %v1170_v30 = vsel %vm4905_vm7, %v3974_v0, %v1169_v2  ;;  %v5079_v52 = vld [vmem:[%s4788_s10 + $0x1c] sm:$0x1]  ;;  %v1468_v0 = vshll.u32 %v4012_v13, 16  ;;  %v1479_v2 = vshrl.u32 %v4014_v6, 16 }
  0x58   : > { %v3983_v16 = vcombine.low %v1170_v30, %v1174_v35  ;;  %v1460_v36 = vshll.u32 %v5079_v52, 16 }
  0x59   : > { %v1040_v55 = vsel %vm4825_vm3, %v1035_v62, %v1039_v63  ;;  %v4018_v62 = vld [vmem:[%s4788_s10 + $0x38] sm:$0xf]  ;;  %v1457_v63 = vor.u32 %v1456_v54, %v1453_v53  ;;  %v1470_v17 = vrot.slane %v1468_v0, 5  ;;  %v1481_v19 = vrot.slane %v1479_v2, 4  ;;  %v5123_v54 = vld [vmem:[%s4788_s10 + $0x44] sm:$0x1] }
  0x5a   : > { %v3961_v14 = vcombine.low %v1026_v7, %v1040_v55  ;;  %v1493_v7 = vshrl.u32 %v4016_v59, 16  ;;  %v1496_v55 = vshll.u32 %v4016_v59, 16  ;;  %v1507_v22 = vshrl.u32 %v4018_v62, 16 }
  0x5b   : > { %v1510_v30 = vshll.u32 %v4018_v62, 16  ;;  %v1462_v41 = vrot.slane %v1460_v36, 5  ;;  %v1458_v15 = vrot.slane %v1457_v63, 4  ;;  %v1485_v37 = vor.u32 %v1484_v20, %v1481_v19  ;;  %v5126_v62 = vld [vmem:[%s4788_s10 + $0x4c] sm:$0x1] }
  0x5c   : > { %4363 = vmatmul.mubr.msk.bf16.gmra.mrb[4].mxu0 %vm451_vm4, %v4699_v29  ;;  %v3980_v29 = vrot.slane %v3972_v60, 9  ;;  %v1495_v26 = vrot.slane %v1493_v7, 4  ;;  %v1498_v28 = vrot.slane %v1496_v55, 5  ;;  %v1509_v57 = vrot.slane %v1507_v22, 4  ;;  %v4033_v22 = vld [vmem:[%s4788_s10 + $0x10] sm:$0xe] }
  0x5d   : > { %4368 = vmatprep.mubr.msk.bf16.mxu0 %vm451_vm4, %v3958_v31  ;;  %v4008_v31 = vld [vmem:[%s4788_s10 + $0x10] sm:$0xf]  ;;  %v1512_v60 = vrot.slane %v1510_v30, 5  ;;  %v1530_v0 = vshll.u32 %v5123_v54, 16  ;;  %v4034_v30 = vld [vmem:[%s4788_s10 + $0x18] sm:$0xe] }
  0x5e   : > { %v1437_v44 = vshrl.u32 %v4008_v31, 16  ;;  %v1440_v45 = vshll.u32 %v4008_v31, 16  ;;  %v1194_v47 = vsel %vm4905_vm7, %v3980_v29, %v1193_v34  ;;  %v5110_v29 = vld [vmem:[%s4788_s10 + $0x3c] sm:$0x1]  ;;  %v4041_v20 = vrot.slane %v4033_v22, 9 }
  0x5f   : > { %v3986_v4 = vcombine.low %v1194_v47, %v1198_v49  ;;  %v1513_v46 = vor.u32 %v1512_v60, %v1509_v57  ;;  %v1516_v38 = vshll.u32 %v5110_v29, 16  ;;  %v1476_v47 = vrot.slane %v1474_v48, 5  ;;  %v4703_v49 = vld [vmem:[%s4788_s10 + $0x40] ss:$8 sps:$4 sm:$0xff]   ;;  %v4038_v48 = vld [vmem:[%s4788_s10 + $0x38] sm:$0xe] }
  0x60   : > { %v1439_v51 = vrot.slane %v1437_v44, 4  ;;  %v1442_v3 = vrot.slane %v1440_v45, 5  ;;  %v1499_v44 = vor.u32 %v1498_v28, %v1495_v26  ;;  %v4042_v25 = vrot.slane %v4034_v30, 9  ;;  %v4035_v57 = vld [vmem:[%s4788_s10 + $0x20] sm:$0xe] }
  0x61   : > { %v1518_v59 = vrot.slane %v1516_v38, 5  ;;  %v1680_v26 = vrot.slane %v5079_v52, 5  ;;  %v4037_v52 = vld [vmem:[%s4788_s10 + $0x30] sm:$0xe]  ;;  %v4040_v38 = vld [vmem:[%s4788_s10 + $0x48] sm:$0xe] }
  0x64   : > { %4369 = vmatmul.mubr.msk.bf16.vlgmr.msra.gmra.mrb[0].mxu0 %vm451_vm4, %v3959_v18  ;;  %v1446_v18 = vshll.u32 %v5076_v50, 16 }
  0x65   : > { %4377 = vmatpush3.bf16.msra.mxu0 %v1226_v32  ;;  %4372 = vmatprep.mubr.msk.bf16.mxu0 %vm451_vm4, %v3960_v58  ;;  %v1443_v32 = vor.u32 %v1442_v3, %v1439_v51  ;;  %v1465_v58 = vshrl.u32 %v4012_v13, 16  ;;  %v1523_v13 = vrot.slane %v1521_v39, 4 }
  0x66   : > { %4668 = vmatprep.subr.msk.bf16.mxu0 %vm464_vm0, %v3999_v21  ;;  %v4701_v21 = vld [vmem:[%s4788_s10 + $0x20] ss:$8 sps:$4 sm:$0xff]   ;;  %v1448_v1 = vrot.slane %v1446_v18, 5 }
  0x67   : > { %v1444_v35 = vrot.slane %v1443_v32, 4  ;;  %v1500_v32 = vrot.slane %v1499_v44, 4  ;;  %v1696_v44 = vrot.slane %v5110_v29, 5 }
  0x69   : > { %v1449_v31 = vsel %vm4825_vm3, %v1444_v35, %v1448_v1  ;;  %v1733_v1 = vsel %vm464_vm0, %v4049_v24, 0 }
  0x6c   : > { %4373 = vmatmul.mubr.msk.bf16.gmra.mrb[4].mxu0 %vm451_vm4, %v3961_v14  ;;  %v1467_v14 = vrot.slane %v1465_v58, 4  ;;  %v1514_v58 = vrot.slane %v1513_v46, 4 }
  0x6d   : > { %4378 = vmatprep.mubr.msk.bf16.mxu0 %vm451_vm4, %v3983_v16  ;;  %v5096_v16 = vld [vmem:[%s4788_s10 + $0x2c] sm:$0x1] }
  0x6e   : > { %v1488_v9 = vshll.u32 %v5096_v16, 16  ;;  %v1471_v34 = vor.u32 %v1470_v17, %v1467_v14  ;;  %v1519_v55 = vsel %vm4825_vm3, %v1514_v58, %v1518_v59  ;;  %v1688_v39 = vrot.slane %v5096_v16, 5 }
  0x70   : > { %v1472_v3 = vrot.slane %v1471_v34, 4  ;;  %v1490_v53 = vrot.slane %v1488_v9, 5  ;;  %v1684_v34 = vrot.slane %v5093_v11, 5  ;;  %v4039_v11 = vld [vmem:[%s4788_s10 + $0x40] sm:$0xe] }
  0x71   : > { %v4047_v29 = vrot.slane %v4039_v11, 9 }
  0x72   : > { %v1477_v63 = vsel %vm4825_vm3, %v1472_v3, %v1476_v47  ;;  %v4048_v3 = vrot.slane %v4040_v38, 9 }
  0x74   : > { %4379 = vmatmul.mubr.msk.bf16.vlgmr.msra.gmra.mrb[0].mxu0 %vm451_vm4, %v3984_v12  ;;  %v5107_v12 = vld [vmem:[%s4788_s10 + $0x34] sm:$0x1] }
  0x75   : > { %4387 = vmatpush3.bf16.msra.mxu0 %v1345_v40  ;;  %4382 = vmatprep.mubr.msk.bf16.mxu0 %vm451_vm4, %v3985_v33  ;;  %v1463_v33 = vsel %vm4825_vm3, %v1458_v15, %v1462_v41  ;;  %v1535_v40 = vshrl.u32 %v4022_v61, 16  ;;  %v1502_v45 = vshll.u32 %v5107_v12, 16  ;;  %v1532_v41 = vrot.slane %v1530_v0, 5 }
  0x76   : > { %4669 = vmatprep.subr.msk.bf16.mxu0 %vm464_vm0, %v4024_v43  ;;  %v1538_v43 = vshll.u32 %v4022_v61, 16  ;;  %v4025_v51 = vcombine.low %v1449_v31, %v1463_v33  ;;  %v4036_v61 = vld [vmem:[%s4788_s10 + $0x28] sm:$0xe]  ;;  %v4043_v31 = vrot.slane %v4035_v57, 9 }
  0x77   : > { %v1537_v6 = vrot.slane %v1535_v40, 4  ;;  %v1504_v36 = vrot.slane %v1502_v45, 5  ;;  %v1692_v40 = vrot.slane %v5107_v12, 5 }
  0x78   : > { %v1540_v18 = vrot.slane %v1538_v43, 5  ;;  %v4046_v43 = vrot.slane %v4038_v48, 9  ;;  %v1685_v45 = vsel %vm4905_vm7, %v4043_v31, %v1684_v34 }
  0x79   : > { %v1505_v7 = vsel %vm4825_vm3, %v1500_v32, %v1504_v36  ;;  %v4058_v32 = vld [vmem:[%s5629_s2] ss:$0 sm:$0xff] }
  0x7a   : > { %v4027_v14 = vcombine.low %v1505_v7, %v1519_v55  ;;  %v1697_v12 = vsel %vm4905_vm7, %v4046_v43, %v1696_v44 }
  0x7c   : > { %4383 = vmatmul.mubr.msk.bf16.gmra.mrb[4].mxu0 %vm451_vm4, %v3986_v4  ;;  %v1486_v4 = vrot.slane %v1485_v37, 4  ;;  %v4044_v37 = vrot.slane %v4036_v61, 9 }
  0x7d   : > { %4388 = vmatprep.mubr.msk.bf16.mxu0 %vm451_vm4, %v4700_v5  ;;  %v1526_v5 = vrot.slane %v1524_v42, 5  ;;  %v4045_v42 = vrot.slane %v4037_v52, 9 }
  0x7e   : > { %v1491_v2 = vsel %vm4825_vm3, %v1486_v4, %v1490_v53  ;;  %v1689_v46 = vsel %vm4905_vm7, %v4044_v37, %v1688_v39  ;;  %v1704_v4 = vrot.slane %v5126_v62, 5 }
  0x7f   : > { %v1527_v8 = vor.u32 %v1526_v5, %v1523_v13  ;;  %v4026_v35 = vcombine.low %v1477_v63, %v1491_v2  ;;  %v1693_v16 = vsel %vm4905_vm7, %v4045_v42, %v1692_v40  ;;  %v4051_v47 = vcombine.low %v1685_v45, %v1689_v46 }
  0x80   : > { %v1705_v13 = vsel %vm4905_vm7, %v4048_v3, %v1704_v4 }
  0x81   : > { %v1528_v15 = vrot.slane %v1527_v8, 4 }
  0x84   : > { %4389 = vmatmul.mubr.msk.bf16.vlgmr.msra.gmra.mrb[0].mxu0 %vm451_vm4, %v4701_v21  ;;  %v1544_v21 = vshll.u32 %v5126_v62, 16 }
  0x85   : > { %4397 = vmatpush3.bf16.msra.mxu0 %v1575_v10  ;;  %4392 = vmatprep.mubr.msk.bf16.mxu0 %vm451_vm4, %v4702_v23  ;;  %v1541_v10 = vor.u32 %v1540_v18, %v1537_v6  ;;  %v1676_v23 = vrot.slane %v5076_v50, 5  ;;  %v1681_v50 = vsel %vm4905_vm7, %v4042_v25, %v1680_v26  ;;  %v4724_v6 = vmov 0   ;;  %v5215_v18 = vld [vmem:[%s5630_s3] sm:$0xf] }
  0x86   : > { %4670 = vmatprep.subr.msk.bf16.mxu0 %vm464_vm0, %v4049_v24  ;;  %v1546_v19 = vrot.slane %v1544_v21, 5  ;;  %v1533_v24 = vsel %vm4825_vm3, %v1528_v15, %v1532_v41  ;;  %282 = vst.msk [vmem:[#allocation2 + $0x4] sm:$0xf] %vm280_vm8, %v4724_v6  ;;  %281 = vst.msk [vmem:[#allocation2] sm:$0xf] %vm280_vm8, %v4724_v6 }
  0x87   : > { %v1542_v17 = vrot.slane %v1541_v10, 4  ;;  %v1677_v60 = vsel %vm4905_vm7, %v4041_v20, %v1676_v23  ;;  %283 = vst.msk [vmem:[#allocation2 + $0x8] sm:$0xf] %vm280_vm8, %v4724_v6  ;;  %285 = vst.msk [vmem:[#allocation2 + $0x6c] sm:$0xf] %vm280_vm8, %v4724_v6 }
  0x88   : > { %v4050_v33 = vcombine.low %v1677_v60, %v1681_v50  ;;  %286 = vst.msk [vmem:[#allocation2 + $0x70] sm:$0xf] %vm280_vm8, %v4724_v6  ;;  %287 = vst.msk [vmem:[#allocation2 + $0x74] sm:$0xf] %vm280_vm8, %v4724_v6 }
  0x89   : > { %v1547_v28 = vsel %vm4825_vm3, %v1542_v17, %v1546_v19  ;;  %289 = vst.msk [vmem:[#allocation2 + $0xc] sm:$0xf] %vm280_vm8, %v4724_v6  ;;  %290 = vst.msk [vmem:[#allocation2 + $0x18] sm:$0xf] %vm280_vm8, %v4724_v6 }
  0x8a   : > { %v4028_v9 = vcombine.low %v1533_v24, %v1547_v28  ;;  %291 = vst.msk [vmem:[#allocation2 + $0x24] sm:$0xf] %vm280_vm8, %v4724_v6  ;;  %292 = vst.msk [vmem:[#allocation2 + $0x30] sm:$0xf] %vm280_vm8, %v4724_v6 }
  0x8b   : > { %293 = vst.msk [vmem:[#allocation2 + $0x3c] sm:$0xf] %vm280_vm8, %v4724_v6  ;;  %294 = vst.msk [vmem:[#allocation2 + $0x48] sm:$0xf] %vm280_vm8, %v4724_v6 }
  0x8c   : > { %4393 = vmatmul.mubr.msk.bf16.gmra.mrb[4].mxu0 %vm451_vm4, %v4703_v49  ;;  %v4052_v49 = vcombine.low %v1693_v16, %v1697_v12  ;;  %295 = vst.msk [vmem:[#allocation2 + $0x54] sm:$0xf] %vm280_vm8, %v4724_v6  ;;  %296 = vst.msk [vmem:[#allocation2 + $0x60] sm:$0xf] %vm280_vm8, %v4724_v6 }
  0x8d   : > { %4398 = vmatprep.mubr.msk.bf16.mxu0 %vm451_vm4, %v4025_v51  ;;  %v1700_v51 = vrot.slane %v5123_v54, 5  ;;  %297 = vst.msk [vmem:[#allocation2 + $0x14] sm:$0xf] %vm280_vm8, %v4724_v6  ;;  %298 = vst.msk [vmem:[#allocation2 + $0x20] sm:$0xf] %vm280_vm8, %v4724_v6  ;;  %v2006_v54 = vsel %vm464_vm0, %v4067_v56, 0 }
  0x8e   : > { %299 = vst.msk [vmem:[#allocation2 + $0x2c] sm:$0xf] %vm280_vm8, %v4724_v6  ;;  %300 = vst.msk [vmem:[#allocation2 + $0x38] sm:$0xf] %vm280_vm8, %v4724_v6  ;;  %4517 = vmatpush3.bf16.msra.mxu1 %v2006_v54  ;;  %v5222_v10 = vld [vmem:[#allocation2 + $0x4] sm:$0xf] }
  0x8f   : > { %v1701_v53 = vsel %vm4905_vm7, %v4047_v29, %v1700_v51  ;;  %301 = vst.msk [vmem:[#allocation2 + $0x44] sm:$0xf] %vm280_vm8, %v4724_v6  ;;  %302 = vst.msk [vmem:[#allocation2 + $0x50] sm:$0xf] %vm280_vm8, %v4724_v6  ;;  %4673 = vmatprep.subr.msk.bf16.mxu1 %vm464_vm0, %v5215_v18  ;;  %v2165_v26 = vld [vmem:[#allocation2 + $0x4] sm:$0xf] }
  0x90   : > { %v4053_v5 = vcombine.low %v1701_v53, %v1705_v13  ;;  %303 = vst.msk [vmem:[#allocation2 + $0x5c] sm:$0xf] %vm280_vm8, %v4724_v6  ;;  %304 = vst.msk [vmem:[#allocation2 + $0x68] sm:$0xf] %vm280_vm8, %v4724_v6  ;;  %v1849_v19 = vld [vmem:[#allocation2 + $0xc] sm:$0x8] }
  0x91   : > { %v1853_v25 = vld [vmem:[#allocation2 + $0x24] sm:$0x8]  ;;  %v1875_v48 = vshll.u32 %v5222_v10, 16  ;;  %v1851_v34 = vld [vmem:[#allocation2 + $0x18] sm:$0x8]  ;;  %v2182_v39 = vshrl.u32 %v2165_v26, 16 }
  0x92   : > { %v1906_v37 = vshrl.u32 %v1853_v25, 16  ;;  %v1855_v43 = vld [vmem:[#allocation2 + $0x30] sm:$0x8]  ;;  %v2185_v44 = vshll.u32 %v2165_v26, 16  ;;  %v2166_v16 = vld [vmem:[#allocation2 + $0x8] sm:$0x1] }
  0x93   : > { %v1857_v51 = vld [vmem:[#allocation2 + $0x3c] sm:$0x8]  ;;  %v2098_v26 = vsel %vm464_vm0, %v5215_v18, 0 }
  0x94   : > { %4399 = vmatmul.mubr.msk.bf16.vlgmr.msra.gmra.mrb[0].mxu0 %vm451_vm4, %v4026_v35 }
  0x95   : > { %4407 = vmatpush3.bf16.msra.mxu0 %v1733_v1  ;;  %4402 = vmatprep.mubr.msk.bf16.mxu0 %vm451_vm4, %v4027_v14  ;;  %v1872_v1 = vshrl.u32 %v5222_v10, 16  ;;  %v1847_v14 = vld [vmem:[#allocation2] sm:$0x8] }
  0x96   : > { %4671 = vmatprep.subr.msk.bf16.mxu0 %vm464_vm0, %v4067_v56  ;;  %v1867_v60 = vshrl.u32 %v1847_v14, 16 }
  0x97   : > { %v1874_v57 = vrot.slane %v1872_v1, 7 }
  0x98   : > { %v5230_v11 = vrot.slane %v1867_v60, 11 }
  0x9c   : > { %4403 = vmatmul.mubr.msk.bf16.gmra.mrb[4].mxu0 %vm451_vm4, %v4028_v9  ;;  %v1880_v9 = vshrl.u32 %v1849_v19, 16 }
  0x9d   : > { %4408 = vmatprep.mubr.msk.bf16.mxu0 %vm451_vm4, %v4050_v33 }
  0x9e   : > { %v4060_v29 = vrot.slane %v1880_v9, 11 }
  0xa4   : > { %4409 = vmatmul.mubr.msk.bf16.vlgmr.msra.gmra.mrb[0].mxu0 %vm451_vm4, %v4051_v47  ;;  %v5233_v47 = vor.u32 %v1875_v48, %v1874_v57 }
  0xa5   : > { %4412 = vmatprep.mubr.msk.bf16.mxu0 %vm451_vm4, %v4052_v49  ;;  %4417 = vmatpush3.bf16.msra.mxu0 %v2006_v54  ;;  %v1893_v49 = vshrl.u32 %v1851_v34, 16  ;;  %v1919_v54 = vshrl.u32 %v1855_v43, 16 }
  0xa7   : > { %v5255_v1 = vrot.slane %v1893_v49, 11 }
  0xac   : > { %4413 = vmatmul.mubr.msk.bf16.gmra.mrb[4].mxu0 %vm451_vm4, %v4053_v5  ;;  %v5237_v5 = vrot.slane %v1906_v37, 11 }
 0x177   : > { %v4410_v36 = vpop.f32.mrb[0].mxu0 }
 0x178   : > { %v1817_v58 = vadd.f32 %v4410_v36, %v4058_v32  ;;  %v1769_v59 = vpop.f32.mrb[1].mxu0  ;;  %v2191_v36 = vshll.u32 %v2166_v16, 16 }
 0x179   : > { %v1815_v62 = vadd.f32 %v4058_v32, %v1769_v59  ;;  %v4411_v63 = vpop.f32.mrb[2].mxu0 }
 0x17a   : > { %v1825_v0 = vmax.f32 %v1817_v58, 0.0  ;;  %v1818_v2 = vadd.f32 %v4411_v63, %v4058_v32  ;;  %v1772_v8 = vpop.f32.mrb[3].mxu0  ;;  %v1932_v63 = vshrl.u32 %v1857_v51, 16 }
 0x17b   : > { %v1823_v21 = vmax.f32 %v1815_v62, 0.0  ;;  %v1816_v7 = vadd.f32 %v4058_v32, %v1772_v8 }
 0x17c   : > { %v1833_v55 = vpack.c.bf16 %v1825_v0, %v1825_v0  ;;  %v1826_v22 = vmax.f32 %v1818_v2, 0.0  ;;  %v5248_v0 = vld [vmem:[#allocation2 + $0x54] sm:$0x8]  ;;  %v5262_v19 = vrot.slane %v1932_v63, 11 }
 0x17d   : > { %v1831_v30 = vpack.c.bf16 %v1823_v21, %v1823_v21  ;;  %v1824_v35 = vmax.f32 %v1816_v7, 0.0  ;;  %v1859_v21 = vld [vmem:[#allocation2 + $0x48] sm:$0x8]  ;;  %v1878_v7 = vsel %vm5242_vm11, %v5230_v11, %v5233_v47  ;;  %v1958_v14 = vshrl.u32 %v5248_v0, 16 }
 0x17e   : > { %1841 = vst.msk [vmem:[#allocation2 + $0x28] sm:$0xf] %vm280_vm8, %v1833_v55  ;;  %v1834_v41 = vpack.c.bf16 %v1826_v22, %v1826_v22 }
 0x17f   : > { %1839 = vst.msk [vmem:[#allocation2 + $0x10] sm:$0xf] %vm280_vm8, %v1831_v30  ;;  %v1832_v15 = vpack.c.bf16 %v1824_v35, %v1824_v35  ;;  %v4414_v17 = vpop.f32.mrb[4].mxu0  ;;  %v2184_v30 = vrot.slane %v2182_v39, 4  ;;  %v2187_v35 = vrot.slane %v2185_v44, 5 }
 0x180   : > { %1842 = vst.msk [vmem:[#allocation2 + $0x34] sm:$0xf] %vm280_vm8, %v1834_v41  ;;  %v1821_v20 = vadd.f32 %v4414_v17, %v4058_v32  ;;  %v1785_v23 = vpop.f32.mrb[5].mxu0  ;;  %v5257_v41 = vrot.slane %v1919_v54, 11 }
 0x181   : > { %1840 = vst.msk [vmem:[#allocation2 + $0x1c] sm:$0xf] %vm280_vm8, %v1832_v15  ;;  %v1819_v24 = vadd.f32 %v4058_v32, %v1785_v23  ;;  %v4415_v28 = vpop.f32.mrb[6].mxu0  ;;  %v5260_v15 = vrot.slane %v2191_v36, 5  ;;  %v2188_v34 = vor.u32 %v2187_v35, %v2184_v30 }
 0x182   : > { %v1829_v50 = vmax.f32 %v1821_v20, 0.0  ;;  %v1822_v61 = vadd.f32 %v4415_v28, %v4058_v32  ;;  %v1788_v52 = vpop.f32.mrb[7].mxu0  ;;  %v1945_v20 = vshrl.u32 %v1859_v21, 16 }
 0x183   : > { %v1827_v31 = vmax.f32 %v1819_v24, 0.0  ;;  %v1820_v33 = vadd.f32 %v4058_v32, %v1788_v52  ;;  %v2168_v32 = vld [vmem:[#allocation2 + $0x14] sm:$0x1]  ;;  %v5278_v51 = vrot.slane %v2188_v34, 4 }
 0x184   : > { %v1837_v42 = vpack.c.bf16 %v1829_v50, %v1829_v50  ;;  %v1830_v40 = vmax.f32 %v1822_v61, 0.0  ;;  %v2205_v23 = vshll.u32 %v2168_v32, 16  ;;  %v4065_v54 = vrot.slane %v1945_v20, 11 }
 0x185   : > { %v1835_v45 = vpack.c.bf16 %v1827_v31, %v1827_v31  ;;  %v1828_v46 = vmax.f32 %v1820_v33, 0.0  ;;  %v1854_v13 = vld [vmem:[#allocation2 + $0x28] sm:$0xf]  ;;  %v2194_v34 = vsel %vm4825_vm3, %v5278_v51, %v5260_v15 }
 0x186   : > { %1845 = vst.msk [vmem:[#allocation2 + $0x58] sm:$0xf] %vm280_vm8, %v1837_v42  ;;  %v1838_v12 = vpack.c.bf16 %v1830_v40, %v1830_v40  ;;  %v1850_v38 = vld [vmem:[#allocation2 + $0x10] sm:$0xf]  ;;  %v1914_v33 = vshll.u32 %v1854_v13, 16 }
 0x187   : > { %1843 = vst.msk [vmem:[#allocation2 + $0x40] sm:$0xf] %vm280_vm8, %v1835_v45  ;;  %v1836_v3 = vpack.c.bf16 %v1828_v46, %v1828_v46  ;;  %v1885_v4 = vshrl.u32 %v1850_v38, 16  ;;  %v4068_v53 = vcombine.low %v5222_v10, %v1850_v38  ;;  %v1888_v59 = vshll.u32 %v1850_v38, 16  ;;  %v1856_v2 = vld [vmem:[#allocation2 + $0x34] sm:$0xf] }
 0x188   : > { %1846 = vst.msk [vmem:[#allocation2 + $0x64] sm:$0xf] %vm280_vm8, %v1838_v12  ;;  %v1852_v6 = vld [vmem:[#allocation2 + $0x1c] sm:$0xf]  ;;  %v1911_v10 = vshrl.u32 %v1854_v13, 16  ;;  %v1924_v17 = vshrl.u32 %v1856_v2, 16 }
 0x189   : > { %1844 = vst.msk [vmem:[#allocation2 + $0x4c] sm:$0xf] %vm280_vm8, %v1836_v3  ;;  %v1887_v58 = vrot.slane %v1885_v4, 7  ;;  %4418 = vmatprep.mubr.msk.bf16.mxu0 %vm451_vm4, %v4068_v53  ;;  %v4069_v62 = vcombine.low %v1852_v6, %v1854_v13  ;;  %v1898_v8 = vshrl.u32 %v1852_v6, 16  ;;  %v2167_v22 = vld [vmem:[#allocation2 + $0x10] sm:$0xf] }
 0x18a   : > { %v1913_v28 = vrot.slane %v1911_v10, 7  ;;  %v2196_v57 = vshrl.u32 %v2167_v22, 16  ;;  %v2199_v52 = vshll.u32 %v2167_v22, 16  ;;  %v1901_v31 = vshll.u32 %v1852_v6, 16  ;;  %v2169_v40 = vld [vmem:[#allocation2 + $0x1c] sm:$0xf] }
 0x18b   : > { %4419 = vmatmul.mubr.msk.bf16.vlgmr.msra.gmra.mrb[8].mxu0 %vm451_vm4, %v4069_v62  ;;  %v1890_v55 = vor.u32 %v1888_v59, %v1887_v58  ;;  %v1900_v24 = vrot.slane %v1898_v8, 7  ;;  %v1926_v37 = vrot.slane %v1924_v17, 7  ;;  %v4084_v45 = vld [vmem:[%s5630_s3 + $0x8] sm:$0xf]  ;;  %v1927_v16 = vshll.u32 %v1856_v2, 16 }
 0x18c   : > { %v1916_v11 = vor.u32 %v1914_v33, %v1913_v28  ;;  %v2198_v38 = vrot.slane %v2196_v57, 4  ;;  %v2201_v47 = vrot.slane %v2199_v52, 5  ;;  %v5280_v3 = vrot.slane %v2205_v23, 5  ;;  %v2173_v63 = vld [vmem:[#allocation2 + $0x34] sm:$0xf] }
 0x18d   : > { %v1891_v61 = vsel %vm5242_vm11, %v4060_v29, %v1890_v55  ;;  %v5268_v9 = vld [vmem:[#allocation2 + $0x58] sm:$0xf]  ;;  %v1903_v46 = vor.u32 %v1901_v31, %v1900_v24  ;;  %v2171_v29 = vld [vmem:[#allocation2 + $0x28] sm:$0xf]  ;;  %v2210_v4 = vshrl.u32 %v2169_v40, 16  ;;  %v1929_v13 = vor.u32 %v1927_v16, %v1926_v37 }
 0x18e   : > { %v1858_v25 = vld [vmem:[#allocation2 + $0x40] sm:$0xf]  ;;  %v4076_v44 = vcombine.low %v1878_v7, %v1891_v61  ;;  %v1963_v49 = vshrl.u32 %v5268_v9, 16  ;;  %v2320_v6 = vsel %vm464_vm0, %v4084_v45, 0  ;;  %v2213_v32 = vshll.u32 %v2169_v40, 16 }
 0x18f   : > { %v1937_v60 = vshrl.u32 %v1858_v25, 16  ;;  %v4070_v50 = vcombine.low %v1856_v2, %v1858_v25  ;;  %v1940_v42 = vshll.u32 %v1858_v25, 16  ;;  %v2175_v53 = vld [vmem:[#allocation2 + $0x40] sm:$0xf]  ;;  %v1904_v58 = vsel %vm5242_vm11, %v5255_v1, %v1903_v46  ;;  %v2172_v24 = vld [vmem:[#allocation2 + $0x2c] sm:$0x1] }
 0x190   : > { %v1860_v48 = vld [vmem:[#allocation2 + $0x4c] sm:$0xf]  ;;  %v1917_v59 = vsel %vm5242_vm11, %v5237_v5, %v1916_v11  ;;  %v2224_v62 = vshrl.u32 %v2171_v29, 16  ;;  %v2202_v8 = vor.u32 %v2201_v47, %v2198_v38  ;;  %v2252_v10 = vshrl.u32 %v2175_v53, 16  ;;  %v2170_v22 = vld [vmem:[#allocation2 + $0x20] sm:$0x1] }
 0x191   : > { %v1939_v39 = vrot.slane %v1937_v60, 7  ;;  %4422 = vmatprep.mubr.msk.bf16.mxu1 %vm451_vm4, %v4070_v50  ;;  %v4071_v18 = vcombine.low %v1860_v48, %v5268_v9  ;;  %v1950_v43 = vshrl.u32 %v1860_v48, 16  ;;  %v2255_v21 = vshll.u32 %v2175_v53, 16  ;;  %v2176_v33 = vld [vmem:[#allocation2 + $0x44] sm:$0x1] }
 0x192   : > { %v1953_v7 = vshll.u32 %v1860_v48, 16  ;;  %v1965_v55 = vrot.slane %v1963_v49, 7  ;;  %v2212_v30 = vrot.slane %v2210_v4, 4  ;;  %v2227_v35 = vshll.u32 %v2171_v29, 16  ;;  %v2174_v40 = vld [vmem:[#allocation2 + $0x38] sm:$0x1] }
 0x193   : > { %v1942_v12 = vor.u32 %v1940_v42, %v1939_v39  ;;  %4423 = vmatmul.mubr.msk.bf16.vlgmr.msra.gmra.mrb[0].mxu1 %vm451_vm4, %v4071_v18  ;;  %v1952_v36 = vrot.slane %v1950_v43, 7  ;;  %v4077_v17 = vcombine.low %v1904_v58, %v1917_v59  ;;  %v1930_v1 = vsel %vm5242_vm11, %v5257_v41, %v1929_v13  ;;  %v2177_v41 = vld [vmem:[#allocation2 + $0x4c] sm:$0xf]  ;;  %v2179_v18 = vld [vmem:[#allocation2 + $0x58] sm:$0xf] }
 0x194   : > { %4427 = vmatpush3.bf16.msra.mxu1 %v2098_v26  ;;  %4428 = vmatprep.mubr.msk.bf16.mxu1 %vm451_vm4, %v4076_v44  ;;  %v2238_v5 = vshrl.u32 %v2173_v63, 16  ;;  %v2241_v20 = vshll.u32 %v2173_v63, 16  ;;  %v1966_v23 = vshll.u32 %v5268_v9, 16  ;;  %v2215_v28 = vrot.slane %v2213_v32, 5  ;;  %v2397_v29 = vld [vmem:[#allocation2 + $0x18] sm:$0x8] }
 0x195   : > { %4674 = vmatprep.subr.msk.bf16.mxu1 %vm464_vm0, %v4084_v45  ;;  %v1943_v2 = vsel %vm5242_vm11, %v5262_v19, %v1942_v12  ;;  %v1955_v26 = vor.u32 %v1953_v7, %v1952_v36  ;;  %v5300_v19 = vld [vmem:[%s5630_s3 + $0xc] sm:$0xf]  ;;  %v2203_v57 = vrot.slane %v2202_v8, 4  ;;  %v2219_v60 = vshll.u32 %v2170_v22, 16  ;;  %v5319_v49 = vld [vmem:[#allocation2 + $0x1c] sm:$0xf] }
 0x196   : > { %v4078_v25 = vcombine.low %v1930_v1, %v1943_v2  ;;  %v2254_v50 = vrot.slane %v2252_v10, 4  ;;  %v2257_v61 = vrot.slane %v2255_v21, 5  ;;  %v4066_v52 = vrot.slane %v1958_v14, 11  ;;  %v5321_v58 = vld [vmem:[#allocation2 + $0x10] sm:$0xf] }
 0x197   : > { %v1968_v48 = vor.u32 %v1966_v23, %v1965_v55  ;;  %v2226_v9 = vrot.slane %v2224_v62, 4  ;;  %v2229_v31 = vrot.slane %v2227_v35, 5  ;;  %v2233_v37 = vshll.u32 %v2172_v24, 16  ;;  %v2395_v63 = vld [vmem:[#allocation2 + $0xc] sm:$0x8] }
 0x198   : > { %v2240_v39 = vrot.slane %v2238_v5, 4  ;;  %v2243_v42 = vrot.slane %v2241_v20, 5  ;;  %v1956_v0 = vsel %vm5242_vm11, %v4065_v54, %v1955_v26  ;;  %v2216_v14 = vor.u32 %v2215_v28, %v2212_v30  ;;  %v2180_v21 = vld [vmem:[#allocation2 + $0x5c] sm:$0x1]  ;;  %v5331_v28 = vld [vmem:[#allocation2 + $0x34] sm:$0xf] }
 0x199   : > { %v2266_v43 = vshrl.u32 %v2177_v41, 16  ;;  %v2269_v44 = vshll.u32 %v2177_v41, 16  ;;  %v2208_v45 = vsel %vm4825_vm3, %v2203_v57, %v5280_v3  ;;  %v2221_v46 = vrot.slane %v2219_v60, 5  ;;  %v2401_v41 = vld [vmem:[#allocation2 + $0x30] sm:$0x8] }
 0x19a   : > { %v2258_v15 = vor.u32 %v2257_v61, %v2254_v50  ;;  %v2261_v11 = vshll.u32 %v2176_v33, 16  ;;  %v1969_v16 = vsel %vm5242_vm11, %v4066_v52, %v1968_v48  ;;  %v2230_v12 = vor.u32 %v2229_v31, %v2226_v9  ;;  %v5337_v52 = vld [vmem:[#allocation2 + $0x4c] sm:$0xf] }
 0x19b   : > { %4429 = vmatmul.mubr.msk.bf16.vlgmr.msra.gmra.mrb[4].mxu1 %vm451_vm4, %v4077_v17  ;;  %v2280_v38 = vshrl.u32 %v2179_v18, 16  ;;  %v2283_v47 = vshll.u32 %v2179_v18, 16  ;;  %v4079_v51 = vcombine.low %v1956_v0, %v1969_v16  ;;  %v2235_v4 = vrot.slane %v2233_v37, 5  ;;  %v5348_v18 = vld [vmem:[#allocation2 + $0x40] sm:$0xf] }
 0x19c   : > { %4437 = vmatpush3.bf16.msra.mxu1 %v2320_v6  ;;  %4432 = vmatprep.mubr.msk.bf16.mxu1 %vm451_vm4, %v4078_v25  ;;  %v2244_v53 = vor.u32 %v2243_v42, %v2240_v39  ;;  %v2247_v13 = vshll.u32 %v2174_v40, 16  ;;  %v2178_v6 = vld [vmem:[#allocation2 + $0x50] sm:$0x1]  ;;  %v4085_v54 = vcombine.low %v2194_v34, %v2208_v45  ;;  %v2217_v32 = vrot.slane %v2216_v14, 4  ;;  %v5342_v34 = vld [vmem:[#allocation2 + $0x28] sm:$0xf] }
 0x19d   : > { %4675 = vmatprep.subr.msk.bf16.mxu1 %vm464_vm0, %v5300_v19  ;;  %v2268_v3 = vrot.slane %v2266_v43, 4  ;;  %v2271_v36 = vrot.slane %v2269_v44, 5  ;;  %v2259_v59 = vrot.slane %v2258_v15, 4  ;;  %v2263_v62 = vrot.slane %v2261_v11, 5  ;;  %v2399_v40 = vld [vmem:[#allocation2 + $0x24] sm:$0x8] }
 0x19e   : > { %v2425_v2 = vshrl.u32 %v2397_v29, 16  ;;  %v2430_v8 = vshrl.u32 %v5319_v49, 16  ;;  %v2231_v10 = vrot.slane %v2230_v12, 4  ;;  %v2275_v7 = vshll.u32 %v2178_v6, 16  ;;  %v2405_v11 = vld [vmem:[#allocation2 + $0x48] sm:$0x8] }
 0x19f   : > { %v2282_v55 = vrot.slane %v2280_v38, 4  ;;  %v2285_v22 = vrot.slane %v2283_v47, 5  ;;  %v2245_v30 = vrot.slane %v2244_v53, 4  ;;  %v2249_v35 = vrot.slane %v2247_v13, 5  ;;  %v2403_v38 = vld [vmem:[#allocation2 + $0x3c] sm:$0x8] }
 0x1a0   : > { %v2417_v17 = vshrl.u32 %v5321_v58, 16  ;;  %v2222_v1 = vsel %vm4825_vm3, %v2217_v32, %v2221_v46  ;;  %v2272_v5 = vor.u32 %v2271_v36, %v2268_v3  ;;  %v2412_v20 = vshrl.u32 %v2395_v63, 16  ;;  %v5361_v32 = vld [vmem:[#allocation2 + $0x64] sm:$0xf]  ;;  %v3298_v56 = vld [vmem:[#allocation2 + $0x4c] sm:$0xf] }
 0x1a1   : > { %v2264_v23 = vsel %vm4825_vm3, %v2259_v59, %v2263_v62  ;;  %v2289_v25 = vshll.u32 %v2180_v21, 16  ;;  %v4094_v26 = vrot.slane %v2425_v2, 11  ;;  %v2432_v24 = vrot.slane %v2430_v8, 7  ;;  %v5369_v21 = vld [vmem:[#allocation2 + $0x58] sm:$0xf] }
 0x1a2   : > { %v2236_v57 = vsel %vm4825_vm3, %v2231_v10, %v2235_v4  ;;  %v2542_v60 = vsel %vm464_vm0, %v5300_v19, 0  ;;  %v2277_v50 = vrot.slane %v2275_v7, 5  ;;  %v2286_v61 = vor.u32 %v2285_v22, %v2282_v55  ;;  %v4110_v19 = vld [vmem:[%s5630_s3 + $0x10] sm:$0xf] }
 0x1a3   : > { %4433 = vmatmul.mubr.msk.bf16.gmra.mrb[0].mxu1 %vm451_vm4, %v4079_v51  ;;  %v4086_v48 = vcombine.low %v2222_v1, %v2236_v57  ;;  %v2250_v9 = vsel %vm4825_vm3, %v2245_v30, %v2249_v35  ;;  %v2419_v31 = vrot.slane %v2417_v17, 7  ;;  %v2433_v33 = vshll.u32 %v5319_v49, 16  ;;  %v2407_v57 = vld [vmem:[#allocation2 + $0x54] sm:$0x8] }
 0x1a4   : > { %4438 = vmatprep.mubr.msk.bf16.mxu1 %vm451_vm4, %v4085_v54  ;;  %v4087_v37 = vcombine.low %v2250_v9, %v2264_v23  ;;  %v2273_v39 = vrot.slane %v2272_v5, 4  ;;  %v2456_v42 = vshrl.u32 %v5331_v28, 16  ;;  %v2420_v0 = vshll.u32 %v5321_v58, 16  ;;  %v2409_v5 = vld [vmem:[#allocation2 + $0x60] sm:$0x8] }
 0x1a5   : > { %v2435_v14 = vor.u32 %v2433_v33, %v2432_v24  ;;  %v2451_v43 = vshrl.u32 %v2401_v41, 16  ;;  %v2482_v44 = vshrl.u32 %v5337_v52, 16  ;;  %v2287_v45 = vrot.slane %v2286_v61, 4 }
 0x1a6   : > { %v2291_v46 = vrot.slane %v2289_v25, 5  ;;  %v2443_v15 = vshrl.u32 %v5342_v34, 16  ;;  %v4093_v16 = vrot.slane %v2412_v20, 11  ;;  %v2422_v12 = vor.u32 %v2420_v0, %v2419_v31 }
 0x1a7   : > { %v2469_v47 = vshrl.u32 %v5348_v18, 16  ;;  %v2278_v29 = vsel %vm4825_vm3, %v2273_v39, %v2277_v50  ;;  %v2438_v51 = vshrl.u32 %v2399_v40, 16  ;;  %v2458_v4 = vrot.slane %v2456_v42, 7 }
 0x1a8   : > { %v2436_v53 = vsel %vm5242_vm11, %v4094_v26, %v2435_v14  ;;  %v4096_v13 = vrot.slane %v2451_v43, 11  ;;  %v2477_v6 = vshrl.u32 %v2405_v11, 16  ;;  %v2484_v54 = vrot.slane %v2482_v44, 7  ;;  %v4119_v44 = vld [vmem:[%s5630_s3 + $0x14] sm:$0xf] }
 0x1a9   : > { %v2292_v3 = vsel %vm4825_vm3, %v2287_v45, %v2291_v46  ;;  %v2445_v36 = vrot.slane %v2443_v15, 7  ;;  %v2459_v59 = vshll.u32 %v5331_v28, 16  ;;  %v2464_v62 = vshrl.u32 %v2403_v38, 16  ;;  %v2727_v11 = vld [vmem:[#allocation2 + $0x10] sm:$0xf] }
 0x1aa   : > { %v4088_v63 = vcombine.low %v2278_v29, %v2292_v3  ;;  %v2423_v2 = vsel %vm5242_vm11, %v4093_v16, %v2422_v12  ;;  %v2471_v8 = vrot.slane %v2469_v47, 7  ;;  %v2485_v10 = vshll.u32 %v5337_v52, 16  ;;  %v2737_v3 = vld [vmem:[#allocation2 + $0x4c] sm:$0xf] }
 0x1ab   : > { %4439 = vmatmul.mubr.msk.bf16.vlgmr.msra.gmra.mrb[4].mxu1 %vm451_vm4, %v4086_v48  ;;  %v4102_v7 = vcombine.low %v2423_v2, %v2436_v53  ;;  %v2446_v55 = vshll.u32 %v5342_v34, 16  ;;  %v2461_v22 = vor.u32 %v2459_v59, %v2458_v4  ;;  %v2508_v30 = vshrl.u32 %v5361_v32, 16 }
 0x1ac   : > { %4447 = vmatpush3.bf16.msra.mxu1 %v2542_v60  ;;  %4442 = vmatprep.mubr.msk.bf16.mxu1 %vm451_vm4, %v4087_v37  ;;  %v2472_v35 = vshll.u32 %v5348_v18, 16  ;;  %v4098_v17 = vrot.slane %v2477_v6, 11  ;;  %v2487_v1 = vor.u32 %v2485_v10, %v2484_v54  ;;  %v4095_v20 = vrot.slane %v2438_v51, 11  ;;  %v2733_v6 = vld [vmem:[#allocation2 + $0x34] sm:$0xf] }
 0x1ad   : > { %4676 = vmatprep.subr.msk.bf16.mxu1 %vm464_vm0, %v4110_v19  ;;  %v2448_v23 = vor.u32 %v2446_v55, %v2445_v36  ;;  %v2495_v25 = vshrl.u32 %v5369_v21, 16  ;;  %v4097_v26 = vrot.slane %v2464_v62, 11  ;;  %v2462_v60 = vsel %vm5242_vm11, %v4096_v13, %v2461_v22  ;;  %v2730_v54 = vld [vmem:[#allocation2 + $0x20] sm:$0x1]  ;;  %v2728_v36 = vld [vmem:[#allocation2 + $0x14] sm:$0x1] }
 0x1ae   : > { %v2474_v24 = vor.u32 %v2472_v35, %v2471_v8  ;;  %v2503_v50 = vshrl.u32 %v2409_v5, 16  ;;  %v2510_v61 = vrot.slane %v2508_v30, 7  ;;  %v2488_v41 = vsel %vm5242_vm11, %v4098_v17, %v2487_v1  ;;  %v2735_v10 = vld [vmem:[#allocation2 + $0x40] sm:$0xf] }
 0x1af   : > { %v2449_v48 = vsel %vm5242_vm11, %v4095_v20, %v2448_v23  ;;  %v2490_v9 = vshrl.u32 %v2407_v57, 16  ;;  %v2497_v31 = vrot.slane %v2495_v25, 7  ;;  %v2511_v33 = vshll.u32 %v5361_v32, 16  ;;  %v2732_v20 = vld [vmem:[#allocation2 + $0x2c] sm:$0x1] }
 0x1b0   : > { %v4103_v37 = vcombine.low %v2449_v48, %v2462_v60  ;;  %v2652_v39 = vsel %vm464_vm0, %v4110_v19, 0  ;;  %v2475_v42 = vsel %vm5242_vm11, %v4097_v26, %v2474_v24  ;;  %v2498_v14 = vshll.u32 %v5369_v21, 16  ;;  %v2729_v19 = vld [vmem:[#allocation2 + $0x1c] sm:$0xf]  ;;  %v2734_v23 = vld [vmem:[#allocation2 + $0x38] sm:$0x1] }
 0x1b1   : > { %v4104_v0 = vcombine.low %v2475_v42, %v2488_v41  ;;  %v4100_v40 = vrot.slane %v2503_v50, 11  ;;  %v2513_v43 = vor.u32 %v2511_v33, %v2510_v61  ;;  %v4099_v45 = vrot.slane %v2490_v9, 11  ;;  %v5410_v57 = vld [vmem:[%s5630_s3 + $0x18] sm:$0xf]  ;;  %v2741_v9 = vld [vmem:[#allocation2 + $0x64] sm:$0xf] }
 0x1b2   : > { %v2500_v46 = vor.u32 %v2498_v14, %v2497_v31  ;;  %v2758_v16 = vshrl.u32 %v2729_v19, 16  ;;  %v2761_v12 = vshll.u32 %v2729_v19, 16  ;;  %v2744_v29 = vshrl.u32 %v2727_v11, 16  ;;  %v2958_v61 = vld [vmem:[#allocation2 + $0x18] sm:$0x8] }
 0x1b3   : > { %4443 = vmatmul.mubr.msk.bf16.gmra.mrb[0].mxu1 %vm451_vm4, %v4088_v63  ;;  %v2514_v15 = vsel %vm5242_vm11, %v4100_v40, %v2513_v43  ;;  %v2747_v51 = vshll.u32 %v2727_v11, 16  ;;  %v4111_v4 = vcombine.low %v5321_v58, %v5319_v49  ;;  %v2731_v63 = vld [vmem:[#allocation2 + $0x28] sm:$0xf]  ;;  %v2786_v2 = vshrl.u32 %v2733_v6, 16  ;;  %v2738_v33 = vld [vmem:[#allocation2 + $0x50] sm:$0x1] }
 0x1b4   : > { %4448 = vmatprep.mubr.msk.bf16.mxu1 %vm451_vm4, %v4102_v7  ;;  %v2501_v38 = vsel %vm5242_vm11, %v4099_v45, %v2500_v46  ;;  %v2760_v53 = vrot.slane %v2758_v16, 4  ;;  %v2763_v13 = vrot.slane %v2761_v12, 5  ;;  %v2746_v59 = vrot.slane %v2744_v29, 4  ;;  %v2739_v14 = vld [vmem:[#allocation2 + $0x58] sm:$0xf] }
 0x1b5   : > { %v4105_v47 = vcombine.low %v2501_v38, %v2514_v15  ;;  %v2749_v62 = vrot.slane %v2747_v51, 5  ;;  %v2789_v8 = vshll.u32 %v2733_v6, 16  ;;  %v2767_v55 = vshll.u32 %v2730_v54, 16  ;;  %v5418_v51 = vld [vmem:[#allocation2 + $0x1c] sm:$0xf] }
 0x1b6   : > { %v2764_v7 = vor.u32 %v2763_v13, %v2760_v53  ;;  %v2814_v22 = vshrl.u32 %v2737_v3, 16  ;;  %v2817_v49 = vshll.u32 %v2737_v3, 16  ;;  %v2882_v58 = vsel %vm464_vm0, %v4119_v44, 0  ;;  %v2742_v54 = vld [vmem:[#allocation2 + $0x68] sm:$0x1] }
 0x1b7   : > { %v2753_v30 = vshll.u32 %v2728_v36, 16  ;;  %v2772_v35 = vshrl.u32 %v2731_v63, 16  ;;  %v2775_v17 = vshll.u32 %v2731_v63, 16  ;;  %v4112_v1 = vcombine.low %v5342_v34, %v5331_v28  ;;  %v5424_v63 = vld [vmem:[#allocation2 + $0x28] sm:$0xf] }
 0x1b8   : > { %v2750_v5 = vor.u32 %v2749_v62, %v2746_v59  ;;  %v2800_v25 = vshrl.u32 %v2735_v10, 16  ;;  %v2803_v26 = vshll.u32 %v2735_v10, 16  ;;  %v4113_v24 = vcombine.low %v5348_v18, %v5337_v52 }
 0x1b9   : > { %v2788_v60 = vrot.slane %v2786_v2, 4  ;;  %v2791_v50 = vrot.slane %v2789_v8, 5  ;;  %v2765_v41 = vrot.slane %v2764_v7, 4  ;;  %v2769_v28 = vrot.slane %v2767_v55, 5  ;;  %v2960_v7 = vld [vmem:[#allocation2 + $0x24] sm:$0x8] }
 0x1ba   : > { %v2816_v34 = vrot.slane %v2814_v22, 4  ;;  %v2819_v48 = vrot.slane %v2817_v49, 5  ;;  %v2774_v31 = vrot.slane %v2772_v35, 4  ;;  %v2777_v52 = vrot.slane %v2775_v17, 5  ;;  %v2740_v55 = vld [vmem:[#allocation2 + $0x5c] sm:$0x1] }
 0x1bb   : > { %4449 = vmatmul.mubr.msk.bf16.vlgmr.msra.gmra.mrb[4].mxu1 %vm451_vm4, %v4103_v37  ;;  %v2795_v18 = vshll.u32 %v2734_v23, 16  ;;  %v2751_v37 = vrot.slane %v2750_v5, 4  ;;  %v2802_v42 = vrot.slane %v2800_v25, 4  ;;  %v2781_v40 = vshll.u32 %v2732_v20, 16 }
 0x1bc   : > { %4457 = vmatpush3.bf16.msra.mxu1 %v2652_v39  ;;  %4452 = vmatprep.mubr.msk.bf16.mxu1 %vm451_vm4, %v4104_v0  ;;  %v2755_v39 = vrot.slane %v2753_v30, 5  ;;  %v2805_v0 = vrot.slane %v2803_v26, 5  ;;  %v2792_v43 = vor.u32 %v2791_v50, %v2788_v60  ;;  %v2842_v45 = vshrl.u32 %v2741_v9, 16  ;;  %v5434_v60 = vld [vmem:[#allocation2 + $0x40] sm:$0xf] }
 0x1bd   : > { %4677 = vmatprep.subr.msk.bf16.mxu1 %vm464_vm0, %v4119_v44  ;;  %v2736_v44 = vld [vmem:[#allocation2 + $0x44] sm:$0x1]  ;;  %v2845_v46 = vshll.u32 %v2741_v9, 16  ;;  %v2770_v19 = vsel %vm4825_vm3, %v2765_v41, %v2769_v28  ;;  %v2820_v15 = vor.u32 %v2819_v48, %v2816_v34  ;;  %v2823_v11 = vshll.u32 %v2738_v33, 16  ;;  %v5440_v34 = vld [vmem:[#allocation2 + $0x4c] sm:$0xf] }
 0x1be   : > { %v2975_v16 = vshrl.u32 %v2958_v61, 16  ;;  %v2778_v12 = vor.u32 %v2777_v52, %v2774_v31  ;;  %v2797_v38 = vrot.slane %v2795_v18, 5  ;;  %v2831_v29 = vshll.u32 %v2739_v14, 16  ;;  %v2962_v18 = vld [vmem:[#allocation2 + $0x30] sm:$0x8] }
 0x1bf   : > { %v2756_v53 = vsel %vm4825_vm3, %v2751_v37, %v2755_v39  ;;  %v2806_v13 = vor.u32 %v2805_v0, %v2802_v42  ;;  %v2809_v6 = vshll.u32 %v2736_v44, 16  ;;  %v2793_v36 = vrot.slane %v2792_v43, 4  ;;  %v5445_v33 = vld [vmem:[#allocation2 + $0x34] sm:$0xf]  ;;  %v2964_v37 = vld [vmem:[#allocation2 + $0x3c] sm:$0x8] }
 0x1c0   : > { %v4120_v3 = vcombine.low %v2756_v53, %v2770_v19  ;;  %v2844_v59 = vrot.slane %v2842_v45, 4  ;;  %v2847_v62 = vrot.slane %v2845_v46, 5  ;;  %v2783_v2 = vrot.slane %v2781_v40, 5  ;;  %v2968_v44 = vld [vmem:[#allocation2 + $0x54] sm:$0x8] }
 0x1c1   : > { %v2821_v8 = vrot.slane %v2820_v15, 4  ;;  %v2825_v10 = vrot.slane %v2823_v11, 5  ;;  %v2833_v49 = vrot.slane %v2831_v29, 5  ;;  %v2807_v30 = vrot.slane %v2806_v13, 4  ;;  %v5458_v46 = vld [vmem:[#allocation2 + $0x70] sm:$0xf] }
 0x1c2   : > { %v2811_v35 = vrot.slane %v2809_v6, 5  ;;  %v2993_v17 = vshrl.u32 %v5424_v63, 16  ;;  %v2848_v5 = vor.u32 %v2847_v62, %v2844_v59  ;;  %v4128_v20 = vrot.slane %v2975_v16, 11  ;;  %v5469_v59 = vld [vmem:[#allocation2 + $0x64] sm:$0xf] }
 0x1c3   : > { %4453 = vmatmul.mubr.msk.bf16.gmra.mrb[0].mxu1 %vm451_vm4, %v4105_v47  ;;  %v2828_v47 = vshrl.u32 %v2739_v14, 16  ;;  %v2826_v23 = vsel %vm4825_vm3, %v2821_v8, %v2825_v10  ;;  %v2837_v25 = vshll.u32 %v2740_v55, 16  ;;  %v3105_v61 = vsel %vm464_vm0, %v5410_v57, 0  ;;  %v5453_v14 = vld [vmem:[#allocation2 + $0x58] sm:$0xf] }
 0x1c4   : > { %4458 = vmatprep.mubr.msk.bf16.mxu1 %vm451_vm4, %v4111_v4  ;;  %v4114_v4 = vcombine.low %v5369_v21, %v5361_v32  ;;  %v2980_v32 = vshrl.u32 %v5418_v51, 16  ;;  %v2779_v21 = vrot.slane %v2778_v12, 4  ;;  %v2812_v9 = vsel %vm4825_vm3, %v2807_v30, %v2811_v35  ;;  %v2966_v12 = vld [vmem:[#allocation2 + $0x48] sm:$0x8]  ;;  %v2970_v35 = vld [vmem:[#allocation2 + $0x60] sm:$0x8] }
 0x1c5   : > { %v2830_v22 = vrot.slane %v2828_v47, 4  ;;  %v2983_v31 = vshll.u32 %v5418_v51, 16  ;;  %v2995_v52 = vrot.slane %v2993_v17, 7  ;;  %v4122_v39 = vcombine.low %v2812_v9, %v2826_v23  ;;  %v2972_v17 = vld [vmem:[#allocation2 + $0x6c] sm:$0x8] }
 0x1c6   : > { %v2982_v26 = vrot.slane %v2980_v32, 7  ;;  %v2784_v50 = vsel %vm4825_vm3, %v2779_v21, %v2783_v2  ;;  %v2849_v42 = vrot.slane %v2848_v5, 4  ;;  %v3019_v0 = vshrl.u32 %v5434_v60, 16 }
 0x1c7   : > { %v2834_v41 = vor.u32 %v2833_v49, %v2830_v22  ;;  %v2996_v43 = vshll.u32 %v5424_v63, 16  ;;  %v3032_v45 = vshrl.u32 %v5440_v34, 16  ;;  %v2839_v15 = vrot.slane %v2837_v25, 5 }
 0x1c8   : > { %v2985_v40 = vor.u32 %v2983_v31, %v2982_v26  ;;  %v3006_v11 = vshrl.u32 %v5445_v33, 16  ;;  %v3014_v16 = vshrl.u32 %v2964_v37, 16  ;;  %v3045_v29 = vshrl.u32 %v5453_v14, 16 }
 0x1c9   : > { %v2835_v19 = vrot.slane %v2834_v41, 4  ;;  %v2998_v47 = vor.u32 %v2996_v43, %v2995_v52  ;;  %v3001_v53 = vshrl.u32 %v2962_v18, 16  ;;  %v3021_v13 = vrot.slane %v3019_v0, 7 }
 0x1ca   : > { %v3040_v6 = vshrl.u32 %v2968_v44, 16  ;;  %v3071_v62 = vshrl.u32 %v5458_v46, 16  ;;  %v3008_v8 = vrot.slane %v3006_v11, 7  ;;  %v4131_v10 = vrot.slane %v3014_v16, 11 }
 0x1cb   : > { %4459 = vmatmul.mubr.msk.bf16.vlgmr.msra.gmra.mrb[4].mxu1 %vm451_vm4, %v4112_v1  ;;  %v2798_v1 = vsel %vm4825_vm3, %v2793_v36, %v2797_v38  ;;  %v3034_v36 = vrot.slane %v3032_v45, 7  ;;  %v2840_v2 = vsel %vm4825_vm3, %v2835_v19, %v2839_v15  ;;  %v3035_v55 = vshll.u32 %v5440_v34, 16  ;;  %v3304_v45 = vld [vmem:[#allocation2 + $0x70] sm:$0xf] }
 0x1cc   : > { %4467 = vmatpush3.bf16.msra.mxu1 %v2882_v58  ;;  %4462 = vmatprep.mubr.msk.bf16.mxu1 %vm451_vm4, %v4113_v24  ;;  %v2851_v58 = vshll.u32 %v2742_v54, 16  ;;  %v2988_v24 = vshrl.u32 %v2960_v7, 16  ;;  %v4121_v48 = vcombine.low %v2784_v50, %v2798_v1  ;;  %v2986_v54 = vsel %vm5242_vm11, %v4128_v20, %v2985_v40 }
 0x1cd   : > { %4678 = vmatprep.subr.msk.bf16.mxu1 %vm464_vm0, %v5410_v57  ;;  %v5450_v57 = vld [vmem:[%s5630_s3 + $0x1c] sm:$0xf]  ;;  %v3022_v7 = vshll.u32 %v5434_v60, 16  ;;  %v3047_v22 = vrot.slane %v3045_v29, 7  ;;  %v3058_v1 = vshrl.u32 %v5469_v59, 16  ;;  %v3037_v20 = vor.u32 %v3035_v55, %v3034_v36 }
 0x1ce   : > { %v2853_v28 = vrot.slane %v2851_v58, 5  ;;  %v4129_v38 = vrot.slane %v2988_v24, 11  ;;  %v3009_v58 = vshll.u32 %v5445_v33, 16  ;;  %v3048_v23 = vshll.u32 %v5453_v14, 16  ;;  %v3296_v55 = vld [vmem:[#allocation2 + $0x40] sm:$0xf] }
 0x1cf   : > { %v3024_v30 = vor.u32 %v3022_v7, %v3021_v13  ;;  %v4130_v25 = vrot.slane %v3001_v53, 11  ;;  %v4133_v24 = vrot.slane %v3040_v6, 11  ;;  %v3066_v41 = vshrl.u32 %v2972_v17, 16 }
 0x1d0   : > { %v2999_v21 = vsel %vm5242_vm11, %v4129_v38, %v2998_v47  ;;  %v3011_v26 = vor.u32 %v3009_v58, %v3008_v8  ;;  %v3050_v50 = vor.u32 %v3048_v23, %v3047_v22  ;;  %v3073_v9 = vrot.slane %v3071_v62, 7  ;;  %v3290_v38 = vld [vmem:[#allocation2 + $0x1c] sm:$0xf] }
 0x1d1   : > { %v4137_v49 = vcombine.low %v2986_v54, %v2999_v21  ;;  %v3074_v31 = vshll.u32 %v5458_v46, 16  ;;  %v3061_v37 = vshll.u32 %v5469_v59, 16  ;;  %v3215_v40 = vsel %vm464_vm0, %v5450_v57, 0  ;;  %v3294_v54 = vld [vmem:[#allocation2 + $0x34] sm:$0xf] }
 0x1d2   : > { %v3012_v18 = vsel %vm5242_vm11, %v4130_v25, %v3011_v26  ;;  %v3051_v43 = vsel %vm5242_vm11, %v4133_v24, %v3050_v50  ;;  %v4135_v11 = vrot.slane %v3066_v41, 11  ;;  %v3405_v53 = vshrl.u32 %v3304_v45, 16  ;;  %v3297_v21 = vld [vmem:[#allocation2 + $0x44] sm:$0x1]  ;;  %v3303_v25 = vld [vmem:[#allocation2 + $0x68] sm:$0x1] }
 0x1d3   : > { %4463 = vmatmul.mubr.msk.bf16.gmra.mrb[0].mxu1 %vm451_vm4, %v4114_v4  ;;  %v2854_v4 = vsel %vm4825_vm3, %v2849_v42, %v2853_v28  ;;  %v3025_v28 = vsel %vm5242_vm11, %v4131_v10, %v3024_v30  ;;  %v3293_v42 = vld [vmem:[#allocation2 + $0x2c] sm:$0x1]  ;;  %v3076_v16 = vor.u32 %v3074_v31, %v3073_v9  ;;  %v3307_v13 = vshrl.u32 %v3290_v38, 16  ;;  %v5513_v26 = vld [vmem:[#allocation2 + $0x74] sm:$0x1] }
 0x1d4   : > { %4468 = vmatprep.mubr.msk.bf16.mxu1 %vm451_vm4, %v4120_v3  ;;  %v3027_v3 = vshrl.u32 %v2966_v12, 16  ;;  %v4123_v32 = vcombine.low %v2840_v2, %v2854_v4  ;;  %v4138_v0 = vcombine.low %v3012_v18, %v3025_v28  ;;  %v4154_v12 = vld [vmem:[%s5630_s3 + $0x20] sm:$0xf]  ;;  %v3330_v29 = vshll.u32 %v3293_v42, 16  ;;  %v3295_v4 = vld [vmem:[#allocation2 + $0x38] sm:$0x1] }
 0x1d5   : > { %v3310_v6 = vshll.u32 %v3290_v38, 16  ;;  %v3077_v62 = vsel %vm5242_vm11, %v4135_v11, %v3076_v16  ;;  %v3408_v2 = vshll.u32 %v3304_v45, 16  ;;  %v3335_v22 = vshrl.u32 %v3294_v54, 16  ;;  %v3302_v11 = vld [vmem:[#allocation2 + $0x64] sm:$0xf] }
 0x1d6   : > { %v4132_v5 = vrot.slane %v3027_v3, 11  ;;  %v3301_v3 = vld [vmem:[#allocation2 + $0x5c] sm:$0x1]  ;;  %v5509_v30 = vrot.slane %v3405_v53, 4  ;;  %v3309_v17 = vrot.slane %v3307_v13, 4  ;;  %v3358_v23 = vshll.u32 %v3297_v21, 16 }
 0x1d7   : > { %v3386_v58 = vshll.u32 %v3301_v3, 16  ;;  %v3410_v24 = vrot.slane %v3408_v2, 5  ;;  %v3349_v41 = vshrl.u32 %v3296_v55, 16  ;;  %v3352_v28 = vshll.u32 %v3296_v55, 16  ;;  %v4163_v38 = vld [vmem:[%s4788_s10 + $0x8] sm:$0xf] }
 0x1d8   : > { %v3038_v52 = vsel %vm5242_vm11, %v4132_v5, %v3037_v20  ;;  %v3338_v5 = vshll.u32 %v3294_v54, 16  ;;  %v4146_v20 = vcombine.low %v5418_v51, %v5424_v63  ;;  %v3363_v31 = vshrl.u32 %v3298_v56, 16  ;;  %v4165_v53 = vld [vmem:[%s4788_s10 + $0x10] sm:$0xf]  ;;  %v5535_v3 = vld [vmem:[%s5632_s5] sm:$0xf] }
 0x1d9   : > { %v4139_v19 = vcombine.low %v3038_v52, %v3051_v43  ;;  %v3366_v52 = vshll.u32 %v3298_v56, 16  ;;  %v5519_v51 = vrot.slane %v3386_v58, 5  ;;  %v3337_v18 = vrot.slane %v3335_v22, 4 }
 0x1da   : > { %v3400_v42 = vshll.u32 %v3303_v25, 16  ;;  %v3411_v16 = vor.u32 %v3410_v24, %v5509_v30  ;;  %v4148_v13 = vcombine.low %v5440_v34, %v5453_v14  ;;  %v3537_v2 = vshrl.u32 %v4163_v38, 16  ;;  %v4166_v25 = vld [vmem:[%s4788_s10 + $0x14] sm:$0x1]  ;;  %v4167_v24 = vld [vmem:[%s4788_s10 + $0x18] sm:$0xf] }
 0x1db   : > { %4469 = vmatmul.mubr.msk.bf16.vlgmr.msra.gmra.mrb[4].mxu1 %vm451_vm4, %v4121_v48  ;;  %v3060_v48 = vrot.slane %v3058_v1, 7  ;;  %v3312_v1 = vrot.slane %v3310_v6, 5 }
 0x1dc   : > { %4477 = vmatpush3.bf16.msra.mxu1 %v3105_v61  ;;  %4472 = vmatprep.mubr.msk.bf16.mxu1 %vm451_vm4, %v4122_v39  ;;  %v3053_v61 = vshrl.u32 %v2970_v35, 16  ;;  %v3291_v39 = vld [vmem:[#allocation2 + $0x20] sm:$0x1]  ;;  %v5538_v21 = vrot.slane %v3400_v42, 5  ;;  %v3539_v56 = vrot.slane %v3537_v2, 4  ;;  %v3565_v42 = vshrl.u32 %v4167_v24, 16 }
 0x1dd   : > { %4679 = vmatprep.subr.msk.bf16.mxu1 %vm464_vm0, %v5450_v57  ;;  %v3063_v15 = vor.u32 %v3061_v37, %v3060_v48  ;;  %v3316_v47 = vshll.u32 %v3291_v39, 16  ;;  %v3292_v57 = vld [vmem:[#allocation2 + $0x28] sm:$0xf]  ;;  %v3299_v48 = vld [vmem:[#allocation2 + $0x50] sm:$0x1]  ;;  %v3313_v63 = vor.u32 %v3312_v1, %v3309_v17  ;;  %v3340_v37 = vrot.slane %v3338_v5, 5 }
 0x1de   : > { %v4134_v44 = vrot.slane %v3053_v61, 11  ;;  %v3321_v10 = vshrl.u32 %v3292_v57, 16  ;;  %v3324_v7 = vshll.u32 %v3292_v57, 16  ;;  %v3300_v39 = vld [vmem:[#allocation2 + $0x58] sm:$0xf]  ;;  %v3372_v43 = vshll.u32 %v3299_v48, 16 }
 0x1df   : > { %v5505_v8 = vrot.slane %v3316_v47, 5  ;;  %v3365_v47 = vrot.slane %v3363_v31, 4  ;;  %v3377_v57 = vshrl.u32 %v3300_v39, 16  ;;  %v3314_v6 = vrot.slane %v3313_v63, 4  ;;  %v4164_v17 = vld [vmem:[%s4788_s10 + $0xc] sm:$0x1] }
 0x1e0   : > { %v3064_v36 = vsel %vm5242_vm11, %v4134_v44, %v3063_v15  ;;  %v3323_v50 = vrot.slane %v3321_v10, 4  ;;  %v3326_v61 = vrot.slane %v3324_v7, 5  ;;  %v3414_v44 = vshll.u32 %v5513_v26, 16  ;;  %v4169_v48 = vld [vmem:[%s4788_s10 + $0x20] sm:$0xf] }
 0x1e1   : > { %v4140_v35 = vcombine.low %v3064_v36, %v3077_v62  ;;  %v3354_v15 = vrot.slane %v3352_v28, 5  ;;  %v3341_v54 = vor.u32 %v3340_v37, %v3337_v18  ;;  %v3391_v36 = vshrl.u32 %v3302_v11, 16 }
 0x1e2   : > { %v3327_v45 = vor.u32 %v3326_v61, %v3323_v50  ;;  %v3394_v62 = vshll.u32 %v3302_v11, 16  ;;  %v3540_v10 = vshll.u32 %v4163_v38, 16  ;;  %v3379_v55 = vrot.slane %v3377_v57, 4 }
 0x1e3   : > { %4473 = vmatmul.mubr.msk.bf16.gmra.mrb[0].mxu1 %vm451_vm4, %v4123_v32  ;;  %v5507_v32 = vrot.slane %v3330_v29, 5  ;;  %v3368_v29 = vrot.slane %v3366_v52, 5  ;;  %v3342_v58 = vrot.slane %v3341_v54, 4  ;;  %v3374_v30 = vrot.slane %v3372_v43, 5  ;;  %v4173_v43 = vld [vmem:[%s4788_s10 + $0x30] sm:$0xf] }
 0x1e4   : > { %4478 = vmatprep.mubr.msk.bf16.mxu1 %vm451_vm4, %v4137_v49  ;;  %v3344_v49 = vshll.u32 %v3295_v4, 16  ;;  %v3380_v4 = vshll.u32 %v3300_v39, 16  ;;  %v3328_v7 = vrot.slane %v3327_v45, 4  ;;  %v3393_v1 = vrot.slane %v3391_v36, 4 }
 0x1e5   : > { %v3369_v14 = vor.u32 %v3368_v29, %v3365_v47  ;;  %v3396_v5 = vrot.slane %v3394_v62, 5  ;;  %v3546_v28 = vshll.u32 %v4164_v17, 16  ;;  %v4149_v31 = vcombine.low %v5469_v59, %v5458_v46  ;;  %v4172_v17 = vld [vmem:[%s4788_s10 + $0x2c] sm:$0x1] }
 0x1e6   : > { %v5517_v9 = vrot.slane %v3344_v49, 5  ;;  %v3382_v22 = vrot.slane %v3380_v4, 5  ;;  %v3319_v49 = vsel %vm4825_vm3, %v3314_v6, %v5505_v8  ;;  %v3560_v39 = vshll.u32 %v4166_v25, 16  ;;  %v4168_v6 = vld [vmem:[%s4788_s10 + $0x1c] sm:$0x1] }
 0x1e7   : > { %v3370_v61 = vrot.slane %v3369_v14, 4  ;;  %v3397_v18 = vor.u32 %v3396_v5, %v3393_v1  ;;  %v3582_v46 = vshll.u32 %v4169_v48, 16  ;;  %v3548_v11 = vrot.slane %v3546_v28, 5  ;;  %v4174_v1 = vld [vmem:[%s4788_s10 + $0x34] sm:$0x1] }
 0x1e8   : > { %v3347_v63 = vsel %vm4825_vm3, %v3342_v58, %v5517_v9  ;;  %v3607_v47 = vshrl.u32 %v4173_v43, 16  ;;  %v3610_v29 = vshll.u32 %v4173_v43, 16  ;;  %v3674_v2 = vsel %vm464_vm0, %v5535_v3, 0 }
 0x1e9   : > { %v3375_v9 = vsel %vm4825_vm3, %v3370_v61, %v3374_v30  ;;  %v3398_v57 = vrot.slane %v3397_v18, 4  ;;  %v3584_v36 = vrot.slane %v3582_v46, 5  ;;  %v3574_v30 = vshll.u32 %v4168_v6, 16 }
 0x1ea   : > { %v3616_v61 = vshll.u32 %v4174_v1, 16 }
 0x1eb   : > { %4479 = vmatmul.mubr.msk.bf16.vlgmr.msra.gmra.mrb[4].mxu1 %vm451_vm4, %v4138_v0  ;;  %v3445_v0 = vsel %vm464_vm0, %v4154_v12, 0  ;;  %v3576_v28 = vrot.slane %v3574_v30, 5 }
 0x1ec   : > { %4487 = vmatpush3.bf16.msra.mxu1 %v3215_v40  ;;  %4482 = vmatprep.mubr.msk.bf16.mxu1 %vm451_vm4, %v4139_v19  ;;  %v5522_v40 = vrot.slane %v3358_v23, 5  ;;  %v3351_v19 = vrot.slane %v3349_v41, 4  ;;  %v3333_v23 = vsel %vm4825_vm3, %v3328_v7, %v5507_v32  ;;  %v3383_v41 = vor.u32 %v3382_v22, %v3379_v55 }
 0x1ed   : > { %4680 = vmatprep.subr.msk.bf16.mxu1 %vm464_vm0, %v4154_v12  ;;  %v4147_v12 = vcombine.low %v5445_v33, %v5434_v60  ;;  %v3551_v60 = vshrl.u32 %v4165_v53, 16  ;;  %v3554_v33 = vshll.u32 %v4165_v53, 16  ;;  %v4155_v52 = vcombine.low %v3319_v49, %v3333_v23  ;;  %v4177_v49 = vld [vmem:[%s4788_s10 + $0x40] sm:$0xf] }
 0x1ee   : > { %v3355_v34 = vor.u32 %v3354_v15, %v3351_v19  ;;  %v5560_v32 = vrot.slane %v3414_v44, 5  ;;  %v3568_v19 = vshll.u32 %v4167_v24, 16  ;;  %v3579_v15 = vshrl.u32 %v4169_v48, 16 }
 0x1ef   : > { %v3553_v26 = vrot.slane %v3551_v60, 4  ;;  %v3556_v8 = vrot.slane %v3554_v33, 5  ;;  %v3384_v44 = vrot.slane %v3383_v41, 4  ;;  %v3562_v53 = vrot.slane %v3560_v39, 5  ;;  %v4170_v60 = vld [vmem:[%s4788_s10 + $0x24] sm:$0x1] }
 0x1f0   : > { %v3356_v50 = vrot.slane %v3355_v34, 4  ;;  %v3570_v54 = vrot.slane %v3568_v19, 5  ;;  %v4175_v33 = vld [vmem:[%s4788_s10 + $0x38] sm:$0xf]  ;;  %v3609_v55 = vrot.slane %v3607_v47, 4  ;;  %v3612_v22 = vrot.slane %v3610_v29, 5 }
 0x1f1   : > { %v3557_v45 = vor.u32 %v3556_v8, %v3553_v26  ;;  %v3621_v23 = vshrl.u32 %v4175_v33, 16  ;;  %v3635_v25 = vshrl.u32 %v4177_v49, 16  ;;  %v3638_v26 = vshll.u32 %v4177_v49, 16 }
 0x1f2   : > { %v3361_v59 = vsel %vm4825_vm3, %v3356_v50, %v5522_v40  ;;  %v3581_v40 = vrot.slane %v3579_v15, 4  ;;  %v3602_v24 = vshll.u32 %v4172_v17, 16  ;;  %v3613_v50 = vor.u32 %v3612_v22, %v3609_v55  ;;  %v4178_v15 = vld [vmem:[%s4788_s10 + $0x44] sm:$0x1] }
 0x1f3   : > { %4483 = vmatmul.mubr.msk.bf16.gmra.mrb[0].mxu1 %vm451_vm4, %v4140_v35  ;;  %v5546_v35 = vrot.slane %v3411_v16, 4  ;;  %v4156_v62 = vcombine.low %v3347_v63, %v3361_v59  ;;  %v3623_v18 = vrot.slane %v3621_v23, 4  ;;  %v3637_v39 = vrot.slane %v3635_v25, 4 }
 0x1f4   : > { %4488 = vmatprep.mubr.msk.bf16.mxu1 %vm451_vm4, %v4146_v20  ;;  %v3542_v20 = vrot.slane %v3540_v10, 5  ;;  %v3389_v10 = vsel %vm4825_vm3, %v3384_v44, %v5519_v51  ;;  %v3604_v43 = vrot.slane %v3602_v24, 5  ;;  %v3618_v19 = vrot.slane %v3616_v61, 5 }
 0x1f5   : > { %v3417_v7 = vsel %vm4825_vm3, %v5546_v35, %v5560_v32  ;;  %v4157_v58 = vcombine.low %v3375_v9, %v3389_v10  ;;  %v4176_v32 = vld [vmem:[%s4788_s10 + $0x3c] sm:$0x1] }
 0x1f6   : > { %v3543_v37 = vor.u32 %v3542_v20, %v3539_v56  ;;  %v3585_v56 = vor.u32 %v3584_v36, %v3581_v40  ;;  %v3588_v20 = vshll.u32 %v4170_v60, 16  ;;  %v3630_v59 = vshll.u32 %v4176_v32, 16  ;;  %v4187_v60 = vld [vmem:[%s5631_s4] ss:$0 sm:$0xff] }
 0x1f8   : > { %v3544_v4 = vrot.slane %v3543_v37, 4  ;;  %v3590_v63 = vrot.slane %v3588_v20, 5 }
 0x1fa   : > { %v3549_v51 = vsel %vm4825_vm3, %v3544_v4, %v3548_v11 }
 0x1fb   : > { %4489 = vmatmul.mubr.msk.bf16.vlgmr.msra.gmra.mrb[4].mxu1 %vm451_vm4, %v4147_v12  ;;  %v3567_v12 = vrot.slane %v3565_v42, 4  ;;  %v3640_v42 = vrot.slane %v3638_v26, 5 }
 0x1fc   : > { %4497 = vmatpush3.bf16.msra.mxu1 %v3445_v0  ;;  %4492 = vmatprep.mubr.msk.bf16.mxu1 %vm451_vm4, %v4148_v13  ;;  %v4171_v0 = vld [vmem:[%s4788_s10 + $0x28] sm:$0xf]  ;;  %v3558_v13 = vrot.slane %v3557_v45, 4  ;;  %v3614_v45 = vrot.slane %v3613_v50, 4 }
 0x1fd   : > { %4681 = vmatprep.subr.msk.bf16.mxu1 %vm464_vm0, %v5535_v3  ;;  %v3593_v16 = vshrl.u32 %v4171_v0, 16  ;;  %v3596_v38 = vshll.u32 %v4171_v0, 16  ;;  %v3403_v3 = vsel %vm4825_vm3, %v3398_v57, %v5538_v21  ;;  %v3571_v5 = vor.u32 %v3570_v54, %v3567_v12 }
 0x1fe   : > { %v3563_v35 = vsel %vm4825_vm3, %v3558_v13, %v3562_v53  ;;  %v3624_v21 = vshll.u32 %v4175_v33, 16  ;;  %v4158_v41 = vcombine.low %v3403_v3, %v3417_v7  ;;  %v3641_v11 = vor.u32 %v3640_v42, %v3637_v39 }
 0x1ff   : > { %v3595_v34 = vrot.slane %v3593_v16, 4  ;;  %v3598_v14 = vrot.slane %v3596_v38, 5  ;;  %v4179_v48 = vcombine.low %v3549_v51, %v3563_v35  ;;  %v3644_v16 = vshll.u32 %v4178_v15, 16 }
 0x200   : > { %v3626_v37 = vrot.slane %v3624_v21, 5  ;;  %v3619_v47 = vsel %vm4825_vm3, %v3614_v45, %v3618_v19  ;;  %v3632_v57 = vrot.slane %v3630_v59, 5  ;;  %v3642_v12 = vrot.slane %v3641_v11, 4 }
 0x201   : > { %v3599_v8 = vor.u32 %v3598_v14, %v3595_v34  ;;  %v3646_v13 = vrot.slane %v3644_v16, 5 }
 0x202   : > { %v3627_v44 = vor.u32 %v3626_v37, %v3623_v18 }
 0x203   : > { %4493 = vmatmul.mubr.msk.bf16.gmra.mrb[0].mxu1 %vm451_vm4, %v4149_v31  ;;  %v3572_v31 = vrot.slane %v3571_v5, 4  ;;  %v3600_v0 = vrot.slane %v3599_v8, 4  ;;  %v3647_v54 = vsel %vm4825_vm3, %v3642_v12, %v3646_v13 }
 0x204   : > { %4498 = vmatprep.mubr.msk.bf16.mxu1 %vm451_vm4, %v4155_v52  ;;  %v3586_v52 = vrot.slane %v3585_v56, 4  ;;  %v3628_v53 = vrot.slane %v3627_v44, 4 }
 0x205   : > { %v3577_v46 = vsel %vm4825_vm3, %v3572_v31, %v3576_v28  ;;  %v3605_v38 = vsel %vm4825_vm3, %v3600_v0, %v3604_v43 }
 0x206   : > { %v3591_v9 = vsel %vm4825_vm3, %v3586_v52, %v3590_v63  ;;  %v4181_v4 = vcombine.low %v3605_v38, %v3619_v47  ;;  %v3633_v6 = vsel %vm4825_vm3, %v3628_v53, %v3632_v57 }
 0x207   : > { %v4180_v29 = vcombine.low %v3577_v46, %v3591_v9  ;;  %v4182_v40 = vcombine.low %v3633_v6, %v3647_v54 }
 0x20b   : > { %4499 = vmatmul.mubr.msk.bf16.vlgmr.msra.gmra.mrb[4].mxu1 %vm451_vm4, %v4156_v62 }
 0x20c   : > { %4507 = vmatpush3.bf16.msra.mxu1 %v3674_v2  ;;  %4502 = vmatprep.mubr.msk.bf16.mxu1 %vm451_vm4, %v4157_v58 }
 0x213   : > { %4503 = vmatmul.mubr.msk.bf16.gmra.mrb[0].mxu1 %vm451_vm4, %v4158_v41 }
 0x214   : > { %4508 = vmatprep.mubr.msk.bf16.mxu1 %vm451_vm4, %v4179_v48 }
 0x21b   : > { %4509 = vmatmul.mubr.msk.bf16.vlgmr.msra.gmra.mrb[4].mxu1 %vm451_vm4, %v4180_v29 }
 0x21c   : > { %4512 = vmatprep.mubr.msk.bf16.mxu1 %vm451_vm4, %v4181_v4 }
 0x223   : > { %4513 = vmatmul.mubr.msk.bf16.gmra.mrb[0].mxu1 %vm451_vm4, %v4182_v40 }
 0x25e   : > { %v4420_v36 = vpop.f32.mrb[8].mxu0 }
 0x25f   : > { %v2042_v62 = vpop.f32.mrb[9].mxu0 }
 0x260   : > { %v4421_v2 = vpop.f32.mrb[10].mxu0 }
 0x261   : > { %v2045_v10 = vpop.f32.mrb[11].mxu0 }
 0x2ee   : > { %v4510_v7 = vpop.f32.mrb[4].mxu1 }
 0x2ef   : > { %v4518_v33 = vadd.f32 %v4510_v7, %v4420_v36  ;;  %v3710_v34 = vpop.f32.mrb[5].mxu1 }
 0x2f0   : > { %v4520_v14 = vadd.f32 %v3710_v34, %v2042_v62  ;;  %v4511_v55 = vpop.f32.mrb[6].mxu1 }
 0x2f1   : > { %v4519_v22 = vadd.f32 %v4518_v33, %v4187_v60  ;;  %v4522_v49 = vadd.f32 %v4511_v55, %v4421_v2  ;;  %v3713_v58 = vpop.f32.mrb[7].mxu1 }
 0x2f2   : > { %v4521_v3 = vadd.f32 %v4520_v14, %v4187_v60  ;;  %v4524_v51 = vadd.f32 %v3713_v58, %v2045_v10 }
 0x2f3   : > { %v3773_v30 = vadd.f32 %v4519_v22, %v4188_v27  ;;  %v4523_v17 = vadd.f32 %v4522_v49, %v4187_v60 }
 0x2f4   : > { %v3771_v1 = vadd.f32 %v4521_v3, %v4188_v27  ;;  %v4525_v35 = vadd.f32 %v4524_v51, %v4187_v60 }
 0x2f5   : > { %v3774_v5 = vadd.f32 %v4523_v17, %v4188_v27  ;;  %v3781_v23 = vmax.f32 %v3773_v30, 0.0 }
 0x2f6   : > { %v3772_v56 = vadd.f32 %v4525_v35, %v4188_v27  ;;  %v4514_v20 = vpop.f32.mrb[0].mxu1  ;;  %v3779_v8 = vmax.f32 %v3771_v1, 0.0 }
 0x2f7   : > { %v3782_v21 = vmax.f32 %v3774_v5, 0.0  ;;  %v4526_v25 = vadd.f32 %v4514_v20, %v4187_v60  ;;  %v3726_v26 = vpop.f32.mrb[1].mxu1 }
 0x2f8   : > { %v3780_v24 = vmax.f32 %v3772_v56, 0.0  ;;  %v4527_v50 = vadd.f32 %v4187_v60, %v3726_v26  ;;  %v4515_v61 = vpop.f32.mrb[2].mxu1 }
 0x2f9   : > { %v4216_v41 = vpack.c.bf16 %v3782_v21, %v3781_v23  ;;  %v3777_v28 = vadd.f32 %v4526_v25, %v4188_v27  ;;  %v4528_v48 = vadd.f32 %v4515_v61, %v4187_v60  ;;  %v3729_v31 = vpop.f32.mrb[3].mxu1 }
 0x2fa   : > { %v4211_v52 = vpack.c.bf16 %v3780_v24, %v3779_v8  ;;  %v3775_v63 = vadd.f32 %v4527_v50, %v4188_v27  ;;  %v4529_v32 = vadd.f32 %v4187_v60, %v3729_v31 }
 0x2fb   : > { %4228 = vst [vmem:[%s278_s13 + $0x8] sm:$0xff] %v4216_v41   ;;  %v3778_v18 = vadd.f32 %v4528_v48, %v4188_v27  ;;  %v3785_v39 = vmax.f32 %v3777_v28, 0.0 }
 0x2fc   : > { %4212 = vst [vmem:[%s278_s13] sm:$0xff] %v4211_v52   ;;  %v3776_v37 = vadd.f32 %v4529_v32, %v4188_v27  ;;  %v3783_v0 = vmax.f32 %v3775_v63, 0.0 }
 0x2fd   : > { %v3786_v42 = vmax.f32 %v3778_v18, 0.0 }
 0x2fe   : > { %v3784_v43 = vmax.f32 %v3776_v37, 0.0 }
 0x2ff   : > { %v4226_v45 = vpack.c.bf16 %v3786_v42, %v3785_v39 }
 0x300   : > { %v4221_v19 = vpack.c.bf16 %v3784_v43, %v3783_v0 }
 0x301   : > { %4230 = vst [vmem:[%s278_s13 + $0x18] sm:$0xff] %v4226_v45  }
 0x302   : > { %4229 = vst [vmem:[%s278_s13 + $0x10] sm:$0xff] %v4221_v19  }
 0x303 PF: > { %s17_s24 = sadd.s32 1, %s4722_s24  }
 0x304   : > { %p14_p4 = scmp.ge.s32.totalorder %s17_s24, 4  }
 0x306   :  { %16 = sbr.rel (!%p14_p4) target bundleno = 1 (0x1), region = 99 }

</bundles_post_ra>
